<compile_context>
chip_gen: v7x
topology: tpu7x:2x2x1
jax: 0.10.0
libtpu: 0.0.40
codegen_flags: <defaults>
</compile_context>

<pallas_src>
import jax
import jax.numpy as jnp
from jax import lax
from jax.experimental import pallas as pl
from jax.experimental.pallas import tpu as pltpu

_BN_EPS = 1e-5
_LANE = 128                       # lane-dense channel padding
_MM_DTYPE = jnp.bfloat16          # MXU operand dtype (accumulation stays f32);
                                  # set to jnp.float32 for <1e-3 accuracy.
_Y1_DTYPE = jnp.bfloat16          # stage1 -> stage2 activation storage
_VMEM_LIMIT = 32 * 1024 * 1024    # safe on v5e/v6e/v7x; usage here is ~2 MiB


# ------------------------- shared conv body -------------------------

def _im2col_matmul(pad_ref, col_ref, w_ref, H, W, Cp):
    """Write the 9 shifted taps into a (H*W, 9*Cp) VMEM im2col scratch (lane-
    aligned stores) and do a single deep-K MXU matmul against (9*Cp, Cp)."""
    for k in range(9):                                   # static unroll, 3x3 taps
        dy, dx = divmod(k, 3)
        tile = pad_ref[dy:dy + H, dx:dx + W, :].reshape(H * W, Cp)
        col_ref[:, k * Cp:(k + 1) * Cp] = tile.astype(col_ref.dtype)
    return jnp.dot(col_ref[...], w_ref[...], preferred_element_type=jnp.float32)


# ------------------------- Pallas kernels -------------------------

def _conv1_stats_kernel(x_ref, w_ref, y_ref, sum_ref, sumsq_ref, pad_ref, col_ref):
    """conv1 (3x3, pad 1) + per-image BN partial stats. Halo built in VMEM."""
    _, H, W, Cp = x_ref.shape
    pad_ref[...] = jnp.zeros_like(pad_ref)               # zero halo
    pad_ref[1:H + 1, 1:W + 1, :] = x_ref[0]              # interior = input tile
    acc = _im2col_matmul(pad_ref, col_ref, w_ref, H, W, Cp)   # (H*W, Cp) f32
    y_ref[...] = acc.reshape(1, H, W, Cp).astype(y_ref.dtype)
    # per-step partial statistics (summed over the batch in XLA afterwards)
    sum_ref[...] = jnp.sum(acc, axis=0).reshape(1, 1, Cp)
    sumsq_ref[...] = jnp.sum(acc * acc, axis=0).reshape(1, 1, Cp)


def _bn_relu_conv2_stats_kernel(y1_ref, scale_ref, shift_ref, w_ref,
                                y2_ref, sum_ref, sumsq_ref, pad_ref, col_ref):
    """Fused bn1(affine)+ReLU, then conv2 (3x3, pad 1) + bn2 partial stats."""
    _, H, W, Cp = y1_ref.shape
    scale = scale_ref[...].reshape(1, 1, Cp)
    shift = shift_ref[...].reshape(1, 1, Cp)
    act = jnp.maximum(y1_ref[0].astype(jnp.float32) * scale + shift, 0.0)
    pad_ref[...] = jnp.zeros_like(pad_ref)               # halo stays 0 => conv2
    pad_ref[1:H + 1, 1:W + 1, :] = act                   # sees zero padding
    acc = _im2col_matmul(pad_ref, col_ref, w_ref, H, W, Cp)
    y2_ref[...] = acc.reshape(1, H, W, Cp).astype(y2_ref.dtype)
    sum_ref[...] = jnp.sum(acc, axis=0).reshape(1, 1, Cp)
    sumsq_ref[...] = jnp.sum(acc * acc, axis=0).reshape(1, 1, Cp)


def _bn_add_relu_kernel(y2_ref, x_ref, scale_ref, shift_ref, o_ref):
    """bn2(affine) + residual add + ReLU (lane-dense elementwise epilogue)."""
    Cp = o_ref.shape[3]
    scale = scale_ref[...].reshape(1, 1, 1, Cp)
    shift = shift_ref[...].reshape(1, 1, 1, Cp)
    o_ref[...] = jnp.maximum(
        y2_ref[...].astype(jnp.float32) * scale + shift + x_ref[...], 0.0)


# ------------------------- pallas_call wrappers -------------------------

def _conv_cost(n, h, wd, cp, in_bytes, out_dt):
    flops = 2 * n * h * wd * cp * (9 * cp)
    bytes_accessed = (in_bytes
                      + n * h * wd * cp * jnp.dtype(out_dt).itemsize
                      + 2 * n * cp * 4)
    return pl.CostEstimate(flops=flops, transcendentals=0,
                           bytes_accessed=bytes_accessed)


def _call_conv1_stats(x, w, n, h, wd, cp):
    return pl.pallas_call(
        _conv1_stats_kernel,
        grid=(n,),
        in_specs=[
            pl.BlockSpec((1, h, wd, cp), lambda i: (i, 0, 0, 0)),   # input tile
            pl.BlockSpec((9 * cp, cp), lambda i: (0, 0)),           # resident W
        ],
        out_specs=[
            pl.BlockSpec((1, h, wd, cp), lambda i: (i, 0, 0, 0)),
            pl.BlockSpec((1, 1, cp), lambda i: (i, 0, 0)),          # sum partial
            pl.BlockSpec((1, 1, cp), lambda i: (i, 0, 0)),          # sumsq partial
        ],
        out_shape=[
            jax.ShapeDtypeStruct((n, h, wd, cp), _Y1_DTYPE),
            jax.ShapeDtypeStruct((n, 1, cp), jnp.float32),
            jax.ShapeDtypeStruct((n, 1, cp), jnp.float32),
        ],
        scratch_shapes=[
            pltpu.VMEM((h + 2, wd + 2, cp), jnp.float32),           # halo'd tile
            pltpu.VMEM((h * wd, 9 * cp), _MM_DTYPE),                # im2col, K=9*Cp
        ],
        compiler_params=pltpu.CompilerParams(
            dimension_semantics=("parallel",),                      # megacore ok
            vmem_limit_bytes=_VMEM_LIMIT),
        cost_estimate=_conv_cost(n, h, wd, cp,
                                 x.size * x.dtype.itemsize
                                 + w.size * w.dtype.itemsize, _Y1_DTYPE),
    )(x, w)


def _call_bn_relu_conv2_stats(y1, scale1, shift1, w, n, h, wd, cp):
    return pl.pallas_call(
        _bn_relu_conv2_stats_kernel,
        grid=(n,),
        in_specs=[
            pl.BlockSpec((1, h, wd, cp), lambda i: (i, 0, 0, 0)),
            pl.BlockSpec((1, cp), lambda i: (0, 0)),                # resident bn1
            pl.BlockSpec((1, cp), lambda i: (0, 0)),
            pl.BlockSpec((9 * cp, cp), lambda i: (0, 0)),           # resident W
        ],
        out_specs=[
            pl.BlockSpec((1, h, wd, cp), lambda i: (i, 0, 0, 0)),
            pl.BlockSpec((1, 1, cp), lambda i: (i, 0, 0)),
            pl.BlockSpec((1, 1, cp), lambda i: (i, 0, 0)),
        ],
        out_shape=[
            jax.ShapeDtypeStruct((n, h, wd, cp), jnp.float32),
            jax.ShapeDtypeStruct((n, 1, cp), jnp.float32),
            jax.ShapeDtypeStruct((n, 1, cp), jnp.float32),
        ],
        scratch_shapes=[
            pltpu.VMEM((h + 2, wd + 2, cp), jnp.float32),
            pltpu.VMEM((h * wd, 9 * cp), _MM_DTYPE),
        ],
        compiler_params=pltpu.CompilerParams(
            dimension_semantics=("parallel",),
            vmem_limit_bytes=_VMEM_LIMIT),
        cost_estimate=_conv_cost(n, h, wd, cp,
                                 y1.size * y1.dtype.itemsize
                                 + w.size * w.dtype.itemsize, jnp.float32),
    )(y1, scale1, shift1, w)


def _call_bn_add_relu(y2, xc, scale2, shift2, n, h, wd, cp):
    flops = 4 * n * h * wd * cp
    bytes_accessed = 3 * n * h * wd * cp * 4 + 4 * cp * 4
    return pl.pallas_call(
        _bn_add_relu_kernel,
        grid=(n,),
        in_specs=[
            pl.BlockSpec((1, h, wd, cp), lambda i: (i, 0, 0, 0)),
            pl.BlockSpec((1, h, wd, cp), lambda i: (i, 0, 0, 0)),
            pl.BlockSpec((1, cp), lambda i: (0, 0)),
            pl.BlockSpec((1, cp), lambda i: (0, 0)),
        ],
        out_specs=pl.BlockSpec((1, h, wd, cp), lambda i: (i, 0, 0, 0)),
        out_shape=jax.ShapeDtypeStruct((n, h, wd, cp), jnp.float32),
        compiler_params=pltpu.CompilerParams(
            dimension_semantics=("parallel",),
            vmem_limit_bytes=_VMEM_LIMIT),
        cost_estimate=pl.CostEstimate(flops=flops, transcendentals=0,
                                      bytes_accessed=bytes_accessed),
    )(y2, xc, scale2, shift2)


# ------------------------- JAX glue -------------------------

def _weight_to_matrix(w_oihw, cp):
    """(Cout,Cin,3,3) -> (9*Cp, Cp): row k*Cp+cin (tap k = 3*dy+dx) -> out ch."""
    cout, cin, kh, kw = w_oihw.shape
    w = jnp.transpose(w_oihw, (2, 3, 1, 0)).reshape(kh * kw, cin, cout)
    w = jnp.pad(w, ((0, 0), (0, cp - cin), (0, cp - cout)))
    return w.reshape(kh * kw * cp, cp).astype(_MM_DTYPE)


def _bn_scale_shift(s, ss, gamma_p, beta_p, m):
    """Finalize BN batch stats from summed per-channel sum/sumsq (tiny XLA op).
    gamma_p is zero-padded, so padded lanes get scale == 0 (robust to bf16)."""
    mean = s / m
    var = jnp.maximum(ss / m - mean * mean, 0.0)
    inv_std = lax.rsqrt(var + _BN_EPS)
    scale = gamma_p.reshape(1, -1) * inv_std
    shift = beta_p.reshape(1, -1) - mean * scale
    return scale, shift


@jax.jit
def basic_block_forward(x_nchw, w1_oihw, g1, b1, w2_oihw, g2, b2):
    """BasicBlock forward (stride=1, no downsample). (N,C,H,W) f32 -> (N,C,H,W)."""
    N, C, H, W = x_nchw.shape
    Cp = -(-C // _LANE) * _LANE                       # lane-dense channel pad

    x = jnp.transpose(x_nchw, (0, 2, 3, 1))           # NCHW -> NHWC
    xc = jnp.pad(x, ((0, 0), (0, 0), (0, 0), (0, Cp - C)))   # channel pad only

    w1m = _weight_to_matrix(w1_oihw, Cp)
    w2m = _weight_to_matrix(w2_oihw, Cp)
    g1p = jnp.pad(g1, (0, Cp - C))                    # zero pad => scale 0 on pad
    b1p = jnp.pad(b1, (0, Cp - C))
    g2p = jnp.pad(g2, (0, Cp - C))
    b2p = jnp.pad(b2, (0, Cp - C))

    M = N * H * W

    # Stage 1: conv1 + per-image bn1 partial stats.
    y1, s1, ss1 = _call_conv1_stats(xc, w1m, N, H, W, Cp)
    scale1, shift1 = _bn_scale_shift(jnp.sum(s1, axis=0), jnp.sum(ss1, axis=0),
                                     g1p, b1p, M)

    # Stage 2: bn1+relu fused into conv2's in-VMEM halo/im2col, + bn2 stats.
    y2, s2, ss2 = _call_bn_relu_conv2_stats(y1, scale1, shift1, w2m, N, H, W, Cp)
    scale2, shift2 = _bn_scale_shift(jnp.sum(s2, axis=0), jnp.sum(ss2, axis=0),
                                     g2p, b2p, M)

    # Stage 3: bn2 + identity add + relu (identity path: Cin==Cout, stride 1).
    out = _call_bn_add_relu(y2, xc, scale2, shift2, N, H, W, Cp)

    return jnp.transpose(out[..., :C], (0, 3, 1, 2))  # drop ch pad, NHWC -> NCHW


# ------------------------- pure-JAX reference (for checking) -------------------------

def _ref_forward(x_nchw, w1, g1, b1, w2, g2, b2):
    def conv(x, w):
        return lax.conv_general_dilated(
            x, w, window_strides=(1, 1), padding=((1, 1), (1, 1)),
            dimension_numbers=("NCHW", "OIHW", "NCHW"))

    def bn(y, g, b):
        mean = y.mean(axis=(0, 2, 3), keepdims=True)
        var = ((y - mean) ** 2).mean(axis=(0, 2, 3), keepdims=True)
        yn = (y - mean) * lax.rsqrt(var + _BN_EPS)
        return yn * g.reshape(1, -1, 1, 1) + b.reshape(1, -1, 1, 1)

    out = jnp.maximum(bn(conv(x_nchw, w1), g1, b1), 0.0)
    out = bn(conv(out, w2), g2, b2) + x_nchw
    return jnp.maximum(out, 0.0)


# ------------------------- main -------------------------

if __name__ == "__main__":
    key = jax.random.PRNGKey(0)
    N, C, H, W = 2, 4, 16, 16          # inplanes = planes = 4, stride = 1
    k_x, k_w1, k_w2 = jax.random.split(key, 3)

    x = jax.random.normal(k_x, (N, C, H, W), dtype=jnp.float32)
    # Conv weights (OIHW, bias=False). Deterministic synthetic init.
    w1 = jax.random.normal(k_w1, (C, C, 3, 3), dtype=jnp.float32) * 0.1
    w2 = jax.random.normal(k_w2, (C, C, 3, 3), dtype=jnp.float32) * 0.1
    # BatchNorm affine params: PyTorch default init (weight=1, bias=0).
    g1 = jnp.ones((C,), jnp.float32)
    b1 = jnp.zeros((C,), jnp.float32)
    g2 = jnp.ones((C,), jnp.float32)
    b2 = jnp.zeros((C,), jnp.float32)

    out = jax.block_until_ready(basic_block_forward(x, w1, g1, b1, w2, g2, b2))
    ref = _ref_forward(x, w1, g1, b1, w2, g2, b2)

    assert out.shape == (N, C, H, W)
    # f32 operands reproduce the reference to <1e-3; bf16 MXU operands (the
    # perf-reviewed default) are renormalized by BN, so allow ~1e-1 max abs.
    tol = 1e-3 if _MM_DTYPE == jnp.float32 else 1e-1
    err = float(jnp.max(jnp.abs(out - ref)))
    assert err < tol, f"mismatch vs JAX reference: {err}"

    print("KERNEL_OK")
</pallas_src>

<mosaic_0001>
module attributes {stable_mosaic.version = 11 : i64} {
  func.func @_conv1_stats_kernel(%arg0: i32, %arg1: memref<1x16x16x128xf32, #tpu.memory_space<vmem>>, %arg2: memref<1152x128xbf16, #tpu.memory_space<vmem>>, %arg3: memref<1x16x16x128xbf16, #tpu.memory_space<vmem>>, %arg4: memref<1x1x128xf32, #tpu.memory_space<vmem>>, %arg5: memref<1x1x128xf32, #tpu.memory_space<vmem>>, %arg6: memref<18x18x128xf32, #tpu.memory_space<vmem>>, %arg7: memref<256x1152xbf16, #tpu.memory_space<vmem>>) attributes {dimension_semantics = [#tpu.dimension_semantics<parallel>], iteration_bounds = array<i64: 2>, scalar_prefetch = 0 : i64, scratch_operands = 2 : i64, tpu.core_type = #tpu.core_type<tc>, window_params = [{transform_indices = @transform_0, window_bounds = array<i64: 1, 16, 16, 128>}, {pipeline_mode = #tpu.pipeline_mode<synchronous>, transform_indices = @transform_1, window_bounds = array<i64: 1152, 128>}, {transform_indices = @transform_2, window_bounds = array<i64: 1, 16, 16, 128>}, {transform_indices = @transform_3, window_bounds = array<i64: 1, 1, 128>}, {transform_indices = @transform_4, window_bounds = array<i64: 1, 1, 128>}]} {
    %cst = arith.constant 0.000000e+00 : f32
    %0 = vector.broadcast %cst : f32 to vector<18x18x128xf32>
    %c0 = arith.constant 0 : index
    %c0_0 = arith.constant 0 : index
    %c0_1 = arith.constant 0 : index
    %1 = vector.load %arg6[%c0, %c0_0, %c0_1] : memref<18x18x128xf32, #tpu.memory_space<vmem>>, vector<18x18x128xf32>
    tpu.vector_store %arg6[%c0, %c0_0, %c0_1], %0 {strides = array<i32>} : memref<18x18x128xf32, #tpu.memory_space<vmem>>, vector<18x18x128xf32>,
    %c0_2 = arith.constant 0 : index
    %c0_3 = arith.constant 0 : index
    %c0_4 = arith.constant 0 : index
    %c0_5 = arith.constant 0 : index
    %2 = vector.load %arg1[%c0_2, %c0_3, %c0_4, %c0_5] : memref<1x16x16x128xf32, #tpu.memory_space<vmem>>, vector<1x16x16x128xf32>
    %3 = vector.shape_cast %2 : vector<1x16x16x128xf32> to vector<16x16x128xf32>
    %c1 = arith.constant 1 : index
    %c1_6 = arith.constant 1 : index
    %c0_7 = arith.constant 0 : index
    %4 = vector.load %arg6[%c1, %c1_6, %c0_7] : memref<18x18x128xf32, #tpu.memory_space<vmem>>, vector<16x16x128xf32>
    tpu.vector_store %arg6[%c1, %c1_6, %c0_7], %3 {strides = array<i32>} : memref<18x18x128xf32, #tpu.memory_space<vmem>>, vector<16x16x128xf32>,
    %c0_8 = arith.constant 0 : index
    %c0_9 = arith.constant 0 : index
    %c0_10 = arith.constant 0 : index
    %5 = vector.load %arg6[%c0_8, %c0_9, %c0_10] : memref<18x18x128xf32, #tpu.memory_space<vmem>>, vector<16x16x128xf32>
    %6 = vector.shape_cast %5 : vector<16x16x128xf32> to vector<256x128xf32>
    %7 = arith.truncf %6 : vector<256x128xf32> to vector<256x128xbf16>
    %c0_11 = arith.constant 0 : index
    %c0_12 = arith.constant 0 : index
    %8 = vector.load %arg7[%c0_11, %c0_12] : memref<256x1152xbf16, #tpu.memory_space<vmem>>, vector<256x128xbf16>
    tpu.vector_store %arg7[%c0_11, %c0_12], %7 {strides = array<i32>} : memref<256x1152xbf16, #tpu.memory_space<vmem>>, vector<256x128xbf16>,
    %c0_13 = arith.constant 0 : index
    %c1_14 = arith.constant 1 : index
    %c0_15 = arith.constant 0 : index
    %9 = vector.load %arg6[%c0_13, %c1_14, %c0_15] : memref<18x18x128xf32, #tpu.memory_space<vmem>>, vector<16x16x128xf32>
    %10 = vector.shape_cast %9 : vector<16x16x128xf32> to vector<256x128xf32>
    %11 = arith.truncf %10 : vector<256x128xf32> to vector<256x128xbf16>
    %c0_16 = arith.constant 0 : index
    %c128 = arith.constant 128 : index
    %12 = vector.load %arg7[%c0_16, %c128] : memref<256x1152xbf16, #tpu.memory_space<vmem>>, vector<256x128xbf16>
    tpu.vector_store %arg7[%c0_16, %c128], %11 {strides = array<i32>} : memref<256x1152xbf16, #tpu.memory_space<vmem>>, vector<256x128xbf16>,
    %c0_17 = arith.constant 0 : index
    %c2 = arith.constant 2 : index
    %c0_18 = arith.constant 0 : index
    %13 = vector.load %arg6[%c0_17, %c2, %c0_18] : memref<18x18x128xf32, #tpu.memory_space<vmem>>, vector<16x16x128xf32>
    %14 = vector.shape_cast %13 : vector<16x16x128xf32> to vector<256x128xf32>
    %15 = arith.truncf %14 : vector<256x128xf32> to vector<256x128xbf16>
    %c0_19 = arith.constant 0 : index
    %c256 = arith.constant 256 : index
    %16 = vector.load %arg7[%c0_19, %c256] : memref<256x1152xbf16, #tpu.memory_space<vmem>>, vector<256x128xbf16>
    tpu.vector_store %arg7[%c0_19, %c256], %15 {strides = array<i32>} : memref<256x1152xbf16, #tpu.memory_space<vmem>>, vector<256x128xbf16>,
    %c1_20 = arith.constant 1 : index
    %c0_21 = arith.constant 0 : index
    %c0_22 = arith.constant 0 : index
    %17 = vector.load %arg6[%c1_20, %c0_21, %c0_22] : memref<18x18x128xf32, #tpu.memory_space<vmem>>, vector<16x16x128xf32>
    %18 = vector.shape_cast %17 : vector<16x16x128xf32> to vector<256x128xf32>
    %19 = arith.truncf %18 : vector<256x128xf32> to vector<256x128xbf16>
    %c0_23 = arith.constant 0 : index
    %c384 = arith.constant 384 : index
    %20 = vector.load %arg7[%c0_23, %c384] : memref<256x1152xbf16, #tpu.memory_space<vmem>>, vector<256x128xbf16>
    tpu.vector_store %arg7[%c0_23, %c384], %19 {strides = array<i32>} : memref<256x1152xbf16, #tpu.memory_space<vmem>>, vector<256x128xbf16>,
    %c1_24 = arith.constant 1 : index
    %c1_25 = arith.constant 1 : index
    %c0_26 = arith.constant 0 : index
    %21 = vector.load %arg6[%c1_24, %c1_25, %c0_26] : memref<18x18x128xf32, #tpu.memory_space<vmem>>, vector<16x16x128xf32>
    %22 = vector.shape_cast %21 : vector<16x16x128xf32> to vector<256x128xf32>
    %23 = arith.truncf %22 : vector<256x128xf32> to vector<256x128xbf16>
    %c0_27 = arith.constant 0 : index
    %c512 = arith.constant 512 : index
    %24 = vector.load %arg7[%c0_27, %c512] : memref<256x1152xbf16, #tpu.memory_space<vmem>>, vector<256x128xbf16>
    tpu.vector_store %arg7[%c0_27, %c512], %23 {strides = array<i32>} : memref<256x1152xbf16, #tpu.memory_space<vmem>>, vector<256x128xbf16>,
    %c1_28 = arith.constant 1 : index
    %c2_29 = arith.constant 2 : index
    %c0_30 = arith.constant 0 : index
    %25 = vector.load %arg6[%c1_28, %c2_29, %c0_30] : memref<18x18x128xf32, #tpu.memory_space<vmem>>, vector<16x16x128xf32>
    %26 = vector.shape_cast %25 : vector<16x16x128xf32> to vector<256x128xf32>
    %27 = arith.truncf %26 : vector<256x128xf32> to vector<256x128xbf16>
    %c0_31 = arith.constant 0 : index
    %c640 = arith.constant 640 : index
    %28 = vector.load %arg7[%c0_31, %c640] : memref<256x1152xbf16, #tpu.memory_space<vmem>>, vector<256x128xbf16>
    tpu.vector_store %arg7[%c0_31, %c640], %27 {strides = array<i32>} : memref<256x1152xbf16, #tpu.memory_space<vmem>>, vector<256x128xbf16>,
    %c2_32 = arith.constant 2 : index
    %c0_33 = arith.constant 0 : index
    %c0_34 = arith.constant 0 : index
    %29 = vector.load %arg6[%c2_32, %c0_33, %c0_34] : memref<18x18x128xf32, #tpu.memory_space<vmem>>, vector<16x16x128xf32>
    %30 = vector.shape_cast %29 : vector<16x16x128xf32> to vector<256x128xf32>
    %31 = arith.truncf %30 : vector<256x128xf32> to vector<256x128xbf16>
    %c0_35 = arith.constant 0 : index
    %c768 = arith.constant 768 : index
    %32 = vector.load %arg7[%c0_35, %c768] : memref<256x1152xbf16, #tpu.memory_space<vmem>>, vector<256x128xbf16>
    tpu.vector_store %arg7[%c0_35, %c768], %31 {strides = array<i32>} : memref<256x1152xbf16, #tpu.memory_space<vmem>>, vector<256x128xbf16>,
    %c2_36 = arith.constant 2 : index
    %c1_37 = arith.constant 1 : index
    %c0_38 = arith.constant 0 : index
    %33 = vector.load %arg6[%c2_36, %c1_37, %c0_38] : memref<18x18x128xf32, #tpu.memory_space<vmem>>, vector<16x16x128xf32>
    %34 = vector.shape_cast %33 : vector<16x16x128xf32> to vector<256x128xf32>
    %35 = arith.truncf %34 : vector<256x128xf32> to vector<256x128xbf16>
    %c0_39 = arith.constant 0 : index
    %c896 = arith.constant 896 : index
    %36 = vector.load %arg7[%c0_39, %c896] : memref<256x1152xbf16, #tpu.memory_space<vmem>>, vector<256x128xbf16>
    tpu.vector_store %arg7[%c0_39, %c896], %35 {strides = array<i32>} : memref<256x1152xbf16, #tpu.memory_space<vmem>>, vector<256x128xbf16>,
    %c2_40 = arith.constant 2 : index
    %c2_41 = arith.constant 2 : index
    %c0_42 = arith.constant 0 : index
    %37 = vector.load %arg6[%c2_40, %c2_41, %c0_42] : memref<18x18x128xf32, #tpu.memory_space<vmem>>, vector<16x16x128xf32>
    %38 = vector.shape_cast %37 : vector<16x16x128xf32> to vector<256x128xf32>
    %39 = arith.truncf %38 : vector<256x128xf32> to vector<256x128xbf16>
    %c0_43 = arith.constant 0 : index
    %c1024 = arith.constant 1024 : index
    %40 = vector.load %arg7[%c0_43, %c1024] : memref<256x1152xbf16, #tpu.memory_space<vmem>>, vector<256x128xbf16>
    tpu.vector_store %arg7[%c0_43, %c1024], %39 {strides = array<i32>} : memref<256x1152xbf16, #tpu.memory_space<vmem>>, vector<256x128xbf16>,
    %c0_44 = arith.constant 0 : index
    %c0_45 = arith.constant 0 : index
    %41 = vector.load %arg7[%c0_44, %c0_45] : memref<256x1152xbf16, #tpu.memory_space<vmem>>, vector<256x1152xbf16>
    %c0_46 = arith.constant 0 : index
    %c0_47 = arith.constant 0 : index
    %42 = vector.load %arg2[%c0_46, %c0_47] : memref<1152x128xbf16, #tpu.memory_space<vmem>>, vector<1152x128xbf16>
    %cst_48 = arith.constant dense<0.000000e+00> : vector<256x128xf32>
    %43 = tpu.matmul %41, %42, %cst_48 {dimension_numbers = #tpu.dot_dimension_numbers<[1], [0], [0], [1], [0, 0, 1, 1], [], []>} : vector<256x1152xbf16>, vector<1152x128xbf16>, vector<256x128xf32> -> vector<256x128xf32>
    %44 = vector.shape_cast %43 : vector<256x128xf32> to vector<1x16x16x128xf32>
    %45 = arith.truncf %44 : vector<1x16x16x128xf32> to vector<1x16x16x128xbf16>
    %c0_49 = arith.constant 0 : index
    %c0_50 = arith.constant 0 : index
    %c0_51 = arith.constant 0 : index
    %c0_52 = arith.constant 0 : index
    %46 = vector.load %arg3[%c0_49, %c0_50, %c0_51, %c0_52] : memref<1x16x16x128xbf16, #tpu.memory_space<vmem>>, vector<1x16x16x128xbf16>
    tpu.vector_store %arg3[%c0_49, %c0_50, %c0_51, %c0_52], %45 {strides = array<i32>} : memref<1x16x16x128xbf16, #tpu.memory_space<vmem>>, vector<1x16x16x128xbf16>,
    %cst_53 = arith.constant dense<0.000000e+00> : vector<128xf32>
    %47 = vector.multi_reduction <add>, %43, %cst_53 [0] : vector<256x128xf32> to vector<128xf32>
    %48 = vector.shape_cast %47 : vector<128xf32> to vector<1x1x128xf32>
    %c0_54 = arith.constant 0 : index
    %c0_55 = arith.constant 0 : index
    %c0_56 = arith.constant 0 : index
    %49 = vector.load %arg4[%c0_54, %c0_55, %c0_56] : memref<1x1x128xf32, #tpu.memory_space<vmem>>, vector<1x1x128xf32>
    tpu.vector_store %arg4[%c0_54, %c0_55, %c0_56], %48 {strides = array<i32>} : memref<1x1x128xf32, #tpu.memory_space<vmem>>, vector<1x1x128xf32>,
    %50 = arith.mulf %43, %43 : vector<256x128xf32>
    %cst_57 = arith.constant dense<0.000000e+00> : vector<128xf32>
    %51 = vector.multi_reduction <add>, %50, %cst_57 [0] : vector<256x128xf32> to vector<128xf32>
    %52 = vector.shape_cast %51 : vector<128xf32> to vector<1x1x128xf32>
    %c0_58 = arith.constant 0 : index
    %c0_59 = arith.constant 0 : index
    %c0_60 = arith.constant 0 : index
    %53 = vector.load %arg5[%c0_58, %c0_59, %c0_60] : memref<1x1x128xf32, #tpu.memory_space<vmem>>, vector<1x1x128xf32>
    tpu.vector_store %arg5[%c0_58, %c0_59, %c0_60], %52 {strides = array<i32>} : memref<1x1x128xf32, #tpu.memory_space<vmem>>, vector<1x1x128xf32>,
    return
  }
  func.func @transform_0(%arg0: i32) -> (i32, i32, i32, i32) {
    %c0_i32 = arith.constant 0 : i32
    %c0_i32_0 = arith.constant 0 : i32
    %c0_i32_1 = arith.constant 0 : i32
    %c0_i32_2 = arith.constant 0 : i32
    return %arg0, %c0_i32, %c0_i32_0, %c0_i32_1 : i32, i32, i32, i32
  }
  func.func @transform_1(%arg0: i32) -> (i32, i32) {
    %c0_i32 = arith.constant 0 : i32
    %c0_i32_0 = arith.constant 0 : i32
    %c0_i32_1 = arith.constant 0 : i32
    return %c0_i32, %c0_i32_0 : i32, i32
  }
  func.func @transform_2(%arg0: i32) -> (i32, i32, i32, i32) {
    %c0_i32 = arith.constant 0 : i32
    %c0_i32_0 = arith.constant 0 : i32
    %c0_i32_1 = arith.constant 0 : i32
    %c0_i32_2 = arith.constant 0 : i32
    return %arg0, %c0_i32, %c0_i32_0, %c0_i32_1 : i32, i32, i32, i32
  }
  func.func @transform_3(%arg0: i32) -> (i32, i32, i32) {
    %c0_i32 = arith.constant 0 : i32
    %c0_i32_0 = arith.constant 0 : i32
    %c0_i32_1 = arith.constant 0 : i32
    return %arg0, %c0_i32, %c0_i32_0 : i32, i32, i32
  }
  func.func @transform_4(%arg0: i32) -> (i32, i32, i32) {
    %c0_i32 = arith.constant 0 : i32
    %c0_i32_0 = arith.constant 0 : i32
    %c0_i32_1 = arith.constant 0 : i32
    return %arg0, %c0_i32, %c0_i32_0 : i32, i32, i32
  }
}

module attributes {stable_mosaic.version = 11 : i64} {
  func.func @_bn_add_relu_kernel(%arg0: i32, %arg1: memref<1x16x16x128xf32, #tpu.memory_space<vmem>>, %arg2: memref<1x16x16x128xf32, #tpu.memory_space<vmem>>, %arg3: memref<1x128xf32, #tpu.memory_space<vmem>>, %arg4: memref<1x128xf32, #tpu.memory_space<vmem>>, %arg5: memref<1x16x16x128xf32, #tpu.memory_space<vmem>>) attributes {dimension_semantics = [#tpu.dimension_semantics<parallel>], iteration_bounds = array<i64: 2>, scalar_prefetch = 0 : i64, scratch_operands = 0 : i64, tpu.core_type = #tpu.core_type<tc>, window_params = [{transform_indices = @transform_0, window_bounds = array<i64: 1, 16, 16, 128>}, {transform_indices = @transform_1, window_bounds = array<i64: 1, 16, 16, 128>}, {pipeline_mode = #tpu.pipeline_mode<synchronous>, transform_indices = @transform_2, window_bounds = array<i64: 1, 128>}, {pipeline_mode = #tpu.pipeline_mode<synchronous>, transform_indices = @transform_3, window_bounds = array<i64: 1, 128>}, {transform_indices = @transform_4, window_bounds = array<i64: 1, 16, 16, 128>}]} {
    %c0 = arith.constant 0 : index
    %c0_0 = arith.constant 0 : index
    %0 = vector.load %arg3[%c0, %c0_0] : memref<1x128xf32, #tpu.memory_space<vmem>>, vector<1x128xf32>
    %1 = vector.shape_cast %0 : vector<1x128xf32> to vector<1x1x1x128xf32>
    %c0_1 = arith.constant 0 : index
    %c0_2 = arith.constant 0 : index
    %2 = vector.load %arg4[%c0_1, %c0_2] : memref<1x128xf32, #tpu.memory_space<vmem>>, vector<1x128xf32>
    %3 = vector.shape_cast %2 : vector<1x128xf32> to vector<1x1x1x128xf32>
    %c0_3 = arith.constant 0 : index
    %c0_4 = arith.constant 0 : index
    %c0_5 = arith.constant 0 : index
    %c0_6 = arith.constant 0 : index
    %4 = vector.load %arg1[%c0_3, %c0_4, %c0_5, %c0_6] : memref<1x16x16x128xf32, #tpu.memory_space<vmem>>, vector<1x16x16x128xf32>
    %5 = vector.broadcast %1 : vector<1x1x1x128xf32> to vector<1x16x16x128xf32>
    %6 = arith.mulf %4, %5 : vector<1x16x16x128xf32>
    %7 = vector.broadcast %3 : vector<1x1x1x128xf32> to vector<1x16x16x128xf32>
    %8 = arith.addf %6, %7 : vector<1x16x16x128xf32>
    %c0_7 = arith.constant 0 : index
    %c0_8 = arith.constant 0 : index
    %c0_9 = arith.constant 0 : index
    %c0_10 = arith.constant 0 : index
    %9 = vector.load %arg2[%c0_7, %c0_8, %c0_9, %c0_10] : memref<1x16x16x128xf32, #tpu.memory_space<vmem>>, vector<1x16x16x128xf32>
    %10 = arith.addf %8, %9 : vector<1x16x16x128xf32>
    %cst = arith.constant 0.000000e+00 : f32
    %11 = vector.broadcast %cst : f32 to vector<1x16x16x128xf32>
    %12 = arith.maximumf %10, %11 : vector<1x16x16x128xf32>
    %c0_11 = arith.constant 0 : index
    %c0_12 = arith.constant 0 : index
    %c0_13 = arith.constant 0 : index
    %c0_14 = arith.constant 0 : index
    %13 = vector.load %arg5[%c0_11, %c0_12, %c0_13, %c0_14] : memref<1x16x16x128xf32, #tpu.memory_space<vmem>>, vector<1x16x16x128xf32>
    tpu.vector_store %arg5[%c0_11, %c0_12, %c0_13, %c0_14], %12 {strides = array<i32>} : memref<1x16x16x128xf32, #tpu.memory_space<vmem>>, vector<1x16x16x128xf32>,
    return
  }
  func.func @transform_0(%arg0: i32) -> (i32, i32, i32, i32) {
    %c0_i32 = arith.constant 0 : i32
    %c0_i32_0 = arith.constant 0 : i32
    %c0_i32_1 = arith.constant 0 : i32
    %c0_i32_2 = arith.constant 0 : i32
    return %arg0, %c0_i32, %c0_i32_0, %c0_i32_1 : i32, i32, i32, i32
  }
  func.func @transform_1(%arg0: i32) -> (i32, i32, i32, i32) {
    %c0_i32 = arith.constant 0 : i32
    %c0_i32_0 = arith.constant 0 : i32
    %c0_i32_1 = arith.constant 0 : i32
    %c0_i32_2 = arith.constant 0 : i32
    return %arg0, %c0_i32, %c0_i32_0, %c0_i32_1 : i32, i32, i32, i32
  }
  func.func @transform_2(%arg0: i32) -> (i32, i32) {
    %c0_i32 = arith.constant 0 : i32
    %c0_i32_0 = arith.constant 0 : i32
    %c0_i32_1 = arith.constant 0 : i32
    return %c0_i32, %c0_i32_0 : i32, i32
  }
  func.func @transform_3(%arg0: i32) -> (i32, i32) {
    %c0_i32 = arith.constant 0 : i32
    %c0_i32_0 = arith.constant 0 : i32
    %c0_i32_1 = arith.constant 0 : i32
    return %c0_i32, %c0_i32_0 : i32, i32
  }
  func.func @transform_4(%arg0: i32) -> (i32, i32, i32, i32) {
    %c0_i32 = arith.constant 0 : i32
    %c0_i32_0 = arith.constant 0 : i32
    %c0_i32_1 = arith.constant 0 : i32
    %c0_i32_2 = arith.constant 0 : i32
    return %arg0, %c0_i32, %c0_i32_0, %c0_i32_1 : i32, i32, i32, i32
  }
}

module attributes {stable_mosaic.version = 11 : i64} {
  func.func @_bn_relu_conv2_stats_kernel(%arg0: i32, %arg1: memref<1x16x16x128xbf16, #tpu.memory_space<vmem>>, %arg2: memref<1x128xf32, #tpu.memory_space<vmem>>, %arg3: memref<1x128xf32, #tpu.memory_space<vmem>>, %arg4: memref<1152x128xbf16, #tpu.memory_space<vmem>>, %arg5: memref<1x16x16x128xf32, #tpu.memory_space<vmem>>, %arg6: memref<1x1x128xf32, #tpu.memory_space<vmem>>, %arg7: memref<1x1x128xf32, #tpu.memory_space<vmem>>, %arg8: memref<18x18x128xf32, #tpu.memory_space<vmem>>, %arg9: memref<256x1152xbf16, #tpu.memory_space<vmem>>) attributes {dimension_semantics = [#tpu.dimension_semantics<parallel>], iteration_bounds = array<i64: 2>, scalar_prefetch = 0 : i64, scratch_operands = 2 : i64, tpu.core_type = #tpu.core_type<tc>, window_params = [{transform_indices = @transform_0, window_bounds = array<i64: 1, 16, 16, 128>}, {pipeline_mode = #tpu.pipeline_mode<synchronous>, transform_indices = @transform_1, window_bounds = array<i64: 1, 128>}, {pipeline_mode = #tpu.pipeline_mode<synchronous>, transform_indices = @transform_2, window_bounds = array<i64: 1, 128>}, {pipeline_mode = #tpu.pipeline_mode<synchronous>, transform_indices = @transform_3, window_bounds = array<i64: 1152, 128>}, {transform_indices = @transform_4, window_bounds = array<i64: 1, 16, 16, 128>}, {transform_indices = @transform_5, window_bounds = array<i64: 1, 1, 128>}, {transform_indices = @transform_6, window_bounds = array<i64: 1, 1, 128>}]} {
    %c0 = arith.constant 0 : index
    %c0_0 = arith.constant 0 : index
    %0 = vector.load %arg2[%c0, %c0_0] : memref<1x128xf32, #tpu.memory_space<vmem>>, vector<1x128xf32>
    %1 = vector.shape_cast %0 : vector<1x128xf32> to vector<1x1x128xf32>
    %c0_1 = arith.constant 0 : index
    %c0_2 = arith.constant 0 : index
    %2 = vector.load %arg3[%c0_1, %c0_2] : memref<1x128xf32, #tpu.memory_space<vmem>>, vector<1x128xf32>
    %3 = vector.shape_cast %2 : vector<1x128xf32> to vector<1x1x128xf32>
    %c0_3 = arith.constant 0 : index
    %c0_4 = arith.constant 0 : index
    %c0_5 = arith.constant 0 : index
    %c0_6 = arith.constant 0 : index
    %4 = vector.load %arg1[%c0_3, %c0_4, %c0_5, %c0_6] : memref<1x16x16x128xbf16, #tpu.memory_space<vmem>>, vector<1x16x16x128xbf16>
    %5 = vector.shape_cast %4 : vector<1x16x16x128xbf16> to vector<16x16x128xbf16>
    %6 = arith.extf %5 : vector<16x16x128xbf16> to vector<16x16x128xf32>
    %7 = vector.broadcast %1 : vector<1x1x128xf32> to vector<16x16x128xf32>
    %8 = arith.mulf %6, %7 : vector<16x16x128xf32>
    %9 = vector.broadcast %3 : vector<1x1x128xf32> to vector<16x16x128xf32>
    %10 = arith.addf %8, %9 : vector<16x16x128xf32>
    %cst = arith.constant 0.000000e+00 : f32
    %11 = vector.broadcast %cst : f32 to vector<16x16x128xf32>
    %12 = arith.maximumf %10, %11 : vector<16x16x128xf32>
    %cst_7 = arith.constant 0.000000e+00 : f32
    %13 = vector.broadcast %cst_7 : f32 to vector<18x18x128xf32>
    %c0_8 = arith.constant 0 : index
    %c0_9 = arith.constant 0 : index
    %c0_10 = arith.constant 0 : index
    %14 = vector.load %arg8[%c0_8, %c0_9, %c0_10] : memref<18x18x128xf32, #tpu.memory_space<vmem>>, vector<18x18x128xf32>
    tpu.vector_store %arg8[%c0_8, %c0_9, %c0_10], %13 {strides = array<i32>} : memref<18x18x128xf32, #tpu.memory_space<vmem>>, vector<18x18x128xf32>,
    %c1 = arith.constant 1 : index
    %c1_11 = arith.constant 1 : index
    %c0_12 = arith.constant 0 : index
    %15 = vector.load %arg8[%c1, %c1_11, %c0_12] : memref<18x18x128xf32, #tpu.memory_space<vmem>>, vector<16x16x128xf32>
    tpu.vector_store %arg8[%c1, %c1_11, %c0_12], %12 {strides = array<i32>} : memref<18x18x128xf32, #tpu.memory_space<vmem>>, vector<16x16x128xf32>,
    %c0_13 = arith.constant 0 : index
    %c0_14 = arith.constant 0 : index
    %c0_15 = arith.constant 0 : index
    %16 = vector.load %arg8[%c0_13, %c0_14, %c0_15] : memref<18x18x128xf32, #tpu.memory_space<vmem>>, vector<16x16x128xf32>
    %17 = vector.shape_cast %16 : vector<16x16x128xf32> to vector<256x128xf32>
    %18 = arith.truncf %17 : vector<256x128xf32> to vector<256x128xbf16>
    %c0_16 = arith.constant 0 : index
    %c0_17 = arith.constant 0 : index
    %19 = vector.load %arg9[%c0_16, %c0_17] : memref<256x1152xbf16, #tpu.memory_space<vmem>>, vector<256x128xbf16>
    tpu.vector_store %arg9[%c0_16, %c0_17], %18 {strides = array<i32>} : memref<256x1152xbf16, #tpu.memory_space<vmem>>, vector<256x128xbf16>,
    %c0_18 = arith.constant 0 : index
    %c1_19 = arith.constant 1 : index
    %c0_20 = arith.constant 0 : index
    %20 = vector.load %arg8[%c0_18, %c1_19, %c0_20] : memref<18x18x128xf32, #tpu.memory_space<vmem>>, vector<16x16x128xf32>
    %21 = vector.shape_cast %20 : vector<16x16x128xf32> to vector<256x128xf32>
    %22 = arith.truncf %21 : vector<256x128xf32> to vector<256x128xbf16>
    %c0_21 = arith.constant 0 : index
    %c128 = arith.constant 128 : index
    %23 = vector.load %arg9[%c0_21, %c128] : memref<256x1152xbf16, #tpu.memory_space<vmem>>, vector<256x128xbf16>
    tpu.vector_store %arg9[%c0_21, %c128], %22 {strides = array<i32>} : memref<256x1152xbf16, #tpu.memory_space<vmem>>, vector<256x128xbf16>,
    %c0_22 = arith.constant 0 : index
    %c2 = arith.constant 2 : index
    %c0_23 = arith.constant 0 : index
    %24 = vector.load %arg8[%c0_22, %c2, %c0_23] : memref<18x18x128xf32, #tpu.memory_space<vmem>>, vector<16x16x128xf32>
    %25 = vector.shape_cast %24 : vector<16x16x128xf32> to vector<256x128xf32>
    %26 = arith.truncf %25 : vector<256x128xf32> to vector<256x128xbf16>
    %c0_24 = arith.constant 0 : index
    %c256 = arith.constant 256 : index
    %27 = vector.load %arg9[%c0_24, %c256] : memref<256x1152xbf16, #tpu.memory_space<vmem>>, vector<256x128xbf16>
    tpu.vector_store %arg9[%c0_24, %c256], %26 {strides = array<i32>} : memref<256x1152xbf16, #tpu.memory_space<vmem>>, vector<256x128xbf16>,
    %c1_25 = arith.constant 1 : index
    %c0_26 = arith.constant 0 : index
    %c0_27 = arith.constant 0 : index
    %28 = vector.load %arg8[%c1_25, %c0_26, %c0_27] : memref<18x18x128xf32, #tpu.memory_space<vmem>>, vector<16x16x128xf32>
    %29 = vector.shape_cast %28 : vector<16x16x128xf32> to vector<256x128xf32>
    %30 = arith.truncf %29 : vector<256x128xf32> to vector<256x128xbf16>
    %c0_28 = arith.constant 0 : index
    %c384 = arith.constant 384 : index
    %31 = vector.load %arg9[%c0_28, %c384] : memref<256x1152xbf16, #tpu.memory_space<vmem>>, vector<256x128xbf16>
    tpu.vector_store %arg9[%c0_28, %c384], %30 {strides = array<i32>} : memref<256x1152xbf16, #tpu.memory_space<vmem>>, vector<256x128xbf16>,
    %c1_29 = arith.constant 1 : index
    %c1_30 = arith.constant 1 : index
    %c0_31 = arith.constant 0 : index
    %32 = vector.load %arg8[%c1_29, %c1_30, %c0_31] : memref<18x18x128xf32, #tpu.memory_space<vmem>>, vector<16x16x128xf32>
    %33 = vector.shape_cast %32 : vector<16x16x128xf32> to vector<256x128xf32>
    %34 = arith.truncf %33 : vector<256x128xf32> to vector<256x128xbf16>
    %c0_32 = arith.constant 0 : index
    %c512 = arith.constant 512 : index
    %35 = vector.load %arg9[%c0_32, %c512] : memref<256x1152xbf16, #tpu.memory_space<vmem>>, vector<256x128xbf16>
    tpu.vector_store %arg9[%c0_32, %c512], %34 {strides = array<i32>} : memref<256x1152xbf16, #tpu.memory_space<vmem>>, vector<256x128xbf16>,
    %c1_33 = arith.constant 1 : index
    %c2_34 = arith.constant 2 : index
    %c0_35 = arith.constant 0 : index
    %36 = vector.load %arg8[%c1_33, %c2_34, %c0_35] : memref<18x18x128xf32, #tpu.memory_space<vmem>>, vector<16x16x128xf32>
    %37 = vector.shape_cast %36 : vector<16x16x128xf32> to vector<256x128xf32>
    %38 = arith.truncf %37 : vector<256x128xf32> to vector<256x128xbf16>
    %c0_36 = arith.constant 0 : index
    %c640 = arith.constant 640 : index
    %39 = vector.load %arg9[%c0_36, %c640] : memref<256x1152xbf16, #tpu.memory_space<vmem>>, vector<256x128xbf16>
    tpu.vector_store %arg9[%c0_36, %c640], %38 {strides = array<i32>} : memref<256x1152xbf16, #tpu.memory_space<vmem>>, vector<256x128xbf16>,
    %c2_37 = arith.constant 2 : index
    %c0_38 = arith.constant 0 : index
    %c0_39 = arith.constant 0 : index
    %40 = vector.load %arg8[%c2_37, %c0_38, %c0_39] : memref<18x18x128xf32, #tpu.memory_space<vmem>>, vector<16x16x128xf32>
    %41 = vector.shape_cast %40 : vector<16x16x128xf32> to vector<256x128xf32>
    %42 = arith.truncf %41 : vector<256x128xf32> to vector<256x128xbf16>
    %c0_40 = arith.constant 0 : index
    %c768 = arith.constant 768 : index
    %43 = vector.load %arg9[%c0_40, %c768] : memref<256x1152xbf16, #tpu.memory_space<vmem>>, vector<256x128xbf16>
    tpu.vector_store %arg9[%c0_40, %c768], %42 {strides = array<i32>} : memref<256x1152xbf16, #tpu.memory_space<vmem>>, vector<256x128xbf16>,
    %c2_41 = arith.constant 2 : index
    %c1_42 = arith.constant 1 : index
    %c0_43 = arith.constant 0 : index
    %44 = vector.load %arg8[%c2_41, %c1_42, %c0_43] : memref<18x18x128xf32, #tpu.memory_space<vmem>>, vector<16x16x128xf32>
    %45 = vector.shape_cast %44 : vector<16x16x128xf32> to vector<256x128xf32>
    %46 = arith.truncf %45 : vector<256x128xf32> to vector<256x128xbf16>
    %c0_44 = arith.constant 0 : index
    %c896 = arith.constant 896 : index
    %47 = vector.load %arg9[%c0_44, %c896] : memref<256x1152xbf16, #tpu.memory_space<vmem>>, vector<256x128xbf16>
    tpu.vector_store %arg9[%c0_44, %c896], %46 {strides = array<i32>} : memref<256x1152xbf16, #tpu.memory_space<vmem>>, vector<256x128xbf16>,
    %c2_45 = arith.constant 2 : index
    %c2_46 = arith.constant 2 : index
    %c0_47 = arith.constant 0 : index
    %48 = vector.load %arg8[%c2_45, %c2_46, %c0_47] : memref<18x18x128xf32, #tpu.memory_space<vmem>>, vector<16x16x128xf32>
    %49 = vector.shape_cast %48 : vector<16x16x128xf32> to vector<256x128xf32>
    %50 = arith.truncf %49 : vector<256x128xf32> to vector<256x128xbf16>
    %c0_48 = arith.constant 0 : index
    %c1024 = arith.constant 1024 : index
    %51 = vector.load %arg9[%c0_48, %c1024] : memref<256x1152xbf16, #tpu.memory_space<vmem>>, vector<256x128xbf16>
    tpu.vector_store %arg9[%c0_48, %c1024], %50 {strides = array<i32>} : memref<256x1152xbf16, #tpu.memory_space<vmem>>, vector<256x128xbf16>,
    %c0_49 = arith.constant 0 : index
    %c0_50 = arith.constant 0 : index
    %52 = vector.load %arg9[%c0_49, %c0_50] : memref<256x1152xbf16, #tpu.memory_space<vmem>>, vector<256x1152xbf16>
    %c0_51 = arith.constant 0 : index
    %c0_52 = arith.constant 0 : index
    %53 = vector.load %arg4[%c0_51, %c0_52] : memref<1152x128xbf16, #tpu.memory_space<vmem>>, vector<1152x128xbf16>
    %cst_53 = arith.constant dense<0.000000e+00> : vector<256x128xf32>
    %54 = tpu.matmul %52, %53, %cst_53 {dimension_numbers = #tpu.dot_dimension_numbers<[1], [0], [0], [1], [0, 0, 1, 1], [], []>} : vector<256x1152xbf16>, vector<1152x128xbf16>, vector<256x128xf32> -> vector<256x128xf32>
    %55 = vector.shape_cast %54 : vector<256x128xf32> to vector<1x16x16x128xf32>
    %c0_54 = arith.constant 0 : index
    %c0_55 = arith.constant 0 : index
    %c0_56 = arith.constant 0 : index
    %c0_57 = arith.constant 0 : index
    %56 = vector.load %arg5[%c0_54, %c0_55, %c0_56, %c0_57] : memref<1x16x16x128xf32, #tpu.memory_space<vmem>>, vector<1x16x16x128xf32>
    tpu.vector_store %arg5[%c0_54, %c0_55, %c0_56, %c0_57], %55 {strides = array<i32>} : memref<1x16x16x128xf32, #tpu.memory_space<vmem>>, vector<1x16x16x128xf32>,
    %cst_58 = arith.constant dense<0.000000e+00> : vector<128xf32>
    %57 = vector.multi_reduction <add>, %54, %cst_58 [0] : vector<256x128xf32> to vector<128xf32>
    %58 = vector.shape_cast %57 : vector<128xf32> to vector<1x1x128xf32>
    %c0_59 = arith.constant 0 : index
    %c0_60 = arith.constant 0 : index
    %c0_61 = arith.constant 0 : index
    %59 = vector.load %arg6[%c0_59, %c0_60, %c0_61] : memref<1x1x128xf32, #tpu.memory_space<vmem>>, vector<1x1x128xf32>
    tpu.vector_store %arg6[%c0_59, %c0_60, %c0_61], %58 {strides = array<i32>} : memref<1x1x128xf32, #tpu.memory_space<vmem>>, vector<1x1x128xf32>,
    %60 = arith.mulf %54, %54 : vector<256x128xf32>
    %cst_62 = arith.constant dense<0.000000e+00> : vector<128xf32>
    %61 = vector.multi_reduction <add>, %60, %cst_62 [0] : vector<256x128xf32> to vector<128xf32>
    %62 = vector.shape_cast %61 : vector<128xf32> to vector<1x1x128xf32>
    %c0_63 = arith.constant 0 : index
    %c0_64 = arith.constant 0 : index
    %c0_65 = arith.constant 0 : index
    %63 = vector.load %arg7[%c0_63, %c0_64, %c0_65] : memref<1x1x128xf32, #tpu.memory_space<vmem>>, vector<1x1x128xf32>
    tpu.vector_store %arg7[%c0_63, %c0_64, %c0_65], %62 {strides = array<i32>} : memref<1x1x128xf32, #tpu.memory_space<vmem>>, vector<1x1x128xf32>,
    return
  }
  func.func @transform_0(%arg0: i32) -> (i32, i32, i32, i32) {
    %c0_i32 = arith.constant 0 : i32
    %c0_i32_0 = arith.constant 0 : i32
    %c0_i32_1 = arith.constant 0 : i32
    %c0_i32_2 = arith.constant 0 : i32
    return %arg0, %c0_i32, %c0_i32_0, %c0_i32_1 : i32, i32, i32, i32
  }
  func.func @transform_1(%arg0: i32) -> (i32, i32) {
    %c0_i32 = arith.constant 0 : i32
    %c0_i32_0 = arith.constant 0 : i32
    %c0_i32_1 = arith.constant 0 : i32
    return %c0_i32, %c0_i32_0 : i32, i32
  }
  func.func @transform_2(%arg0: i32) -> (i32, i32) {
    %c0_i32 = arith.constant 0 : i32
    %c0_i32_0 = arith.constant 0 : i32
    %c0_i32_1 = arith.constant 0 : i32
    return %c0_i32, %c0_i32_0 : i32, i32
  }
  func.func @transform_3(%arg0: i32) -> (i32, i32) {
    %c0_i32 = arith.constant 0 : i32
    %c0_i32_0 = arith.constant 0 : i32
    %c0_i32_1 = arith.constant 0 : i32
    return %c0_i32, %c0_i32_0 : i32, i32
  }
  func.func @transform_4(%arg0: i32) -> (i32, i32, i32, i32) {
    %c0_i32 = arith.constant 0 : i32
    %c0_i32_0 = arith.constant 0 : i32
    %c0_i32_1 = arith.constant 0 : i32
    %c0_i32_2 = arith.constant 0 : i32
    return %arg0, %c0_i32, %c0_i32_0, %c0_i32_1 : i32, i32, i32, i32
  }
  func.func @transform_5(%arg0: i32) -> (i32, i32, i32) {
    %c0_i32 = arith.constant 0 : i32
    %c0_i32_0 = arith.constant 0 : i32
    %c0_i32_1 = arith.constant 0 : i32
    return %arg0, %c0_i32, %c0_i32_0 : i32, i32, i32
  }
  func.func @transform_6(%arg0: i32) -> (i32, i32, i32) {
    %c0_i32 = arith.constant 0 : i32
    %c0_i32_0 = arith.constant 0 : i32
    %c0_i32_1 = arith.constant 0 : i32
    return %arg0, %c0_i32, %c0_i32_0 : i32, i32, i32
  }
}

</mosaic_0001>

<bundles_post_ra>
// kernel: basic_block_forward.5
= control target key start
LH: loop header
LB: loop body
LE: loop exit
PB: predicated region body
PF: predicated region fallthrough
CT: control target
= control target key end

     0   :  { %s582_s15 = smov 0   ;;  %s783_s0 = inlined_call_operand.vmem [shape: f32[2,16,16,128], index: 0, kind: input, shape index: {}]   ;;  %s784_s1 = inlined_call_operand.vmem [shape: f32[2,16,16,128], index: 1, kind: input, shape index: {}]   ;;  %s785_s2 = inlined_call_operand.vmem [shape: f32[1,128], index: 2, kind: input, shape index: {}]   ;;  %s786_s3 = inlined_call_operand.vmem [shape: f32[1,128], index: 3, kind: input, shape index: {}]   ;;  %s787_s4 = inlined_call_operand.vmem [shape: f32[2,16,16,128], index: 4, kind: output, shape index: {}]  }
   0x1 LB: > { %s523_s16 = sadd.s32 4294967295, %s555_s15   ;;  %p527_p0 = scmp.ge.s32.totalorder %s555_s15, 1  ;;  %s555_s15 = sphi %s582_s15, %s14_s15  }
   0x2   : > { %p172_p1 = scmp.lt.s32.totalorder %s555_s15, 3 }
   0x4   : > { %p173_p2 = pnand %p527_p0, %p172_p1 }
   0x5   : > { %p203_p3 = scmp.lt.s32.totalorder (!%p173_p2), %s523_s16, 1  ;;  %v595_v0 = vld [vmem:[%s785_s2] ss:$0 sm:$0xff] (!%p173_p2) }
   0x6   : > { %176 = sbr.rel (%p173_p2) target bundleno = 55 (0x37), region = 36  ;;  %v612_v1 = vld [vmem:[%s786_s3] ss:$0 sm:$0xff] (!%p173_p2) }
   0xd   : > { %s789_s16 = smov (!%p203_p3, %s523_s16), 1 }
   0xe   : > { %s590_s17 = sshll.u32 %s789_s16, 8 }
   0xf   : > { %s601_s22 = scalar_lea.vmem %s783_s0, %s590_s17  ;;  %s607_s25 = scalar_lea.vmem %s784_s1, %s590_s17 }
  0x10   : > { %v220_v2 = vld [vmem:[%s601_s22] sm:$0xff]  ;;  %v221_v3 = vld [vmem:[%s601_s22 + $0x8] sm:$0xff]  ;;  %v222_v7 = vld [vmem:[%s601_s22 + $0x10] sm:$0xff]  ;;  %s643_s30 = scalar_lea.vmem %s787_s4, %s590_s17 }
  0x11   : > { %v258_v4 = vmul.f32 %v595_v0, %v220_v2  ;;  %v328_v5 = vld [vmem:[%s607_s25] sm:$0xff]  ;;  %v259_v6 = vmul.f32 %v595_v0, %v221_v3  ;;  %v329_v8 = vld [vmem:[%s607_s25 + $0x8] sm:$0xff]  ;;  %v260_v9 = vmul.f32 %v595_v0, %v222_v7  ;;  %v223_v10 = vld [vmem:[%s601_s22 + $0x18] sm:$0xff] }
  0x12   : > { %v224_v11 = vld [vmem:[%s601_s22 + $0x20] sm:$0xff]  ;;  %v330_v14 = vld [vmem:[%s607_s25 + $0x10] sm:$0xff]  ;;  %v261_v15 = vmul.f32 %v595_v0, %v223_v10  ;;  %v331_v16 = vld [vmem:[%s607_s25 + $0x18] sm:$0xff] }
  0x13   : > { %v296_v12 = vadd.f32 %v612_v1, %v258_v4  ;;  %v297_v13 = vadd.f32 %v612_v1, %v259_v6  ;;  %v262_v17 = vmul.f32 %v595_v0, %v224_v11  ;;  %v225_v18 = vld [vmem:[%s601_s22 + $0x28] sm:$0xff]  ;;  %v298_v19 = vadd.f32 %v612_v1, %v260_v9  ;;  %v332_v20 = vld [vmem:[%s607_s25 + $0x20] sm:$0xff]  ;;  %v226_v22 = vld [vmem:[%s601_s22 + $0x30] sm:$0xff] }
  0x14   : > { %v263_v21 = vmul.f32 %v595_v0, %v225_v18  ;;  %v227_v23 = vld [vmem:[%s601_s22 + $0x38] sm:$0xff]  ;;  %v299_v26 = vadd.f32 %v612_v1, %v261_v15  ;;  %v333_v28 = vld [vmem:[%s607_s25 + $0x28] sm:$0xff]  ;;  %v264_v31 = vmul.f32 %v595_v0, %v226_v22  ;;  %v228_v33 = vld [vmem:[%s601_s22 + $0x40] sm:$0xff] }
  0x15   : > { %v360_v24 = vadd.f32 %v328_v5, %v296_v12  ;;  %v361_v25 = vadd.f32 %v329_v8, %v297_v13  ;;  %v300_v27 = vadd.f32 %v612_v1, %v262_v17  ;;  %v362_v29 = vadd.f32 %v330_v14, %v298_v19  ;;  %v229_v34 = vld [vmem:[%s601_s22 + $0x48] sm:$0xff]  ;;  %v334_v39 = vld [vmem:[%s607_s25 + $0x30] sm:$0xff]  ;;  %v335_v40 = vld [vmem:[%s607_s25 + $0x38] sm:$0xff] }
  0x16   : > { %v301_v30 = vadd.f32 %v612_v1, %v263_v21  ;;  %v265_v32 = vmul.f32 %v595_v0, %v227_v23  ;;  %v363_v37 = vadd.f32 %v331_v16, %v299_v26  ;;  %v230_v41 = vld [vmem:[%s601_s22 + $0x50] sm:$0xff]  ;;  %v302_v44 = vadd.f32 %v612_v1, %v264_v31  ;;  %v231_v46 = vld [vmem:[%s601_s22 + $0x58] sm:$0xff]  ;;  %v232_v47 = vld [vmem:[%s601_s22 + $0x60] sm:$0xff] }
  0x17   : > { %v392_v35 = vmax.f32 %v360_v24, 0.0  ;;  %v393_v36 = vmax.f32 %v361_v25, 0.0  ;;  %v364_v38 = vadd.f32 %v332_v20, %v300_v27  ;;  %v394_v42 = vmax.f32 %v362_v29, 0.0  ;;  %v233_v52 = vld [vmem:[%s601_s22 + $0x68] sm:$0xff]  ;;  %v336_v56 = vld [vmem:[%s607_s25 + $0x40] sm:$0xff]  ;;  %v338_v61 = vld [vmem:[%s607_s25 + $0x50] sm:$0xff] }
  0x18   : > { %v365_v43 = vadd.f32 %v333_v28, %v301_v30  ;;  %v303_v45 = vadd.f32 %v612_v1, %v265_v32  ;;  %v395_v48 = vmax.f32 %v363_v37, 0.0  ;;  %v266_v50 = vmul.f32 %v595_v0, %v228_v33  ;;  %v337_v57 = vld [vmem:[%s607_s25 + $0x48] sm:$0xff]  ;;  %v234_v2 = vld [vmem:[%s601_s22 + $0x70] sm:$0xff]  ;;  %v235_v3 = vld [vmem:[%s601_s22 + $0x78] sm:$0xff] }
  0x19   : > { %424 = vst [vmem:[%s643_s30] sm:$0xff] %v392_v35  ;;  %425 = vst [vmem:[%s643_s30 + $0x8] sm:$0xff] %v393_v36  ;;  %v396_v49 = vmax.f32 %v364_v38, 0.0  ;;  %v267_v51 = vmul.f32 %v595_v0, %v229_v34  ;;  %v366_v54 = vadd.f32 %v334_v39, %v302_v44  ;;  %v268_v58 = vmul.f32 %v595_v0, %v230_v41  ;;  %v339_v7 = vld [vmem:[%s607_s25 + $0x58] sm:$0xff]  ;;  %v340_v8 = vld [vmem:[%s607_s25 + $0x60] sm:$0xff] }
  0x1a   : > { %426 = vst [vmem:[%s643_s30 + $0x10] sm:$0xff] %v394_v42  ;;  %v397_v53 = vmax.f32 %v365_v43, 0.0  ;;  %v367_v55 = vadd.f32 %v335_v40, %v303_v45  ;;  %427 = vst [vmem:[%s643_s30 + $0x18] sm:$0xff] %v395_v48  ;;  %v304_v59 = vadd.f32 %v612_v1, %v266_v50  ;;  %v269_v62 = vmul.f32 %v595_v0, %v231_v46  ;;  %v341_v14 = vld [vmem:[%s607_s25 + $0x68] sm:$0xff]  ;;  %v236_v19 = vld [vmem:[%s601_s22 + $0x80] sm:$0xff] }
  0x1b   : > { %428 = vst [vmem:[%s643_s30 + $0x20] sm:$0xff] %v396_v49  ;;  %v305_v60 = vadd.f32 %v612_v1, %v267_v51  ;;  %v270_v63 = vmul.f32 %v595_v0, %v232_v47  ;;  %v398_v4 = vmax.f32 %v366_v54, 0.0  ;;  %v306_v6 = vadd.f32 %v612_v1, %v268_v58  ;;  %v237_v20 = vld [vmem:[%s601_s22 + $0x88] sm:$0xff]  ;;  %v342_v25 = vld [vmem:[%s607_s25 + $0x70] sm:$0xff]  ;;  %v343_v26 = vld [vmem:[%s607_s25 + $0x78] sm:$0xff] }
  0x1c   : > { %429 = vst [vmem:[%s643_s30 + $0x28] sm:$0xff] %v397_v53  ;;  %v399_v5 = vmax.f32 %v367_v55, 0.0  ;;  %v271_v9 = vmul.f32 %v595_v0, %v233_v52  ;;  %v368_v10 = vadd.f32 %v336_v56, %v304_v59  ;;  %v307_v12 = vadd.f32 %v612_v1, %v269_v62  ;;  %v238_v27 = vld [vmem:[%s601_s22 + $0x90] sm:$0xff]  ;;  %v239_v32 = vld [vmem:[%s601_s22 + $0x98] sm:$0xff]  ;;  %v240_v33 = vld [vmem:[%s601_s22 + $0xa0] sm:$0xff] }
  0x1d   : > { %v369_v11 = vadd.f32 %v337_v57, %v305_v60  ;;  %v308_v13 = vadd.f32 %v612_v1, %v270_v63  ;;  %430 = vst [vmem:[%s643_s30 + $0x30] sm:$0xff] %v398_v4  ;;  %v370_v15 = vadd.f32 %v338_v61, %v306_v6  ;;  %v272_v17 = vmul.f32 %v595_v0, %v234_v2  ;;  %v241_v38 = vld [vmem:[%s601_s22 + $0xa8] sm:$0xff]  ;;  %v344_v42 = vld [vmem:[%s607_s25 + $0x80] sm:$0xff]  ;;  %v346_v47 = vld [vmem:[%s607_s25 + $0x90] sm:$0xff] }
  0x1e   : > { %431 = vst [vmem:[%s643_s30 + $0x38] sm:$0xff] %v399_v5  ;;  %v309_v16 = vadd.f32 %v612_v1, %v271_v9  ;;  %v273_v18 = vmul.f32 %v595_v0, %v235_v3  ;;  %v400_v21 = vmax.f32 %v368_v10, 0.0  ;;  %v371_v23 = vadd.f32 %v339_v7, %v307_v12  ;;  %v345_v43 = vld [vmem:[%s607_s25 + $0x88] sm:$0xff]  ;;  %v242_v50 = vld [vmem:[%s601_s22 + $0xb0] sm:$0xff]  ;;  %v243_v51 = vld [vmem:[%s601_s22 + $0xb8] sm:$0xff] }
  0x1f   : > { %v401_v22 = vmax.f32 %v369_v11, 0.0  ;;  %v372_v24 = vadd.f32 %v340_v8, %v308_v13  ;;  %v402_v28 = vmax.f32 %v370_v15, 0.0  ;;  %v310_v30 = vadd.f32 %v612_v1, %v272_v17  ;;  %v347_v55 = vld [vmem:[%s607_s25 + $0x98] sm:$0xff]  ;;  %v348_v56 = vld [vmem:[%s607_s25 + $0xa0] sm:$0xff]  ;;  %v349_v62 = vld [vmem:[%s607_s25 + $0xa8] sm:$0xff] }
  0x20   : > { %v373_v29 = vadd.f32 %v341_v14, %v309_v16  ;;  %v311_v31 = vadd.f32 %v612_v1, %v273_v18  ;;  %432 = vst [vmem:[%s643_s30 + $0x40] sm:$0xff] %v400_v21  ;;  %v403_v34 = vmax.f32 %v371_v23, 0.0  ;;  %v274_v36 = vmul.f32 %v595_v0, %v236_v19  ;;  %v244_v5 = vld [vmem:[%s601_s22 + $0xc0] sm:$0xff]  ;;  %v245_v6 = vld [vmem:[%s601_s22 + $0xc8] sm:$0xff]  ;;  %v350_v11 = vld [vmem:[%s607_s25 + $0xb0] sm:$0xff] }
  0x21   : > { %433 = vst [vmem:[%s643_s30 + $0x48] sm:$0xff] %v401_v22  ;;  %v404_v35 = vmax.f32 %v372_v24, 0.0  ;;  %v275_v37 = vmul.f32 %v595_v0, %v237_v20  ;;  %434 = vst [vmem:[%s643_s30 + $0x50] sm:$0xff] %v402_v28  ;;  %v374_v40 = vadd.f32 %v342_v25, %v310_v30  ;;  %v276_v44 = vmul.f32 %v595_v0, %v238_v27  ;;  %v351_v12 = vld [vmem:[%s607_s25 + $0xb8] sm:$0xff]  ;;  %v246_v13 = vld [vmem:[%s601_s22 + $0xd0] sm:$0xff] }
  0x22   : > { %v405_v39 = vmax.f32 %v373_v29, 0.0  ;;  %v375_v41 = vadd.f32 %v343_v26, %v311_v31  ;;  %435 = vst [vmem:[%s643_s30 + $0x58] sm:$0xff] %v403_v34  ;;  %v312_v45 = vadd.f32 %v612_v1, %v274_v36  ;;  %v277_v48 = vmul.f32 %v595_v0, %v239_v32  ;;  %v247_v18 = vld [vmem:[%s601_s22 + $0xd8] sm:$0xff]  ;;  %v248_v19 = vld [vmem:[%s601_s22 + $0xe0] sm:$0xff]  ;;  %v249_v24 = vld [vmem:[%s601_s22 + $0xe8] sm:$0xff] }
  0x23   : > { %436 = vst [vmem:[%s643_s30 + $0x60] sm:$0xff] %v404_v35  ;;  %v313_v46 = vadd.f32 %v612_v1, %v275_v37  ;;  %v278_v49 = vmul.f32 %v595_v0, %v240_v33  ;;  %v406_v52 = vmax.f32 %v374_v40, 0.0  ;;  %v314_v54 = vadd.f32 %v612_v1, %v276_v44  ;;  %v352_v28 = vld [vmem:[%s607_s25 + $0xc0] sm:$0xff]  ;;  %v353_v29 = vld [vmem:[%s607_s25 + $0xc8] sm:$0xff]  ;;  %v354_v33 = vld [vmem:[%s607_s25 + $0xd0] sm:$0xff] }
  0x24   : > { %437 = vst [vmem:[%s643_s30 + $0x68] sm:$0xff] %v405_v39  ;;  %v407_v53 = vmax.f32 %v375_v41, 0.0  ;;  %v279_v57 = vmul.f32 %v595_v0, %v241_v38  ;;  %v376_v58 = vadd.f32 %v344_v42, %v312_v45  ;;  %v315_v60 = vadd.f32 %v612_v1, %v277_v48  ;;  %v250_v36 = vld [vmem:[%s601_s22 + $0xf0] sm:$0xff]  ;;  %v251_v37 = vld [vmem:[%s601_s22 + $0xf8] sm:$0xff]  ;;  %v356_v42 = vld [vmem:[%s607_s25 + $0xe0] sm:$0xff] }
  0x25   : > { %v377_v59 = vadd.f32 %v345_v43, %v313_v46  ;;  %v316_v61 = vadd.f32 %v612_v1, %v278_v49  ;;  %438 = vst [vmem:[%s643_s30 + $0x70] sm:$0xff] %v406_v52  ;;  %v378_v63 = vadd.f32 %v346_v47, %v314_v54  ;;  %v280_v3 = vmul.f32 %v595_v0, %v242_v50  ;;  %v355_v41 = vld [vmem:[%s607_s25 + $0xd8] sm:$0xff]  ;;  %v357_v48 = vld [vmem:[%s607_s25 + $0xe8] sm:$0xff] }
  0x26   : > { %439 = vst [vmem:[%s643_s30 + $0x78] sm:$0xff] %v407_v53  ;;  %v317_v2 = vadd.f32 %v612_v1, %v279_v57  ;;  %v281_v4 = vmul.f32 %v595_v0, %v243_v51  ;;  %v408_v7 = vmax.f32 %v376_v58, 0.0  ;;  %v379_v9 = vadd.f32 %v347_v55, %v315_v60  ;;  %v358_v57 = vld [vmem:[%s607_s25 + $0xf0] sm:$0xff]  ;;  %v359_v58 = vld [vmem:[%s607_s25 + $0xf8] sm:$0xff] }
  0x27   : > { %v409_v8 = vmax.f32 %v377_v59, 0.0  ;;  %v380_v10 = vadd.f32 %v348_v56, %v316_v61  ;;  %v410_v14 = vmax.f32 %v378_v63, 0.0  ;;  %v318_v16 = vadd.f32 %v612_v1, %v280_v3 }
  0x28   : > { %v381_v15 = vadd.f32 %v349_v62, %v317_v2  ;;  %v319_v17 = vadd.f32 %v612_v1, %v281_v4  ;;  %440 = vst [vmem:[%s643_s30 + $0x80] sm:$0xff] %v408_v7  ;;  %v411_v20 = vmax.f32 %v379_v9, 0.0  ;;  %v282_v22 = vmul.f32 %v595_v0, %v244_v5 }
  0x29   : > { %441 = vst [vmem:[%s643_s30 + $0x88] sm:$0xff] %v409_v8  ;;  %v412_v21 = vmax.f32 %v380_v10, 0.0  ;;  %v283_v23 = vmul.f32 %v595_v0, %v245_v6  ;;  %442 = vst [vmem:[%s643_s30 + $0x90] sm:$0xff] %v410_v14  ;;  %v382_v26 = vadd.f32 %v350_v11, %v318_v16  ;;  %v284_v30 = vmul.f32 %v595_v0, %v246_v13 }
  0x2a   : > { %v413_v25 = vmax.f32 %v381_v15, 0.0  ;;  %v383_v27 = vadd.f32 %v351_v12, %v319_v17  ;;  %443 = vst [vmem:[%s643_s30 + $0x98] sm:$0xff] %v411_v20  ;;  %v320_v31 = vadd.f32 %v612_v1, %v282_v22  ;;  %v285_v34 = vmul.f32 %v595_v0, %v247_v18 }
  0x2b   : > { %444 = vst [vmem:[%s643_s30 + $0xa0] sm:$0xff] %v412_v21  ;;  %v321_v32 = vadd.f32 %v612_v1, %v283_v23  ;;  %v286_v35 = vmul.f32 %v595_v0, %v248_v19  ;;  %v414_v38 = vmax.f32 %v382_v26, 0.0  ;;  %v322_v40 = vadd.f32 %v612_v1, %v284_v30 }
  0x2c   : > { %445 = vst [vmem:[%s643_s30 + $0xa8] sm:$0xff] %v413_v25  ;;  %v415_v39 = vmax.f32 %v383_v27, 0.0  ;;  %v287_v43 = vmul.f32 %v595_v0, %v249_v24  ;;  %v384_v44 = vadd.f32 %v352_v28, %v320_v31  ;;  %v323_v46 = vadd.f32 %v612_v1, %v285_v34 }
  0x2d   : > { %v385_v45 = vadd.f32 %v353_v29, %v321_v32  ;;  %v324_v47 = vadd.f32 %v612_v1, %v286_v35  ;;  %446 = vst [vmem:[%s643_s30 + $0xb0] sm:$0xff] %v414_v38  ;;  %v386_v49 = vadd.f32 %v354_v33, %v322_v40  ;;  %v288_v51 = vmul.f32 %v595_v0, %v250_v36 }
  0x2e   : > { %447 = vst [vmem:[%s643_s30 + $0xb8] sm:$0xff] %v415_v39  ;;  %v325_v50 = vadd.f32 %v612_v1, %v287_v43  ;;  %v289_v52 = vmul.f32 %v595_v0, %v251_v37  ;;  %v416_v53 = vmax.f32 %v384_v44, 0.0  ;;  %v387_v55 = vadd.f32 %v355_v41, %v323_v46 }
  0x2f   : > { %v417_v54 = vmax.f32 %v385_v45, 0.0  ;;  %v388_v56 = vadd.f32 %v356_v42, %v324_v47  ;;  %v418_v59 = vmax.f32 %v386_v49, 0.0  ;;  %v326_v61 = vadd.f32 %v612_v1, %v288_v51 }
  0x30   : > { %v389_v60 = vadd.f32 %v357_v48, %v325_v50  ;;  %v327_v62 = vadd.f32 %v612_v1, %v289_v52  ;;  %448 = vst [vmem:[%s643_s30 + $0xc0] sm:$0xff] %v416_v53  ;;  %v419_v0 = vmax.f32 %v387_v55, 0.0 }
  0x31   : > { %449 = vst [vmem:[%s643_s30 + $0xc8] sm:$0xff] %v417_v54  ;;  %v420_v63 = vmax.f32 %v388_v56, 0.0  ;;  %450 = vst [vmem:[%s643_s30 + $0xd0] sm:$0xff] %v418_v59  ;;  %v390_v3 = vadd.f32 %v358_v57, %v326_v61 }
  0x32   : > { %v421_v2 = vmax.f32 %v389_v60, 0.0  ;;  %v391_v4 = vadd.f32 %v359_v58, %v327_v62  ;;  %451 = vst [vmem:[%s643_s30 + $0xd8] sm:$0xff] %v419_v0 }
  0x33   : > { %452 = vst [vmem:[%s643_s30 + $0xe0] sm:$0xff] %v420_v63  ;;  %v422_v5 = vmax.f32 %v390_v3, 0.0 }
  0x34   : > { %453 = vst [vmem:[%s643_s30 + $0xe8] sm:$0xff] %v421_v2  ;;  %v423_v6 = vmax.f32 %v391_v4, 0.0 }
  0x35   : > { %454 = vst [vmem:[%s643_s30 + $0xf0] sm:$0xff] %v422_v5 }
  0x36   : > { %455 = vst [vmem:[%s643_s30 + $0xf8] sm:$0xff] %v423_v6 }
  0x37 PF: > { %s14_s15 = sadd.s32 1, %s555_s15  }
  0x38   : > { %p11_p4 = scmp.ge.s32.totalorder %s14_s15, 4  }
  0x3a   :  { %13 = sbr.rel (!%p11_p4) target bundleno = 1 (0x1), region = 69 }

// kernel: basic_block_forward.3
= control target key start
LH: loop header
LB: loop body
LE: loop exit
PB: predicated region body
PF: predicated region fallthrough
CT: control target
= control target key end

     0   :  { %s3707_s15 = smov 0   ;;  %s4629_s0 = inlined_call_operand.vmem [shape: f32[2,16,16,128], index: 0, kind: input, shape index: {}]   ;;  %s4630_s1 = inlined_call_operand.vmem [shape: bf16[1152,128], index: 1, kind: input, shape index: {}]   ;;  %s4631_s2 = inlined_call_operand.vmem [shape: bf16[2,16,16,128], index: 2, kind: output, shape index: {0}]   ;;  %s4632_s3 = inlined_call_operand.vmem [shape: f32[2,1,128], index: 3, kind: output, shape index: {1}]   ;;  %s4633_s4 = inlined_call_operand.vmem [shape: f32[2,1,128], index: 4, kind: output, shape index: {2}]  }
   0x1 LB: > { %s2810_s16 = sadd.s32 4294967295, %s3678_s15   ;;  %p2814_p0 = scmp.ge.s32.totalorder %s3678_s15, 1  ;;  %s3678_s15 = sphi %s3707_s15, %s15_s15  }
   0x2   : > { %p167_p1 = scmp.lt.s32.totalorder %s3678_s15, 3 }
   0x4   : > { %p168_p2 = pnand %p2814_p0, %p167_p1 }
   0x5   : > { %v3599_v0 = vld [vmem:[%s4630_s1 + $0x40] sm:$0xff] (!%p168_p2)   ;;  %v3680_v2 = vmov (!%p168_p2), 0.0   ;;  %v3601_v3 = vld [vmem:[%s4630_s1 + $0x48] sm:$0xff] (!%p168_p2)   ;;  %p199_p3 = scmp.lt.s32.totalorder (!%p168_p2), %s2810_s16, 1  ;;  %v3603_v5 = vld [vmem:[%s4630_s1 + $0x50] sm:$0xff] (!%p168_p2)   ;;  %v3681_v46 = vmov (!%p168_p2), 0.0|0.0  }
   0x6   : > { %171 = sbr.rel (%p168_p2) target bundleno = 561 (0x231), region = 28  ;;  %v3600_v1 = vld [vmem:[%s4630_s1] sm:$0xff] (!%p168_p2)   ;;  %216 = vst [vmem:[#allocation2] sm:$0xff] (!%p168_p2), %v3680_v2  ;;  %217 = vst [vmem:[#allocation2 + $0x8] sm:$0xff] (!%p168_p2), %v3680_v2  ;;  %3054 = vmatprep.subr.bf16.mxu0 (!%p168_p2), %v3599_v0  ;;  %3574 = vmatprep.subr.bf16.mxu1 (!%p168_p2), %v3599_v0  ;;  %v3602_v4 = vld [vmem:[%s4630_s1 + $0x8] sm:$0xff] (!%p168_p2)  }
   0x7   : > { %218 = vst [vmem:[#allocation2 + $0x10] sm:$0x3] (!%p168_p2), %v3680_v2  ;;  %219 = vst [vmem:[#allocation2 + $0x18] sm:$0xff] (!%p168_p2), %v3680_v2  ;;  %3055 = vmatpush3.bf16.msra.mxu0 (!%p168_p2), %v3600_v1  ;;  %3582 = vmatpush3.bf16.msra.mxu1 (!%p168_p2), %v3600_v1  ;;  %v3604_v6 = vld [vmem:[%s4630_s1 + $0x10] sm:$0xff] (!%p168_p2)   ;;  %v3605_v7 = vld [vmem:[%s4630_s1 + $0x58] sm:$0xff] (!%p168_p2)  }
   0x8   : > { %220 = vst [vmem:[#allocation2 + $0x20] sm:$0xff] (!%p168_p2), %v3680_v2  ;;  %221 = vst [vmem:[#allocation2 + $0x28] sm:$0x3] (!%p168_p2), %v3680_v2  ;;  %3056 = vmatprep.subr.bf16.mxu0 (!%p168_p2), %v3601_v3  ;;  %3575 = vmatprep.subr.bf16.mxu1 (!%p168_p2), %v3601_v3  ;;  %v3606_v8 = vld [vmem:[%s4630_s1 + $0x18] sm:$0xff] (!%p168_p2)   ;;  %v3607_v9 = vld [vmem:[%s4630_s1 + $0x60] sm:$0xff] (!%p168_p2)  }
   0x9   : > { %222 = vst [vmem:[#allocation2 + $0x30] sm:$0xff] (!%p168_p2), %v3680_v2  ;;  %223 = vst [vmem:[#allocation2 + $0x38] sm:$0xff] (!%p168_p2), %v3680_v2  ;;  %v3608_v10 = vld [vmem:[%s4630_s1 + $0x20] sm:$0xff] (!%p168_p2)   ;;  %v3609_v11 = vld [vmem:[%s4630_s1 + $0x68] sm:$0xff] (!%p168_p2)  }
   0xa   : > { %224 = vst [vmem:[#allocation2 + $0x40] sm:$0x3] (!%p168_p2), %v3680_v2  ;;  %225 = vst [vmem:[#allocation2 + $0x48] sm:$0xff] (!%p168_p2), %v3680_v2  ;;  %v3610_v18 = vld [vmem:[%s4630_s1 + $0x28] sm:$0xff] (!%p168_p2)   ;;  %v3611_v19 = vld [vmem:[%s4630_s1 + $0x70] sm:$0xff] (!%p168_p2)  }
   0xb   : > { %226 = vst [vmem:[#allocation2 + $0x50] sm:$0xff] (!%p168_p2), %v3680_v2  ;;  %227 = vst [vmem:[#allocation2 + $0x58] sm:$0x3] (!%p168_p2), %v3680_v2  ;;  %3057 = vmatpush3.bf16.msra.mxu0 (!%p168_p2), %v3602_v4  ;;  %3583 = vmatpush3.bf16.msra.mxu1 (!%p168_p2), %v3602_v4  ;;  %v3612_v20 = vld [vmem:[%s4630_s1 + $0x30] sm:$0xff] (!%p168_p2)   ;;  %v3613_v23 = vld [vmem:[%s4630_s1 + $0x78] sm:$0xff] (!%p168_p2)  }
   0xc   : > { %228 = vst [vmem:[#allocation2 + $0x60] sm:$0xff] (!%p168_p2), %v3680_v2  ;;  %229 = vst [vmem:[#allocation2 + $0x68] sm:$0xff] (!%p168_p2), %v3680_v2  ;;  %3058 = vmatprep.subr.bf16.mxu0 (!%p168_p2), %v3603_v5  ;;  %3576 = vmatprep.subr.bf16.mxu1 (!%p168_p2), %v3603_v5  ;;  %v3614_v26 = vld [vmem:[%s4630_s1 + $0x38] sm:$0xff] (!%p168_p2)   ;;  %v3615_v28 = vld [vmem:[%s4630_s1 + $0xc0] sm:$0xff] (!%p168_p2)  }
   0xd   : > { %230 = vst [vmem:[#allocation2 + $0x70] sm:$0x3] %v3680_v2  ;;  %231 = vst [vmem:[#allocation2 + $0x78] sm:$0xff] %v3680_v2  ;;  %s4635_s16 = smov (!%p199_p3, %s2810_s16), 1  ;;  %v399_v12 = vld [vmem:[#allocation2 + $0x1] sm:$0xff]  ;;  %v3621_v49 = vld [vmem:[%s4630_s1 + $0xd0] sm:$0xff]  }
   0xe   : > { %232 = vst [vmem:[#allocation2 + $0x80] sm:$0xff] %v3680_v2  ;;  %233 = vst [vmem:[#allocation2 + $0x88] sm:$0x3] %v3680_v2  ;;  %s2925_s5 = sshll.u32 %s4635_s16, 8  ;;  %v400_v13 = vld [vmem:[#allocation2 + $0x9] sm:$0xff]  ;;  %v3616_v30 = vld [vmem:[%s4630_s1 + $0x140] sm:$0xff]   ;;  %s214_s8 = scalar_lea.vmem %s4633_s4, %s4635_s16 }
   0xf   : > { %234 = vst [vmem:[#allocation2 + $0x90] sm:$0xff] %v3680_v2  ;;  %235 = vst [vmem:[#allocation2 + $0x98] sm:$0xff] %v3680_v2  ;;  %3059 = vmatpush3.bf16.msra.mxu0 %v3604_v6  ;;  %3584 = vmatpush3.bf16.msra.mxu1 %v3604_v6  ;;  %s3752_s12 = scalar_lea.vmem %s4629_s0, %s2925_s5  ;;  %v431_v15 = vpack.c.bf16 %v400_v13, %v399_v12  ;;  %v3617_v32 = vld [vmem:[%s4630_s1 + $0x80] sm:$0xff]   ;;  %v3619_v34 = vld [vmem:[%s4630_s1 + $0xc8] sm:$0xff]   ;;  %s2926_s25 = sshll.u32 %s4635_s16, 7 }
  0x10   : > { %236 = vst [vmem:[#allocation2 + $0xa0] sm:$0x3] %v3680_v2  ;;  %237 = vst [vmem:[#allocation2 + $0xa8] sm:$0xff] %v3680_v2  ;;  %3060 = vmatprep.subr.bf16.mxu0 %v3605_v7  ;;  %3577 = vmatprep.subr.bf16.mxu1 %v3605_v7  ;;  %v292_v14 = vld [vmem:[%s3752_s12 + $0xb0] sm:$0xff]  ;;  %v293_v16 = vld [vmem:[%s3752_s12 + $0xb8] sm:$0xff]  ;;  %s4553_s28 = scalar_lea.vmem %s4631_s2, %s2926_s25  ;;  %s211_s5 = scalar_lea.vmem %s4632_s3, %s4635_s16 }
  0x11   : > { %238 = vst [vmem:[#allocation2 + $0xb0] sm:$0xff] %v3680_v2  ;;  %239 = vst [vmem:[#allocation2 + $0xb8] sm:$0x3] %v3680_v2  ;;  %v443_v17 = vpack.c.bf16 %v293_v16, %v292_v14  ;;  %1664 = vmatprep.mubr.bf16.mxu0 %v431_v15  ;;  %v270_v21 = vld [vmem:[%s3752_s12] sm:$0xff]  ;;  %v271_v22 = vld [vmem:[%s3752_s12 + $0x8] sm:$0xff] }
  0x12   : > { %240 = vst [vmem:[#allocation2 + $0xc0] sm:$0xff] %v3680_v2  ;;  %241 = vst [vmem:[#allocation2 + $0xc8] sm:$0xff] %v3680_v2  ;;  %v294_v24 = vld [vmem:[%s3752_s12 + $0xc0] sm:$0xff]  ;;  %v295_v25 = vld [vmem:[%s3752_s12 + $0xc8] sm:$0xff]  ;;  %v3798_v35 = vpack.c.bf16 %v271_v22, %v270_v21 }
  0x13   : > { %242 = vst [vmem:[#allocation2 + $0xd0] sm:$0x3] %v3680_v2  ;;  %243 = vst [vmem:[#allocation2 + $0xd8] sm:$0xff] %v3680_v2  ;;  %3061 = vmatpush3.bf16.msra.mxu0 %v3606_v8  ;;  %3585 = vmatpush3.bf16.msra.mxu1 %v3606_v8  ;;  %v3618_v33 = vld [vmem:[%s4630_s1 + $0x100] sm:$0xff]   ;;  %v3624_v36 = vld [vmem:[%s4630_s1 + $0x148] sm:$0xff]   ;;  %v444_v39 = vpack.c.bf16 %v295_v25, %v294_v24 }
  0x14   : > { %244 = vst [vmem:[#allocation2 + $0xe0] sm:$0xff] %v3680_v2  ;;  %245 = vst [vmem:[#allocation2 + $0xe8] sm:$0x3] %v3680_v2  ;;  %3062 = vmatprep.subr.bf16.mxu0 %v3607_v9  ;;  %3578 = vmatprep.subr.bf16.mxu1 %v3607_v9  ;;  %v272_v37 = vld [vmem:[%s3752_s12 + $0x10] sm:$0xff]  ;;  %v3620_v38 = vld [vmem:[%s4630_s1 + $0x88] sm:$0xff]  }
  0x15   : > { %246 = vst [vmem:[#allocation2 + $0xf0] sm:$0xff] %v3680_v2  ;;  %247 = vst [vmem:[#allocation2 + $0xf8] sm:$0xff] %v3680_v2  ;;  %1760 = vmatprep.mubr.bf16.mxu1 %v443_v17  ;;  %v3626_v42 = vld [vmem:[%s4630_s1 + $0x108] sm:$0xff]   ;;  %v273_v43 = vld [vmem:[%s3752_s12 + $0x18] sm:$0xff] }
  0x16   : > { %248 = vst [vmem:[#allocation2 + $0x100] sm:$0x3] %v3680_v2  ;;  %249 = vst [vmem:[#allocation2 + $0x108] sm:$0xff] %v3680_v2  ;;  %v296_v44 = vld [vmem:[%s3752_s12 + $0xd0] sm:$0xff]  ;;  %v297_v45 = vld [vmem:[%s3752_s12 + $0xd8] sm:$0xff]  ;;  %v3828_v56 = vpack.c.bf16 %v273_v43, %v272_v37 }
  0x17   : > { %250 = vst [vmem:[#allocation2 + $0x110] sm:$0xff] %v3680_v2  ;;  %251 = vst [vmem:[#allocation2 + $0x118] sm:$0x3] %v3680_v2  ;;  %3063 = vmatpush3.bf16.msra.mxu0 %v3608_v10  ;;  %3586 = vmatpush3.bf16.msra.mxu1 %v3608_v10  ;;  %v3622_v50 = vld [vmem:[%s4630_s1 + $0x90] sm:$0xff]   ;;  %v274_v53 = vld [vmem:[%s3752_s12 + $0x20] sm:$0xff]  ;;  %v445_v59 = vpack.c.bf16 %v297_v45, %v296_v44 }
  0x18   : > { %252 = vst [vmem:[#allocation2 + $0x120] sm:$0xff] %v3680_v2  ;;  %253 = vst [vmem:[#allocation2 + $0x128] sm:$0xff] %v3680_v2  ;;  %3064 = vmatprep.subr.bf16.mxu0 %v3609_v11  ;;  %3579 = vmatprep.subr.bf16.mxu1 %v3609_v11  ;;  %v275_v54 = vld [vmem:[%s3752_s12 + $0x28] sm:$0xff]  ;;  %v298_v55 = vld [vmem:[%s3752_s12 + $0xe0] sm:$0xff] }
  0x19   : > { %254 = vst [vmem:[#allocation2 + $0x130] sm:$0x3] %v3680_v2  ;;  %255 = vst [vmem:[#allocation2 + $0x138] sm:$0xff] %v3680_v2  ;;  %v299_v57 = vld [vmem:[%s3752_s12 + $0xe8] sm:$0xff]  ;;  %v3623_v58 = vld [vmem:[%s4630_s1 + $0xd8] sm:$0xff]   ;;  %v3856_v7 = vpack.c.bf16 %v275_v54, %v274_v53 }
  0x1a   : > { %256 = vst [vmem:[#allocation2 + $0x140] sm:$0xff] %v3680_v2  ;;  %257 = vst [vmem:[#allocation2 + $0x148] sm:$0x3] %v3680_v2  ;;  %v3625_v60 = vld [vmem:[%s4630_s1 + $0x98] sm:$0xff]   ;;  %v3627_v0 = vld [vmem:[%s4630_s1 + $0xe0] sm:$0xff]   ;;  %v446_v9 = vpack.c.bf16 %v299_v57, %v298_v55 }
  0x1b   : > { %258 = vst [vmem:[#allocation2 + $0x150] sm:$0xff] %v3680_v2  ;;  %259 = vst [vmem:[#allocation2 + $0x158] sm:$0xff] %v3680_v2  ;;  %3065 = vmatpush3.bf16.msra.mxu0 %v3610_v18  ;;  %3587 = vmatpush3.bf16.msra.mxu1 %v3610_v18  ;;  %v3632_v1 = vld [vmem:[%s4630_s1 + $0x150] sm:$0xff]   ;;  %v3628_v6 = vld [vmem:[%s4630_s1 + $0xa0] sm:$0xff]  }
  0x1c   : > { %260 = vst [vmem:[#allocation2 + $0x160] sm:$0x3] %v3680_v2  ;;  %261 = vst [vmem:[#allocation2 + $0x168] sm:$0xff] %v3680_v2  ;;  %3066 = vmatprep.subr.bf16.mxu0 %v3611_v19  ;;  %3580 = vmatprep.subr.bf16.mxu1 %v3611_v19  ;;  %v3634_v3 = vld [vmem:[%s4630_s1 + $0x110] sm:$0xff]   ;;  %v3629_v8 = vld [vmem:[%s4630_s1 + $0xe8] sm:$0xff]  }
  0x1d   : > { %262 = vst [vmem:[#allocation2 + $0x170] sm:$0xff] %v3680_v2  ;;  %263 = vst [vmem:[#allocation2 + $0x178] sm:$0x3] %v3680_v2  ;;  %v276_v10 = vld [vmem:[%s3752_s12 + $0x30] sm:$0xff]  ;;  %v277_v11 = vld [vmem:[%s3752_s12 + $0x38] sm:$0xff] }
  0x1e   : > { %264 = vst [vmem:[#allocation2 + $0x180] sm:$0xff] %v3680_v2  ;;  %265 = vst [vmem:[#allocation2 + $0x188] sm:$0xff] %v3680_v2  ;;  %v3630_v12 = vld [vmem:[%s4630_s1 + $0xa8] sm:$0xff]   ;;  %v3639_v18 = vld [vmem:[%s4630_s1 + $0x158] sm:$0xff]  }
  0x1f   : > { %266 = vst [vmem:[#allocation2 + $0x190] sm:$0x3] %v3680_v2  ;;  %267 = vst [vmem:[#allocation2 + $0x198] sm:$0xff] %v3680_v2  ;;  %3067 = vmatpush3.bf16.msra.mxu0 %v3612_v20  ;;  %3588 = vmatpush3.bf16.msra.mxu1 %v3612_v20  ;;  %v3640_v19 = vld [vmem:[%s4630_s1 + $0x118] sm:$0xff]   ;;  %v278_v20 = vld [vmem:[%s3752_s12 + $0x40] sm:$0xff] }
  0x20   : > { %268 = vst [vmem:[#allocation2 + $0x1a0] sm:$0xff] %v3680_v2  ;;  %269 = vst [vmem:[#allocation2 + $0x1a8] sm:$0x3] %v3680_v2  ;;  %3068 = vmatprep.subr.bf16.mxu0 %v3613_v23  ;;  %3581 = vmatprep.subr.bf16.mxu1 %v3613_v23 }
  0x21   : > { %325 = vst [vmem:[#allocation2 + $0x121] sm:$0xff] %v292_v14  ;;  %326 = vst [vmem:[#allocation2 + $0x129] sm:$0xff] %v293_v16  ;;  %v3631_v16 = vld [vmem:[%s4630_s1 + $0xf0] sm:$0xff]  }
  0x22   : > { %303 = vst [vmem:[#allocation2 + $0x19] sm:$0xff] %v270_v21  ;;  %304 = vst [vmem:[#allocation2 + $0x21] sm:$0xff] %v271_v22  ;;  %v279_v21 = vld [vmem:[%s3752_s12 + $0x48] sm:$0xff] }
  0x23   : > { %327 = vst [vmem:[#allocation2 + $0x139] sm:$0xff] %v294_v24  ;;  %328 = vst [vmem:[#allocation2 + $0x141] sm:$0xff] %v295_v25  ;;  %3069 = vmatpush3.bf16.msra.mxu0 %v3614_v26  ;;  %3589 = vmatpush3.bf16.msra.mxu1 %v3614_v26  ;;  %v3885_v24 = vld [vmem:[%s3752_s12 + $0x50] sm:$0xff]  ;;  %v3890_v26 = vpack.c.bf16 %v277_v11, %v276_v10 }
  0x24   : > { %3166 = vmatprep.subr.bf16.mxu1 %v3615_v28  ;;  %3278 = vmatprep.subr.bf16.mxu0 %v3616_v30  ;;  %305 = vst [vmem:[#allocation2 + $0x31] sm:$0xff] %v272_v37  ;;  %306 = vst [vmem:[#allocation2 + $0x39] sm:$0xff] %v273_v43  ;;  %v3633_v25 = vld [vmem:[%s4630_s1 + $0xb0] sm:$0xff]   ;;  %v3635_v28 = vld [vmem:[%s4630_s1 + $0xf8] sm:$0xff]  }
  0x25   : > { %329 = vst [vmem:[#allocation2 + $0x151] sm:$0xff] %v296_v44  ;;  %330 = vst [vmem:[#allocation2 + $0x159] sm:$0xff] %v297_v45  ;;  %v3643_v37 = vld [vmem:[%s4630_s1 + $0x120] sm:$0xff]   ;;  %v3926_v44 = vpack.c.bf16 %v279_v21, %v278_v20  ;;  %v3642_v45 = vld [vmem:[%s4630_s1 + $0x1c8] sm:$0xff]  }
  0x26   : > { %1665 = vmatmul.mubr.bf16.vlgmr.msra.gmra.mrb[0].mxu0 %v3681_v46  ;;  %307 = vst [vmem:[#allocation2 + $0x49] sm:$0xff] %v274_v53  ;;  %308 = vst [vmem:[#allocation2 + $0x51] sm:$0xff] %v275_v54  ;;  %v3638_v43 = vld [vmem:[%s4630_s1 + $0x180] sm:$0xff]   ;;  %v3646_v54 = vld [vmem:[%s4630_s1 + $0x128] sm:$0xff]  }
  0x27   : > { %3279 = vmatpush3.bf16.msra.mxu0 %v3618_v33  ;;  %1672 = vmatprep.mubr.bf16.mxu0 %v3798_v35  ;;  %331 = vst [vmem:[#allocation2 + $0x169] sm:$0xff] %v298_v55  ;;  %332 = vst [vmem:[#allocation2 + $0x171] sm:$0xff] %v299_v57  ;;  %v464_v33 = vld [vmem:[#allocation2 + $0xa] sm:$0xff] }
  0x28   : > { %v359_v27 = vld [vmem:[#allocation2 + $0x120] sm:$0xff]  ;;  %v360_v29 = vld [vmem:[#allocation2 + $0x128] sm:$0xff]  ;;  %3280 = vmatprep.subr.bf16.mxu0 %v3624_v36  ;;  %309 = vst [vmem:[#allocation2 + $0x61] sm:$0xff] %v276_v10  ;;  %310 = vst [vmem:[#allocation2 + $0x69] sm:$0xff] %v277_v11 }
  0x29   : > { %v3787_v31 = vpack.c.bf16 %v360_v29, %v359_v27  ;;  %v337_v40 = vld [vmem:[#allocation2 + $0x18] sm:$0xff]  ;;  %v338_v41 = vld [vmem:[#allocation2 + $0x20] sm:$0xff]  ;;  %311 = vst [vmem:[#allocation2 + $0x79] sm:$0xff] %v278_v20  ;;  %312 = vst [vmem:[#allocation2 + $0x81] sm:$0xff] %v279_v21 }
  0x2a   : > { %v361_v47 = vld [vmem:[#allocation2 + $0x138] sm:$0xff]  ;;  %v362_v48 = vld [vmem:[#allocation2 + $0x140] sm:$0xff]  ;;  %v3821_v51 = vpack.c.bf16 %v338_v41, %v337_v40  ;;  %313 = vst [vmem:[#allocation2 + $0x91] sm:$0xff] %v3885_v24  ;;  %v3917_v40 = vld [vmem:[%s3752_s12 + $0x68] sm:$0xff] }
  0x2b   : > { %1761 = vmatmul.mubr.bf16.vlgmr.msra.gmra.mrb[0].mxu1 %v3787_v31  ;;  %v3823_v52 = vpack.c.bf16 %v362_v48, %v361_v47  ;;  %3281 = vmatpush3.bf16.msra.mxu0 %v3626_v42  ;;  %v339_v61 = vld [vmem:[#allocation2 + $0x30] sm:$0xff]  ;;  %v340_v62 = vld [vmem:[#allocation2 + $0x38] sm:$0xff]  ;;  %316 = vst [vmem:[#allocation2 + $0xb1] sm:$0xff] %v3917_v40  ;;  %v466_v47 = vld [vmem:[#allocation2 + $0x22] sm:$0xff] }
  0x2c   : > { %3167 = vmatpush3.bf16.msra.mxu1 %v3617_v32  ;;  %1768 = vmatprep.mubr.bf16.mxu1 %v444_v39  ;;  %v363_v63 = vld [vmem:[#allocation2 + $0x150] sm:$0xff]  ;;  %v364_v2 = vld [vmem:[#allocation2 + $0x158] sm:$0xff]  ;;  %v3849_v4 = vpack.c.bf16 %v340_v62, %v339_v61  ;;  %v463_v32 = vld [vmem:[#allocation2 + $0x2] sm:$0xff] }
  0x2d   : > { %3168 = vmatprep.subr.bf16.mxu1 %v3619_v34  ;;  %3282 = vmatprep.subr.bf16.mxu0 %v3632_v1  ;;  %v3851_v5 = vpack.c.bf16 %v364_v2, %v363_v63  ;;  %v341_v13 = vld [vmem:[#allocation2 + $0x48] sm:$0xff]  ;;  %v342_v14 = vld [vmem:[#allocation2 + $0x50] sm:$0xff]  ;;  %v281_v27 = vld [vmem:[%s3752_s12 + $0x58] sm:$0xff]  ;;  %v495_v42 = vpack.c.bf16 %v464_v33, %v463_v32 }
  0x2e   : > { %1673 = vmatmul.mubr.bf16.gmra.mrb[4].mxu0 %v3821_v51  ;;  %v365_v15 = vld [vmem:[#allocation2 + $0x168] sm:$0xff]  ;;  %v366_v17 = vld [vmem:[#allocation2 + $0x170] sm:$0xff]  ;;  %v3880_v22 = vpack.c.bf16 %v342_v14, %v341_v13  ;;  %314 = vst [vmem:[#allocation2 + $0x99] sm:$0xff] %v281_v27  ;;  %v3636_v29 = vld [vmem:[%s4630_s1 + $0xb8] sm:$0xff]   ;;  %v3970_v63 = vpack.c.bf16 %v281_v27, %v3885_v24 }
  0x2f   : > { %1680 = vmatprep.mubr.bf16.mxu0 %v3828_v56  ;;  %3283 = vmatpush3.bf16.msra.mxu0 %v3634_v3  ;;  %v3882_v23 = vpack.c.bf16 %v366_v17, %v365_v15  ;;  %v343_v30 = vld [vmem:[#allocation2 + $0x60] sm:$0xff]  ;;  %v344_v36 = vld [vmem:[#allocation2 + $0x68] sm:$0xff]  ;;  %v3647_v57 = vld [vmem:[%s4630_s1 + $0x1d0] sm:$0xff]  }
  0x30   : > { %3169 = vmatpush3.bf16.msra.mxu1 %v3620_v38  ;;  %3284 = vmatprep.subr.bf16.mxu0 %v3639_v18  ;;  %v3641_v34 = vld [vmem:[%s4630_s1 + $0x160] sm:$0xff]   ;;  %v3920_v41 = vpack.c.bf16 %v344_v36, %v343_v30  ;;  %v3644_v48 = vld [vmem:[%s4630_s1 + $0x188] sm:$0xff]   ;;  %v345_v53 = vld [vmem:[#allocation2 + $0x78] sm:$0xff] }
  0x31   : > { %3170 = vmatprep.subr.bf16.mxu1 %v3621_v49  ;;  %v3637_v38 = vld [vmem:[%s4630_s1 + $0x1c0] sm:$0xff]   ;;  %v3645_v49 = vld [vmem:[%s4630_s1 + $0x168] sm:$0xff]   ;;  %v3648_v62 = vld [vmem:[%s4630_s1 + $0x190] sm:$0xff]  }
  0x32   : > { %v3914_v39 = vld [vmem:[%s3752_s12 + $0x60] sm:$0xff]  ;;  %v3650_v1 = vld [vmem:[%s4630_s1 + $0x130] sm:$0xff]   ;;  %v3651_v11 = vld [vmem:[%s4630_s1 + $0x1d8] sm:$0xff]  }
  0x33   : > { %1769 = vmatmul.mubr.bf16.gmra.mrb[4].mxu1 %v3823_v52  ;;  %3285 = vmatpush3.bf16.msra.mxu0 %v3640_v19  ;;  %315 = vst [vmem:[#allocation2 + $0xa9] sm:$0xff] %v3914_v39  ;;  %v465_v46 = vld [vmem:[#allocation2 + $0x1a] sm:$0xff]  ;;  %v3979_v2 = vld [vmem:[%s3752_s12 + $0x90] sm:$0xff]  ;;  %v4014_v19 = vld [vmem:[%s3752_s12 + $0xa8] sm:$0xff] }
  0x34   : > { %3171 = vmatpush3.bf16.msra.mxu1 %v3622_v50  ;;  %1776 = vmatprep.mubr.bf16.mxu1 %v445_v59  ;;  %v3938_v50 = vld [vmem:[%s3752_s12 + $0x70] sm:$0xff]  ;;  %v346_v55 = vld [vmem:[#allocation2 + $0x80] sm:$0xff]  ;;  %v3958_v59 = vld [vmem:[%s3752_s12 + $0x88] sm:$0xff]  ;;  %v3962_v61 = vpack.c.bf16 %v466_v47, %v465_v46  ;;  %321 = vst [vmem:[#allocation2 + $0xf1] sm:$0xff] %v3979_v2 }
  0x35   : > { %3172 = vmatprep.subr.bf16.mxu1 %v3623_v58  ;;  %3286 = vmatprep.subr.bf16.mxu0 %v3641_v34  ;;  %317 = vst [vmem:[#allocation2 + $0xc1] sm:$0xff] %v3938_v50  ;;  %v3955_v58 = vld [vmem:[%s3752_s12 + $0x80] sm:$0xff]  ;;  %320 = vst [vmem:[#allocation2 + $0xe1] sm:$0xff] %v3958_v59  ;;  %v467_v3 = vld [vmem:[#allocation2 + $0x32] sm:$0xff] }
  0x36   : > { %1681 = vmatmul.mubr.bf16.gmra.mrb[8].mxu0 %v3849_v4  ;;  %319 = vst [vmem:[#allocation2 + $0xd9] sm:$0xff] %v3955_v58  ;;  %v348_v10 = vld [vmem:[#allocation2 + $0x98] sm:$0xff]  ;;  %v4011_v18 = vld [vmem:[%s3752_s12 + $0xa0] sm:$0xff]  ;;  %324 = vst [vmem:[#allocation2 + $0x111] sm:$0xff] %v4014_v19  ;;  %v4064_v47 = vpack.c.bf16 %v3958_v59, %v3955_v58 }
  0x37   : > { %1688 = vmatprep.mubr.bf16.mxu0 %v3856_v7  ;;  %3287 = vmatpush3.bf16.msra.mxu0 %v3643_v37  ;;  %v3653_v15 = vld [vmem:[%s4630_s1 + $0x178] sm:$0xff]   ;;  %323 = vst [vmem:[#allocation2 + $0x109] sm:$0xff] %v4011_v18  ;;  %v469_v24 = vld [vmem:[#allocation2 + $0x4a] sm:$0xff]  ;;  %v3655_v27 = vld [vmem:[%s4630_s1 + $0x1e0] sm:$0xff]  }
  0x38   : > { %3173 = vmatpush3.bf16.msra.mxu1 %v3625_v60  ;;  %3288 = vmatprep.subr.bf16.mxu0 %v3645_v49  ;;  %v3960_v60 = vpack.c.bf16 %v346_v55, %v345_v53  ;;  %v3654_v17 = vld [vmem:[%s4630_s1 + $0x138] sm:$0xff]   ;;  %v3658_v34 = vld [vmem:[%s4630_s1 + $0x1e8] sm:$0xff]   ;;  %v3663_v46 = vld [vmem:[%s4630_s1 + $0x1b0] sm:$0xff]  }
  0x39   : > { %3174 = vmatprep.subr.bf16.mxu1 %v3627_v0  ;;  %v3649_v0 = vld [vmem:[%s4630_s1 + $0x170] sm:$0xff]   ;;  %v3660_v36 = vld [vmem:[%s4630_s1 + $0x1a8] sm:$0xff]   ;;  %v473_v49 = vld [vmem:[#allocation2 + $0x7a] sm:$0xff] }
  0x3a   : > { %v349_v20 = vld [vmem:[#allocation2 + $0xa8] sm:$0xff]  ;;  %v350_v21 = vld [vmem:[#allocation2 + $0xb0] sm:$0xff] }
  0x3b   : > { %1777 = vmatmul.mubr.bf16.gmra.mrb[8].mxu1 %v3851_v5  ;;  %3289 = vmatpush3.bf16.msra.mxu0 %v3646_v54  ;;  %v4034_v30 = vpack.c.bf16 %v350_v21, %v349_v20  ;;  %v300_v53 = vld [vmem:[%s3752_s12 + $0xf0] sm:$0xff] }
  0x3c   : > { %3175 = vmatpush3.bf16.msra.mxu1 %v3628_v6  ;;  %1784 = vmatprep.mubr.bf16.mxu1 %v446_v9  ;;  %v468_v6 = vld [vmem:[#allocation2 + $0x3a] sm:$0xff]  ;;  %v347_v9 = vld [vmem:[#allocation2 + $0x90] sm:$0xff]  ;;  %333 = vst [vmem:[#allocation2 + $0x181] sm:$0xff] %v300_v53 }
  0x3d   : > { %3176 = vmatprep.subr.bf16.mxu1 %v3629_v8  ;;  %3290 = vmatprep.subr.bf16.mxu0 %v3649_v0  ;;  %v3982_v8 = vld [vmem:[%s3752_s12 + $0x98] sm:$0xff]  ;;  %v3996_v13 = vpack.c.bf16 %v348_v10, %v347_v9  ;;  %v3998_v14 = vpack.c.bf16 %v468_v6, %v467_v3  ;;  %v351_v37 = vld [vmem:[#allocation2 + $0xc0] sm:$0xff] }
  0x3e   : > { %1689 = vmatmul.mubr.bf16.gmra.mrb[12].mxu0 %v3880_v22  ;;  %322 = vst [vmem:[#allocation2 + $0xf9] sm:$0xff] %v3982_v8  ;;  %v353_v54 = vld [vmem:[#allocation2 + $0xd8] sm:$0xff]  ;;  %v354_v55 = vld [vmem:[#allocation2 + $0xe0] sm:$0xff] }
  0x3f   : > { %1696 = vmatprep.mubr.bf16.mxu0 %v3890_v26  ;;  %3291 = vmatpush3.bf16.msra.mxu0 %v3650_v1  ;;  %v4078_v58 = vpack.c.bf16 %v354_v55, %v353_v54  ;;  %v475_v0 = vld [vmem:[#allocation2 + $0x92] sm:$0xff]  ;;  %v476_v6 = vld [vmem:[#allocation2 + $0x9a] sm:$0xff] }
  0x40   : > { %3177 = vmatpush3.bf16.msra.mxu1 %v3630_v12  ;;  %v3652_v12 = vld [vmem:[%s4630_s1 + $0x198] sm:$0xff]   ;;  %3292 = vmatprep.subr.bf16.mxu0 %v3653_v15  ;;  %v355_v1 = vld [vmem:[#allocation2 + $0xf0] sm:$0xff]  ;;  %v4092_v10 = vpack.c.bf16 %v476_v6, %v475_v0 }
  0x41   : > { %3178 = vmatprep.subr.bf16.mxu1 %v3631_v16  ;;  %v4005_v16 = vpack.c.bf16 %v3917_v40, %v3914_v39  ;;  %v472_v39 = vld [vmem:[#allocation2 + $0x6a] sm:$0xff]  ;;  %v478_v15 = vld [vmem:[#allocation2 + $0xb2] sm:$0xff]  ;;  %v492_v55 = vld [vmem:[#allocation2 + $0x15a] sm:$0xff] }
  0x42   : > { %v491_v54 = vld [vmem:[#allocation2 + $0x152] sm:$0xff] }
  0x43   : > { %1785 = vmatmul.mubr.bf16.gmra.mrb[12].mxu1 %v3882_v23  ;;  %3293 = vmatpush3.bf16.msra.mxu0 %v3654_v17 }
  0x44   : > { %3179 = vmatpush3.bf16.msra.mxu1 %v3633_v25  ;;  %1825 = vmatprep.mubr.bf16.mxu1 %v3821_v51  ;;  %v3941_v51 = vld [vmem:[%s3752_s12 + $0x78] sm:$0xff] }
  0x45   : > { %3180 = vmatprep.subr.bf16.mxu1 %v3635_v28  ;;  %318 = vst [vmem:[#allocation2 + $0xc9] sm:$0xff] %v3941_v51  ;;  %v470_v25 = vld [vmem:[#allocation2 + $0x52] sm:$0xff]  ;;  %v4028_v28 = vld [vmem:[%s4630_s1 + $0x200] sm:$0xff]   ;;  %v4040_v33 = vpack.c.bf16 %v3941_v51, %v3938_v50 }
  0x46   : > { %1697 = vmatmul.mubr.bf16.gmra.mrb[16].mxu0 %v3920_v41  ;;  %3526 = vmatprep.subr.bf16.mxu0 %v4028_v28  ;;  %v4036_v32 = vpack.c.bf16 %v470_v25, %v469_v24  ;;  %v474_v50 = vld [vmem:[#allocation2 + $0x82] sm:$0xff]  ;;  %v3666_v51 = vld [vmem:[%s4630_s1 + $0x1b8] sm:$0xff]  }
  0x47   : > { %1704 = vmatprep.mubr.bf16.mxu0 %v3926_v44  ;;  %v4080_v59 = vpack.c.bf16 %v474_v50, %v473_v49  ;;  %v356_v3 = vld [vmem:[#allocation2 + $0xf8] sm:$0xff]  ;;  %v3659_v25 = vld [vmem:[%s4630_s1 + $0x208] sm:$0xff]  }
  0x48   : > { %3181 = vmatpush3.bf16.msra.mxu1 %v3636_v29  ;;  %v3657_v29 = vld [vmem:[%s4630_s1 + $0x1a0] sm:$0xff]   ;;  %v4090_v9 = vpack.c.bf16 %v356_v3, %v355_v1  ;;  %v488_v49 = vld [vmem:[#allocation2 + $0x12a] sm:$0xff]  ;;  %v4170_v1 = vpack.c.bf16 %v492_v55, %v491_v54 }
  0x49   : > { %3390 = vmatprep.subr.bf16.mxu1 %v3637_v38  ;;  %v471_v38 = vld [vmem:[#allocation2 + $0x62] sm:$0xff]  ;;  %v493_v3 = vld [vmem:[#allocation2 + $0x16a] sm:$0xff] }
  0x4b   : > { %1826 = vmatmul.mubr.bf16.vlgmr.msra.gmra.mrb[16].mxu1 %v495_v42  ;;  %v3661_v42 = vld [vmem:[%s4630_s1 + $0x1f0] sm:$0xff]  }
  0x4c   : > { %3391 = vmatpush3.bf16.msra.mxu1 %v3638_v43  ;;  %1833 = vmatprep.mubr.bf16.mxu1 %v3849_v4  ;;  %v352_v40 = vld [vmem:[#allocation2 + $0xc8] sm:$0xff] }
  0x4d   : > { %3392 = vmatprep.subr.bf16.mxu1 %v3642_v45  ;;  %v4055_v43 = vpack.c.bf16 %v352_v40, %v351_v37  ;;  %v4057_v45 = vpack.c.bf16 %v472_v39, %v471_v38  ;;  %v3668_v38 = vld [vmem:[%s4630_s1 + $0x228] sm:$0xff]   ;;  %v486_v40 = vld [vmem:[#allocation2 + $0x112] sm:$0xff] }
  0x4e   : > { %1705 = vmatmul.mubr.bf16.gmra.mrb[20].mxu0 %v3960_v60  ;;  %v485_v39 = vld [vmem:[#allocation2 + $0x10a] sm:$0xff] }
  0x4f   : > { %1712 = vmatprep.mubr.bf16.mxu0 %v3970_v63 }
  0x50   : > { %3393 = vmatpush3.bf16.msra.mxu1 %v3644_v48  ;;  %v3664_v48 = vld [vmem:[%s4630_s1 + $0x1f8] sm:$0xff]  }
  0x51   : > { %3394 = vmatprep.subr.bf16.mxu1 %v3647_v57  ;;  %v301_v57 = vld [vmem:[%s3752_s12 + $0xf8] sm:$0xff] }
  0x52   : > { %334 = vst [vmem:[#allocation2 + $0x189] sm:$0xff] %v301_v57  ;;  %v4106_v21 = vpack.c.bf16 %v301_v57, %v300_v53  ;;  %v490_v53 = vld [vmem:[#allocation2 + $0x142] sm:$0xff] }
  0x53   : > { %1834 = vmatmul.mubr.bf16.gmra.mrb[20].mxu1 %v3962_v61  ;;  %v557_v57 = vld [vmem:[#allocation2 + $0x180] sm:$0xff] }
  0x54   : > { %1841 = vmatprep.mubr.bf16.mxu1 %v3880_v22  ;;  %3395 = vmatpush3.bf16.msra.mxu1 %v3648_v62  ;;  %v4084_v62 = vpack.c.bf16 %v3982_v8, %v3979_v2  ;;  %v4096_v2 = vpack.c.bf16 %v4014_v19, %v4011_v18  ;;  %v477_v8 = vld [vmem:[#allocation2 + $0xaa] sm:$0xff]  ;;  %v479_v18 = vld [vmem:[#allocation2 + $0xc2] sm:$0xff] }
  0x55   : > { %3396 = vmatprep.subr.bf16.mxu1 %v3651_v11  ;;  %v357_v11 = vld [vmem:[#allocation2 + $0x108] sm:$0xff]  ;;  %v4104_v20 = vpack.c.bf16 %v478_v15, %v477_v8 }
  0x56   : > { %1713 = vmatmul.mubr.bf16.gmra.mrb[24].mxu0 %v3996_v13  ;;  %v480_v19 = vld [vmem:[#allocation2 + $0xca] sm:$0xff] }
  0x57   : > { %1720 = vmatprep.mubr.bf16.mxu0 %v4005_v16  ;;  %v4112_v24 = vpack.c.bf16 %v480_v19, %v479_v18 }
  0x58   : > { %3397 = vmatpush3.bf16.msra.mxu1 %v3652_v12  ;;  %v358_v12 = vld [vmem:[#allocation2 + $0x110] sm:$0xff] }
  0x59   : > { %3398 = vmatprep.subr.bf16.mxu1 %v3655_v27  ;;  %v4102_v17 = vpack.c.bf16 %v358_v12, %v357_v11  ;;  %v481_v27 = vld [vmem:[#allocation2 + $0xda] sm:$0xff]  ;;  %v558_v0 = vld [vmem:[#allocation2 + $0x188] sm:$0xff] }
  0x5a   : > { %v685_v12 = vld [vmem:[#allocation2 + $0x182] sm:$0xff] }
  0x5b   : > { %1842 = vmatmul.mubr.bf16.gmra.mrb[24].mxu1 %v3998_v14 }
  0x5c   : > { %1849 = vmatprep.mubr.bf16.mxu1 %v3920_v41  ;;  %3399 = vmatpush3.bf16.msra.mxu1 %v3657_v29  ;;  %v482_v29 = vld [vmem:[#allocation2 + $0xe2] sm:$0xff] }
  0x5d   : > { %3400 = vmatprep.subr.bf16.mxu1 %v3658_v34  ;;  %v4125_v34 = vpack.c.bf16 %v482_v29, %v481_v27 }
  0x5e   : > { %1721 = vmatmul.mubr.bf16.gmra.mrb[28].mxu0 %v4034_v30 }
  0x5f   : > { %1728 = vmatprep.mubr.bf16.mxu0 %v4040_v33 }
  0x60   : > { %3401 = vmatpush3.bf16.msra.mxu1 %v3660_v36  ;;  %v3667_v36 = vld [vmem:[%s4630_s1 + $0x220] sm:$0xff]  }
  0x61   : > { %3402 = vmatprep.subr.bf16.mxu1 %v3661_v42  ;;  %v3669_v42 = vld [vmem:[%s4630_s1 + $0x230] sm:$0xff]  }
  0x63   : > { %1850 = vmatmul.mubr.bf16.gmra.mrb[28].mxu1 %v4036_v32 }
  0x64   : > { %1857 = vmatprep.mubr.bf16.mxu1 %v3960_v60  ;;  %3403 = vmatpush3.bf16.msra.mxu1 %v3663_v46  ;;  %v4149_v46 = vpack.c.bf16 %v486_v40, %v485_v39 }
  0x65   : > { %3404 = vmatprep.subr.bf16.mxu1 %v3664_v48  ;;  %v3670_v48 = vld [vmem:[%s4630_s1 + $0x238] sm:$0xff]  }
  0x66   : > { %1729 = vmatmul.mubr.bf16.gmra.mrb[32].mxu0 %v4055_v43 }
  0x67   : > { %1736 = vmatprep.mubr.bf16.mxu0 %v4064_v47 }
  0x68   : > { %3405 = vmatpush3.bf16.msra.mxu1 %v3666_v51  ;;  %v489_v51 = vld [vmem:[#allocation2 + $0x13a] sm:$0xff] }
  0x6b   : > { %1858 = vmatmul.mubr.bf16.gmra.mrb[32].mxu1 %v4057_v45 }
  0x6c   : > { %1865 = vmatprep.mubr.bf16.mxu1 %v3996_v13 }
  0x6e   : > { %1737 = vmatmul.mubr.bf16.gmra.mrb[36].mxu0 %v4078_v58 }
  0x6f   : > { %1744 = vmatprep.mubr.bf16.mxu0 %v4084_v62 }
  0x73   : > { %1866 = vmatmul.mubr.bf16.gmra.mrb[36].mxu1 %v4080_v59 }
  0x74   : > { %1873 = vmatprep.mubr.bf16.mxu1 %v4034_v30 }
  0x76   : > { %1745 = vmatmul.mubr.bf16.gmra.mrb[40].mxu0 %v4090_v9 }
  0x77   : > { %1752 = vmatprep.mubr.bf16.mxu0 %v4096_v2 }
  0x7b   : > { %1874 = vmatmul.mubr.bf16.gmra.mrb[40].mxu1 %v4092_v10 }
  0x7c   : > { %1881 = vmatprep.mubr.bf16.mxu1 %v4055_v43 }
  0x7e   : > { %1753 = vmatmul.mubr.bf16.gmra.mrb[44].mxu0 %v4102_v17 }
  0x7f   : > { %1986 = vmatprep.mubr.bf16.mxu0 %v3962_v61  ;;  %v3662_v61 = vld [vmem:[%s4630_s1 + $0x210] sm:$0xff]  }
  0x83   : > { %1882 = vmatmul.mubr.bf16.gmra.mrb[44].mxu1 %v4104_v20 }
  0x84   : > { %1889 = vmatprep.mubr.bf16.mxu1 %v4078_v58 }
  0x86   : > { %1987 = vmatmul.mubr.bf16.vlgmr.msra.gmra.mrb[48].mxu0 %v3798_v35  ;;  %v3665_v35 = vld [vmem:[%s4630_s1 + $0x218] sm:$0xff]  }
  0x87   : > { %3527 = vmatpush3.bf16.msra.mxu0 %v4028_v28  ;;  %1994 = vmatprep.mubr.bf16.mxu0 %v3998_v14  ;;  %v483_v14 = vld [vmem:[#allocation2 + $0xf2] sm:$0xff]  ;;  %v484_v28 = vld [vmem:[#allocation2 + $0xfa] sm:$0xff] }
  0x88   : > { %3528 = vmatprep.subr.bf16.mxu0 %v3659_v25  ;;  %v4137_v37 = vpack.c.bf16 %v484_v28, %v483_v14 }
  0x8b   : > { %1890 = vmatmul.mubr.bf16.gmra.mrb[48].mxu1 %v4112_v24  ;;  %3529 = vmatpush3.bf16.msra.mxu0 %v3659_v25 }
  0x8c   : > { %1897 = vmatprep.mubr.bf16.mxu1 %v4090_v9  ;;  %3530 = vmatprep.subr.bf16.mxu0 %v3662_v61 }
  0x8e   : > { %1995 = vmatmul.mubr.bf16.gmra.mrb[52].mxu0 %v3828_v56 }
  0x8f   : > { %2002 = vmatprep.mubr.bf16.mxu0 %v4036_v32  ;;  %3531 = vmatpush3.bf16.msra.mxu0 %v3662_v61 }
  0x90   : > { %3532 = vmatprep.subr.bf16.mxu0 %v3665_v35 }
  0x93   : > { %1898 = vmatmul.mubr.bf16.gmra.mrb[52].mxu1 %v4125_v34  ;;  %3533 = vmatpush3.bf16.msra.mxu0 %v3665_v35 }
  0x94   : > { %1905 = vmatprep.mubr.bf16.mxu1 %v4102_v17  ;;  %3534 = vmatprep.subr.bf16.mxu0 %v3667_v36 }
  0x96   : > { %2003 = vmatmul.mubr.bf16.gmra.mrb[56].mxu0 %v3856_v7 }
  0x97   : > { %2010 = vmatprep.mubr.bf16.mxu0 %v4057_v45  ;;  %3535 = vmatpush3.bf16.msra.mxu0 %v3667_v36 }
  0x98   : > { %3536 = vmatprep.subr.bf16.mxu0 %v3668_v38 }
  0x9b   : > { %1906 = vmatmul.mubr.bf16.gmra.mrb[56].mxu1 %v4137_v37  ;;  %3537 = vmatpush3.bf16.msra.mxu0 %v3668_v38 }
  0x9c   : > { %1913 = vmatprep.mubr.bf16.mxu1 %v3787_v31  ;;  %3538 = vmatprep.subr.bf16.mxu0 %v3669_v42  ;;  %v487_v31 = vld [vmem:[#allocation2 + $0x122] sm:$0xff] }
  0x9d   : > { %v4158_v50 = vpack.c.bf16 %v488_v49, %v487_v31 }
  0x9e   : > { %2011 = vmatmul.mubr.bf16.gmra.mrb[60].mxu0 %v3890_v26 }
  0x9f   : > { %2018 = vmatprep.mubr.bf16.mxu0 %v4080_v59  ;;  %3539 = vmatpush3.bf16.msra.mxu0 %v3669_v42 }
  0xa0   : > { %3540 = vmatprep.subr.bf16.mxu0 %v3670_v48 }
  0xa3   : > { %1914 = vmatmul.mubr.bf16.gmra.mrb[60].mxu1 %v4149_v46  ;;  %3541 = vmatpush3.bf16.msra.mxu0 %v3670_v48 }
  0xa4   : > { %1921 = vmatprep.mubr.bf16.mxu1 %v3823_v52  ;;  %v4164_v52 = vpack.c.bf16 %v490_v53, %v489_v51 }
  0xa6   : > { %2019 = vmatmul.mubr.bf16.gmra.mrb[64].mxu0 %v3926_v44 }
  0xa7   : > { %2026 = vmatprep.mubr.bf16.mxu0 %v4092_v10 }
  0xab   : > { %1922 = vmatmul.mubr.bf16.gmra.mrb[64].mxu1 %v4158_v50 }
  0xac   : > { %1929 = vmatprep.mubr.bf16.mxu1 %v3851_v5  ;;  %v4172_v5 = vpack.c.bf16 %v558_v0, %v557_v57 }
  0xae   : > { %2027 = vmatmul.mubr.bf16.gmra.mrb[68].mxu0 %v3970_v63 }
  0xaf   : > { %2034 = vmatprep.mubr.bf16.mxu0 %v4104_v20 }
  0xb3   : > { %1930 = vmatmul.mubr.bf16.gmra.mrb[68].mxu1 %v4164_v52 }
  0xb4   : > { %1937 = vmatprep.mubr.bf16.mxu1 %v3882_v23  ;;  %v494_v23 = vld [vmem:[#allocation2 + $0x172] sm:$0xff] }
  0xb5   : > { %v4178_v6 = vpack.c.bf16 %v494_v23, %v493_v3 }
  0xb6   : > { %2035 = vmatmul.mubr.bf16.gmra.mrb[72].mxu0 %v4005_v16 }
  0xb7   : > { %2042 = vmatprep.mubr.bf16.mxu0 %v4112_v24 }
  0xbb   : > { %1938 = vmatmul.mubr.bf16.gmra.mrb[72].mxu1 %v4170_v1 }
  0xbc   : > { %1945 = vmatprep.mubr.bf16.mxu1 %v4172_v5 }
  0xbe   : > { %2043 = vmatmul.mubr.bf16.gmra.mrb[76].mxu0 %v4040_v33 }
  0xbf   : > { %2050 = vmatprep.mubr.bf16.mxu0 %v4125_v34 }
  0xc3   : > { %1946 = vmatmul.mubr.bf16.gmra.mrb[76].mxu1 %v4178_v6 }
  0xc4   : > { %2147 = vmatprep.mubr.bf16.mxu1 %v3828_v56  ;;  %v613_v56 = vld [vmem:[#allocation2 + $0x121] sm:$0xff] }
  0xc6   : > { %2051 = vmatmul.mubr.bf16.gmra.mrb[80].mxu0 %v4064_v47 }
  0xc7   : > { %2058 = vmatprep.mubr.bf16.mxu0 %v4137_v37 }
  0xcb   : > { %2148 = vmatmul.mubr.bf16.vlgmr.msra.gmra.mrb[80].mxu1 %v3849_v4  ;;  %v614_v4 = vld [vmem:[#allocation2 + $0x129] sm:$0xff] }
  0xcc   : > { %2155 = vmatprep.mubr.bf16.mxu1 %v3856_v7  ;;  %v4196_v8 = vpack.c.bf16 %v614_v4, %v613_v56  ;;  %v615_v7 = vld [vmem:[#allocation2 + $0x139] sm:$0xff] }
  0xce   : > { %2059 = vmatmul.mubr.bf16.gmra.mrb[84].mxu0 %v4084_v62 }
  0xcf   : > { %2066 = vmatprep.mubr.bf16.mxu0 %v4149_v46 }
  0xd3   : > { %2156 = vmatmul.mubr.bf16.gmra.mrb[84].mxu1 %v3880_v22  ;;  %v616_v22 = vld [vmem:[#allocation2 + $0x141] sm:$0xff] }
  0xd4   : > { %2163 = vmatprep.mubr.bf16.mxu1 %v3890_v26  ;;  %v4202_v26 = vpack.c.bf16 %v616_v22, %v615_v7 }
  0xd6   : > { %2067 = vmatmul.mubr.bf16.gmra.mrb[88].mxu0 %v4096_v2 }
  0xd7   : > { %2074 = vmatprep.mubr.bf16.mxu0 %v4158_v50 }
  0xdb   : > { %2164 = vmatmul.mubr.bf16.gmra.mrb[88].mxu1 %v3920_v41  ;;  %v617_v41 = vld [vmem:[#allocation2 + $0x151] sm:$0xff] }
  0xdc   : > { %2171 = vmatprep.mubr.bf16.mxu1 %v3926_v44  ;;  %v618_v44 = vld [vmem:[#allocation2 + $0x159] sm:$0xff] }
  0xdd   : > { %v4208_v11 = vpack.c.bf16 %v618_v44, %v617_v41 }
  0xde   : > { %2075 = vmatmul.mubr.bf16.gmra.mrb[92].mxu0 %v4196_v8 }
  0xdf   : > { %2082 = vmatprep.mubr.bf16.mxu0 %v4164_v52 }
  0xe3   : > { %2172 = vmatmul.mubr.bf16.gmra.mrb[92].mxu1 %v3960_v60  ;;  %v619_v60 = vld [vmem:[#allocation2 + $0x169] sm:$0xff] }
  0xe4   : > { %2179 = vmatprep.mubr.bf16.mxu1 %v3970_v63  ;;  %v620_v63 = vld [vmem:[#allocation2 + $0x171] sm:$0xff] }
  0xe5   : > { %v4214_v15 = vpack.c.bf16 %v620_v63, %v619_v60 }
  0xe6   : > { %2083 = vmatmul.mubr.bf16.gmra.mrb[96].mxu0 %v4202_v26 }
  0xe7   : > { %2090 = vmatprep.mubr.bf16.mxu0 %v4170_v1 }
  0xeb   : > { %2180 = vmatmul.mubr.bf16.gmra.mrb[96].mxu1 %v3996_v13  ;;  %v686_v13 = vld [vmem:[#allocation2 + $0x18a] sm:$0xff] }
  0xec   : > { %2187 = vmatprep.mubr.bf16.mxu1 %v4005_v16  ;;  %v4216_v18 = vpack.c.bf16 %v686_v13, %v685_v12  ;;  %v848_v16 = vld [vmem:[#allocation2 + $0x32] sm:$0xff] }
  0xee   : > { %2091 = vmatmul.mubr.bf16.gmra.mrb[100].mxu0 %v4208_v11 }
  0xef   : > { %2098 = vmatprep.mubr.bf16.mxu0 %v4178_v6 }
  0xf3   : > { %2188 = vmatmul.mubr.bf16.gmra.mrb[100].mxu1 %v4034_v30  ;;  %v849_v30 = vld [vmem:[#allocation2 + $0x3a] sm:$0xff] }
  0xf4   : > { %2195 = vmatprep.mubr.bf16.mxu1 %v4040_v33  ;;  %v880_v28 = vpack.c.bf16 %v849_v30, %v848_v16 }
  0xf6   : > { %2099 = vmatmul.mubr.bf16.gmra.mrb[104].mxu0 %v4214_v15 }
  0xf7   : > { %2106 = vmatprep.mubr.bf16.mxu0 %v4216_v18 }
  0xf9   : > { %v3070_v19 = vpop.f32.mrb[0].mxu0 }
  0xfa   : > { %v3071_v25 = vpop.f32.mrb[1].mxu0 }
  0xfb   : > { %2196 = vmatmul.mubr.bf16.gmra.mrb[104].mxu1 %v4055_v43  ;;  %v4222_v29 = vadd.f32 %v3071_v25, %v3070_v19  ;;  %v3073_v35 = vpop.f32.mrb[2].mxu0 }
  0xfc   : > { %2203 = vmatprep.mubr.bf16.mxu1 %v4064_v47  ;;  %v3074_v36 = vpop.f32.mrb[3].mxu0 }
  0xfd   : > { %v4226_v43 = vadd.f32 %v3074_v36, %v3073_v35  ;;  %v743_v35 = vld [vmem:[#allocation2 + $0x140] sm:$0xff] }
  0xfe   : > { %v3142_v33 = vpop.f32.mrb[0].mxu1  ;;  %2107 = vmatmul.mubr.bf16.gmra.mrb[108].mxu0 %v4106_v21 }
  0xff   : > { %v3143_v27 = vpop.f32.mrb[1].mxu1  ;;  %3542 = vmatprep.mubr.bf16.mxu0 %v880_v28 }
 0x100   : > { %v4224_v61 = vadd.f32 %v3143_v27, %v3142_v33  ;;  %v3145_v14 = vpop.f32.mrb[2].mxu1 }
 0x101   : > { %v3146_v38 = vpop.f32.mrb[3].mxu1  ;;  %v3076_v47 = vpop.f32.mrb[4].mxu0 }
 0x102   : > { %v4228_v39 = vadd.f32 %v3146_v38, %v3145_v14  ;;  %v3077_v42 = vpop.f32.mrb[5].mxu0 }
 0x103   : > { %2204 = vmatmul.mubr.bf16.gmra.mrb[108].mxu1 %v4078_v58  ;;  %v4233_v31 = vadd.f32 %v3077_v42, %v3076_v47  ;;  %v3079_v51 = vpop.f32.mrb[6].mxu0 }
 0x104   : > { %2211 = vmatprep.mubr.bf16.mxu1 %v4084_v62  ;;  %v3080_v54 = vpop.f32.mrb[7].mxu0 }
 0x105   : > { %v4237_v57 = vadd.f32 %v3080_v54, %v3079_v51 }
 0x106   : > { %v3148_v40 = vpop.f32.mrb[4].mxu1  ;;  %3543 = vmatmul.mubr.bf16.vlgmr.msra.gmra.mrb[112].mxu0 %v4036_v32  ;;  %v740_v32 = vld [vmem:[#allocation2 + $0x120] sm:$0xff] }
 0x107   : > { %v3149_v48 = vpop.f32.mrb[5].mxu1  ;;  %3546 = vmatprep.mubr.bf16.mxu0 %v4057_v45  ;;  %v741_v45 = vld [vmem:[#allocation2 + $0x128] sm:$0xff] }
 0x108   : > { %v4235_v49 = vadd.f32 %v3149_v48, %v3148_v40  ;;  %v3151_v53 = vpop.f32.mrb[6].mxu1  ;;  %v762_v16 = vpack.c.bf16 %v741_v45, %v740_v32 }
 0x109   : > { %v3152_v55 = vpop.f32.mrb[7].mxu1  ;;  %v3082_v58 = vpop.f32.mrb[8].mxu0 }
 0x10a   : > { %v4239_v0 = vadd.f32 %v3152_v55, %v3151_v53  ;;  %v3083_v3 = vpop.f32.mrb[9].mxu0 }
 0x10b   : > { %2212 = vmatmul.mubr.bf16.gmra.mrb[112].mxu1 %v4090_v9  ;;  %v4245_v56 = vadd.f32 %v3083_v3, %v3082_v58  ;;  %v3085_v7 = vpop.f32.mrb[10].mxu0  ;;  %v744_v58 = vld [vmem:[#allocation2 + $0x150] sm:$0xff] }
 0x10c   : > { %2219 = vmatprep.mubr.bf16.mxu1 %v4096_v2  ;;  %v3086_v41 = vpop.f32.mrb[11].mxu0 }
 0x10d   : > { %v4249_v60 = vadd.f32 %v3086_v41, %v3085_v7 }
 0x10e   : > { %v3154_v62 = vpop.f32.mrb[8].mxu1  ;;  %3547 = vmatmul.mubr.bf16.gmra.mrb[116].mxu0 %v4080_v59 }
 0x10f   : > { %v3155_v23 = vpop.f32.mrb[9].mxu1  ;;  %3550 = vmatprep.mubr.bf16.mxu0 %v4092_v10  ;;  %v742_v10 = vld [vmem:[#allocation2 + $0x138] sm:$0xff] }
 0x110   : > { %v4247_v4 = vadd.f32 %v3155_v23, %v3154_v62  ;;  %v3157_v22 = vpop.f32.mrb[10].mxu1  ;;  %v763_v47 = vpack.c.bf16 %v743_v35, %v742_v10  ;;  %v745_v62 = vld [vmem:[#allocation2 + $0x158] sm:$0xff] }
 0x111   : > { %v3158_v44 = vpop.f32.mrb[11].mxu1  ;;  %v3088_v2 = vpop.f32.mrb[12].mxu0 }
 0x112   : > { %v4251_v9 = vadd.f32 %v3158_v44, %v3157_v22  ;;  %v3089_v12 = vpop.f32.mrb[13].mxu0  ;;  %v764_v22 = vpack.c.bf16 %v745_v62, %v744_v58 }
 0x113   : > { %2220 = vmatmul.mubr.bf16.gmra.mrb[116].mxu1 %v4102_v17  ;;  %v4257_v30 = vadd.f32 %v3089_v12, %v3088_v2  ;;  %v3091_v33 = vpop.f32.mrb[14].mxu0  ;;  %v746_v12 = vld [vmem:[#allocation2 + $0x168] sm:$0xff] }
 0x114   : > { %2227 = vmatprep.mubr.bf16.mxu1 %v4196_v8  ;;  %v3092_v17 = vpop.f32.mrb[15].mxu0 }
 0x115   : > { %v4261_v59 = vadd.f32 %v3092_v17, %v3091_v33 }
 0x116   : > { %v3160_v63 = vpop.f32.mrb[12].mxu1  ;;  %3551 = vmatmul.mubr.bf16.gmra.mrb[120].mxu0 %v4104_v20 }
 0x117   : > { %v3161_v13 = vpop.f32.mrb[13].mxu1  ;;  %3554 = vmatprep.mubr.bf16.mxu0 %v4112_v24 }
 0x118   : > { %v4259_v19 = vadd.f32 %v3161_v13, %v3160_v63  ;;  %v3163_v25 = vpop.f32.mrb[14].mxu1  ;;  %v747_v13 = vld [vmem:[#allocation2 + $0x170] sm:$0xff] }
 0x119   : > { %v3164_v27 = vpop.f32.mrb[15].mxu1  ;;  %v3094_v14 = vpop.f32.mrb[16].mxu0  ;;  %v765_v17 = vpack.c.bf16 %v747_v13, %v746_v12 }
 0x11a   : > { %v4263_v8 = vadd.f32 %v3164_v27, %v3163_v25  ;;  %v3095_v36 = vpop.f32.mrb[17].mxu0 }
 0x11b   : > { %2228 = vmatmul.mubr.bf16.gmra.mrb[120].mxu1 %v762_v16  ;;  %v4268_v40 = vadd.f32 %v3095_v36, %v3094_v14  ;;  %v3097_v48 = vpop.f32.mrb[18].mxu0 }
 0x11c   : > { %2235 = vmatprep.mubr.bf16.mxu1 %v4202_v26  ;;  %v3098_v53 = vpop.f32.mrb[19].mxu0 }
 0x11d   : > { %v4273_v26 = vadd.f32 %v3098_v53, %v3097_v48 }
 0x11e   : > { %v3182_v28 = vpop.f32.mrb[16].mxu1  ;;  %3555 = vmatmul.mubr.bf16.gmra.mrb[124].mxu0 %v4125_v34 }
 0x11f   : > { %v3183_v38 = vpop.f32.mrb[17].mxu1  ;;  %3558 = vmatprep.mubr.bf16.mxu0 %v4137_v37 }
 0x120   : > { %v3184_v42 = vadd.f32 %v3183_v38, %v3182_v28  ;;  %v3185_v51 = vpop.f32.mrb[18].mxu1  ;;  %v814_v38 = vld [vmem:[#allocation2 + $0x199] sm:$0xff] }
 0x121   : > { %v3186_v54 = vpop.f32.mrb[19].mxu1  ;;  %v3100_v3 = vpop.f32.mrb[20].mxu0 }
 0x122   : > { %v4271_v20 = vadd.f32 %v3184_v42, %v4222_v29  ;;  %v3187_v24 = vadd.f32 %v3186_v54, %v3185_v51  ;;  %v3101_v7 = vpop.f32.mrb[21].mxu0 }
 0x123   : > { %2236 = vmatmul.mubr.bf16.gmra.mrb[124].mxu1 %v763_v47  ;;  %v4281_v41 = vadd.f32 %v3101_v7, %v3100_v3  ;;  %v3103_v32 = vpop.f32.mrb[22].mxu0  ;;  %v815_v47 = vld [vmem:[#allocation2 + $0x1a1] sm:$0xff] }
 0x124   : > { %v4277_v55 = vadd.f32 %v3187_v24, %v4226_v43  ;;  %2243 = vmatprep.mubr.bf16.mxu1 %v4208_v11  ;;  %v3104_v34 = vpop.f32.mrb[23].mxu0  ;;  %v831_v62 = vpack.c.bf16 %v815_v47, %v814_v38  ;;  %v878_v7 = vld [vmem:[#allocation2 + $0x19a] sm:$0xff] }
 0x125   : > { %v4286_v11 = vadd.f32 %v3104_v34, %v3103_v32 }
 0x126   : > { %v3188_v23 = vpop.f32.mrb[20].mxu1  ;;  %3559 = vmatmul.mubr.bf16.gmra.mrb[128].mxu0 %v4149_v46 }
 0x127   : > { %v3189_v29 = vpop.f32.mrb[21].mxu1  ;;  %3562 = vmatprep.mubr.bf16.mxu0 %v4158_v50 }
 0x128   : > { %v3190_v44 = vadd.f32 %v3189_v29, %v3188_v23  ;;  %v3191_v45 = vpop.f32.mrb[22].mxu1  ;;  %v879_v29 = vld [vmem:[#allocation2 + $0x1a2] sm:$0xff] }
 0x129   : > { %v3192_v2 = vpop.f32.mrb[23].mxu1  ;;  %v3106_v16 = vpop.f32.mrb[24].mxu0 }
 0x12a   : > { %v4284_v43 = vadd.f32 %v3190_v44, %v4233_v31  ;;  %v3193_v37 = vadd.f32 %v3192_v2, %v3191_v45  ;;  %v3107_v25 = vpop.f32.mrb[25].mxu0  ;;  %v3671_v45 = vld [vmem:[#allocation2] sm:$0xff]  ;;  %v895_v2 = vpack.c.bf16 %v879_v29, %v878_v7 }
 0x12b   : > { %2244 = vmatmul.mubr.bf16.gmra.mrb[128].mxu1 %v764_v22  ;;  %v4294_v27 = vadd.f32 %v3107_v25, %v3106_v16  ;;  %v3109_v35 = vpop.f32.mrb[26].mxu0  ;;  %v767_v34 = vpack.c.bf16 %v3671_v45, %v3671_v45 }
 0x12c   : > { %v4290_v63 = vadd.f32 %v3193_v37, %v4237_v57  ;;  %2251 = vmatprep.mubr.bf16.mxu1 %v4214_v15  ;;  %v3110_v46 = vpop.f32.mrb[27].mxu0 }
 0x12d   : > { %v4299_v15 = vadd.f32 %v3110_v46, %v3109_v35 }
 0x12e   : > { %v3194_v33 = vpop.f32.mrb[24].mxu1  ;;  %3563 = vmatmul.mubr.bf16.gmra.mrb[132].mxu0 %v4164_v52 }
 0x12f   : > { %v3195_v31 = vpop.f32.mrb[25].mxu1  ;;  %3566 = vmatprep.mubr.bf16.mxu0 %v4170_v1 }
 0x130   : > { %v3196_v10 = vadd.f32 %v3195_v31, %v3194_v33  ;;  %v3197_v14 = vpop.f32.mrb[26].mxu1 }
 0x131   : > { %v3198_v28 = vpop.f32.mrb[27].mxu1  ;;  %v3112_v42 = vpop.f32.mrb[28].mxu0 }
 0x132   : > { %v4297_v57 = vadd.f32 %v3196_v10, %v4245_v56  ;;  %v3199_v50 = vadd.f32 %v3198_v28, %v3197_v14  ;;  %v3113_v51 = vpop.f32.mrb[29].mxu0 }
 0x133   : > { %2252 = vmatmul.mubr.bf16.gmra.mrb[132].mxu1 %v765_v17  ;;  %v4307_v53 = vadd.f32 %v3113_v51, %v3112_v42  ;;  %v3115_v24 = vpop.f32.mrb[30].mxu0 }
 0x134   : > { %v4303_v36 = vadd.f32 %v3199_v50, %v4249_v60  ;;  %2259 = vmatprep.mubr.bf16.mxu1 %v4106_v21  ;;  %v3116_v52 = vpop.f32.mrb[31].mxu0 }
 0x135   : > { %v4312_v21 = vadd.f32 %v3116_v52, %v3115_v24 }
 0x136   : > { %v3200_v48 = vpop.f32.mrb[28].mxu1  ;;  %3567 = vmatmul.mubr.bf16.gmra.mrb[136].mxu0 %v4178_v6 }
 0x137   : > { %v3201_v56 = vpop.f32.mrb[29].mxu1  ;;  %3570 = vmatprep.mubr.bf16.mxu0 %v4216_v18 }
 0x138   : > { %v3202_v54 = vadd.f32 %v3201_v56, %v3200_v48  ;;  %v3203_v58 = vpop.f32.mrb[30].mxu1 }
 0x139   : > { %v3204_v3 = vpop.f32.mrb[31].mxu1  ;;  %v3118_v22 = vpop.f32.mrb[32].mxu0 }
 0x13a   : > { %v4310_v60 = vadd.f32 %v3202_v54, %v4257_v30  ;;  %v3205_v1 = vadd.f32 %v3204_v3, %v3203_v58  ;;  %v3119_v32 = vpop.f32.mrb[33].mxu0 }
 0x13b   : > { %2260 = vmatmul.mubr.bf16.gmra.mrb[136].mxu1 %v4172_v5  ;;  %v4320_v37 = vadd.f32 %v3119_v32, %v3118_v22  ;;  %v3121_v12 = vpop.f32.mrb[34].mxu0 }
 0x13c   : > { %v4317_v23 = vadd.f32 %v3205_v1, %v4261_v59  ;;  %2267 = vmatprep.mubr.bf16.mxu1 %v831_v62  ;;  %v3122_v13 = vpop.f32.mrb[35].mxu0 }
 0x13d   : > { %v3123_v18 = vadd.f32 %v3122_v13, %v3121_v12 }
 0x13e   : > { %v3206_v44 = vpop.f32.mrb[32].mxu1  ;;  %3571 = vmatmul.mubr.bf16.gmra.mrb[140].mxu0 %v895_v2 }
 0x13f   : > { %v3207_v30 = vpop.f32.mrb[33].mxu1 }
 0x140   : > { %v3208_v5 = vadd.f32 %v3207_v30, %v3206_v44  ;;  %v3209_v6 = vpop.f32.mrb[34].mxu1 }
 0x141   : > { %v3210_v59 = vpop.f32.mrb[35].mxu1  ;;  %v3124_v31 = vpop.f32.mrb[36].mxu0 }
 0x142   : > { %v4323_v16 = vadd.f32 %v3208_v5, %v4268_v40  ;;  %v3211_v33 = vadd.f32 %v3210_v59, %v3209_v6  ;;  %v3125_v10 = vpop.f32.mrb[37].mxu0 }
 0x143   : > { %2268 = vmatmul.mubr.bf16.gmra.mrb[140].mxu1 %v767_v34  ;;  %v4328_v14 = vadd.f32 %v3125_v10, %v3124_v31  ;;  %v3127_v28 = vpop.f32.mrb[38].mxu0 }
 0x144   : > { %v4326_v25 = vadd.f32 %v3211_v33, %v4273_v26  ;;  %v3128_v38 = vpop.f32.mrb[39].mxu0 }
 0x145   : > { %v3129_v42 = vadd.f32 %v3128_v38, %v3127_v28 }
 0x146   : > { %v3212_v17 = vpop.f32.mrb[36].mxu1 }
 0x147   : > { %v3213_v35 = vpop.f32.mrb[37].mxu1 }
 0x148   : > { %v3214_v46 = vadd.f32 %v3213_v35, %v3212_v17  ;;  %v3215_v50 = vpop.f32.mrb[38].mxu1 }
 0x149   : > { %v3216_v47 = vpop.f32.mrb[39].mxu1  ;;  %v3130_v26 = vpop.f32.mrb[40].mxu0 }
 0x14a   : > { %v4331_v40 = vadd.f32 %v3214_v46, %v4281_v41  ;;  %v3217_v48 = vadd.f32 %v3216_v47, %v3215_v50  ;;  %v3131_v54 = vpop.f32.mrb[41].mxu0 }
 0x14b   : > { %v4336_v58 = vadd.f32 %v3131_v54, %v3130_v26  ;;  %v3133_v52 = vpop.f32.mrb[42].mxu0 }
 0x14c   : > { %v4334_v51 = vadd.f32 %v3217_v48, %v4286_v11  ;;  %v3134_v1 = vpop.f32.mrb[43].mxu0 }
 0x14d   : > { %v4341_v41 = vadd.f32 %v3134_v1, %v3133_v52 }
 0x14e   : > { %v3218_v56 = vpop.f32.mrb[40].mxu1 }
 0x14f   : > { %v3219_v24 = vpop.f32.mrb[41].mxu1 }
 0x150   : > { %v3220_v62 = vadd.f32 %v3219_v24, %v3218_v56  ;;  %v3221_v3 = vpop.f32.mrb[42].mxu1 }
 0x151   : > { %v3222_v7 = vpop.f32.mrb[43].mxu1  ;;  %v3136_v44 = vpop.f32.mrb[44].mxu0 }
 0x152   : > { %v4339_v29 = vadd.f32 %v3220_v62, %v4294_v27  ;;  %v3223_v22 = vadd.f32 %v3222_v7, %v3221_v3  ;;  %v3137_v30 = vpop.f32.mrb[45].mxu0 }
 0x153   : > { %v4346_v34 = vadd.f32 %v3137_v30, %v3136_v44  ;;  %v3139_v5 = vpop.f32.mrb[46].mxu0 }
 0x154   : > { %v4344_v11 = vadd.f32 %v3223_v22, %v4299_v15  ;;  %v3140_v6 = vpop.f32.mrb[47].mxu0 }
 0x155   : > { %v4351_v59 = vadd.f32 %v3140_v6, %v3139_v5 }
 0x156   : > { %v3224_v32 = vpop.f32.mrb[44].mxu1 }
 0x157   : > { %v3225_v45 = vpop.f32.mrb[45].mxu1 }
 0x158   : > { %v3226_v2 = vadd.f32 %v3225_v45, %v3224_v32  ;;  %v3227_v12 = vpop.f32.mrb[46].mxu1 }
 0x159   : > { %v3228_v13 = vpop.f32.mrb[47].mxu1  ;;  %v3294_v17 = vpop.f32.mrb[48].mxu0 }
 0x15a   : > { %v4349_v27 = vadd.f32 %v3226_v2, %v4307_v53  ;;  %v3229_v33 = vadd.f32 %v3228_v13, %v3227_v12  ;;  %v3295_v35 = vpop.f32.mrb[49].mxu0 }
 0x15b   : > { %v3296_v28 = vadd.f32 %v3295_v35, %v3294_v17  ;;  %v3297_v38 = vpop.f32.mrb[50].mxu0 }
 0x15c   : > { %v4354_v15 = vadd.f32 %v3229_v33, %v4312_v21  ;;  %v3298_v48 = vpop.f32.mrb[51].mxu0 }
 0x15d   : > { %v4360_v53 = vadd.f32 %v3296_v28, %v4271_v20  ;;  %v3299_v54 = vadd.f32 %v3298_v48, %v3297_v38 }
 0x15e   : > { %v3230_v31 = vpop.f32.mrb[48].mxu1 }
 0x15f   : > { %v3231_v10 = vpop.f32.mrb[49].mxu1  ;;  %v4365_v24 = vadd.f32 %v3299_v54, %v4277_v55 }
 0x160   : > { %v3232_v46 = vadd.f32 %v3231_v10, %v3230_v31  ;;  %v3233_v50 = vpop.f32.mrb[50].mxu1 }
 0x161   : > { %v3234_v47 = vpop.f32.mrb[51].mxu1  ;;  %v3300_v52 = vpop.f32.mrb[52].mxu0 }
 0x162   : > { %v4357_v26 = vadd.f32 %v3232_v46, %v4320_v37  ;;  %v3235_v56 = vadd.f32 %v3234_v47, %v3233_v50  ;;  %v3301_v1 = vpop.f32.mrb[53].mxu0 }
 0x163   : > { %v3302_v22 = vadd.f32 %v3301_v1, %v3300_v52  ;;  %v3303_v32 = vpop.f32.mrb[54].mxu0 }
 0x164   : > { %v4362_v21 = vadd.f32 %v3235_v56, %v3123_v18  ;;  %v3304_v30 = vpop.f32.mrb[55].mxu0 }
 0x165   : > { %v4371_v45 = vadd.f32 %v3302_v22, %v4284_v43  ;;  %v3305_v2 = vadd.f32 %v3304_v30, %v3303_v32 }
 0x166   : > { %v3236_v62 = vpop.f32.mrb[52].mxu1 }
 0x167   : > { %v3237_v3 = vpop.f32.mrb[53].mxu1  ;;  %v4376_v5 = vadd.f32 %v3305_v2, %v4290_v63 }
 0x168   : > { %v3238_v7 = vadd.f32 %v3237_v3, %v3236_v62  ;;  %v3239_v44 = vpop.f32.mrb[54].mxu1 }
 0x169   : > { %v3240_v37 = vpop.f32.mrb[55].mxu1  ;;  %v3306_v6 = vpop.f32.mrb[56].mxu0 }
 0x16a   : > { %v4368_v20 = vadd.f32 %v3238_v7, %v4328_v14  ;;  %v3241_v18 = vadd.f32 %v3240_v37, %v3239_v44  ;;  %v3307_v33 = vpop.f32.mrb[57].mxu0 }
 0x16b   : > { %v3308_v17 = vadd.f32 %v3307_v33, %v3306_v6  ;;  %v3309_v35 = vpop.f32.mrb[58].mxu0 }
 0x16c   : > { %v4373_v55 = vadd.f32 %v3241_v18, %v3129_v42  ;;  %v3310_v46 = vpop.f32.mrb[59].mxu0 }
 0x16d   : > { %v4382_v28 = vadd.f32 %v3308_v17, %v4297_v57  ;;  %v3311_v50 = vadd.f32 %v3310_v46, %v3309_v35 }
 0x16e   : > { %v3242_v12 = vpop.f32.mrb[56].mxu1 }
 0x16f   : > { %v3243_v13 = vpop.f32.mrb[57].mxu1  ;;  %v4388_v38 = vadd.f32 %v3311_v50, %v4303_v36 }
 0x170   : > { %v3244_v31 = vadd.f32 %v3243_v13, %v3242_v12  ;;  %v3245_v10 = vpop.f32.mrb[58].mxu1 }
 0x171   : > { %v3246_v14 = vpop.f32.mrb[59].mxu1  ;;  %v3312_v48 = vpop.f32.mrb[60].mxu0 }
 0x172   : > { %v4379_v43 = vadd.f32 %v3244_v31, %v4336_v58  ;;  %v3247_v42 = vadd.f32 %v3246_v14, %v3245_v10  ;;  %v3313_v54 = vpop.f32.mrb[61].mxu0 }
 0x173   : > { %v3314_v52 = vadd.f32 %v3313_v54, %v3312_v48  ;;  %v3315_v58 = vpop.f32.mrb[62].mxu0 }
 0x174   : > { %v4385_v63 = vadd.f32 %v3247_v42, %v4341_v41  ;;  %v3316_v7 = vpop.f32.mrb[63].mxu0 }
 0x175   : > { %v4394_v22 = vadd.f32 %v3314_v52, %v4310_v60  ;;  %v3317_v44 = vadd.f32 %v3316_v7, %v3315_v58 }
 0x176   : > { %v3248_v47 = vpop.f32.mrb[60].mxu1 }
 0x177   : > { %v3249_v56 = vpop.f32.mrb[61].mxu1  ;;  %v4400_v32 = vadd.f32 %v3317_v44, %v4317_v23 }
 0x178   : > { %v3250_v62 = vadd.f32 %v3249_v56, %v3248_v47  ;;  %v3251_v3 = vpop.f32.mrb[62].mxu1 }
 0x179   : > { %v3252_v1 = vpop.f32.mrb[63].mxu1  ;;  %v3318_v30 = vpop.f32.mrb[64].mxu0 }
 0x17a   : > { %v4391_v57 = vadd.f32 %v3250_v62, %v4346_v34  ;;  %v3253_v41 = vadd.f32 %v3252_v1, %v3251_v3  ;;  %v3319_v2 = vpop.f32.mrb[65].mxu0 }
 0x17b   : > { %v3320_v6 = vadd.f32 %v3319_v2, %v3318_v30  ;;  %v3321_v34 = vpop.f32.mrb[66].mxu0 }
 0x17c   : > { %v4397_v36 = vadd.f32 %v3253_v41, %v4351_v59  ;;  %v3322_v31 = vpop.f32.mrb[67].mxu0 }
 0x17d   : > { %v4406_v17 = vadd.f32 %v3320_v6, %v4323_v16  ;;  %v3323_v10 = vadd.f32 %v3322_v31, %v3321_v34 }
 0x17e   : > { %v3254_v37 = vpop.f32.mrb[64].mxu1 }
 0x17f   : > { %v3255_v18 = vpop.f32.mrb[65].mxu1  ;;  %v4412_v35 = vadd.f32 %v3323_v10, %v4326_v25 }
 0x180   : > { %v3256_v12 = vadd.f32 %v3255_v18, %v3254_v37  ;;  %v3257_v13 = vpop.f32.mrb[66].mxu1 }
 0x181   : > { %v3258_v33 = vpop.f32.mrb[67].mxu1  ;;  %v3324_v46 = vpop.f32.mrb[68].mxu0 }
 0x182   : > { %v4403_v60 = vadd.f32 %v3256_v12, %v4224_v61  ;;  %v3259_v59 = vadd.f32 %v3258_v33, %v3257_v13  ;;  %v3325_v50 = vpop.f32.mrb[69].mxu0 }
 0x183   : > { %v3326_v48 = vadd.f32 %v3325_v50, %v3324_v46  ;;  %v3327_v61 = vpop.f32.mrb[70].mxu0 }
 0x184   : > { %v4409_v23 = vadd.f32 %v3259_v59, %v4228_v39  ;;  %v3328_v62 = vpop.f32.mrb[71].mxu0 }
 0x185   : > { %v4418_v52 = vadd.f32 %v3326_v48, %v4331_v40  ;;  %v3329_v3 = vadd.f32 %v3328_v62, %v3327_v61 }
 0x186   : > { %v3260_v14 = vpop.f32.mrb[68].mxu1 }
 0x187   : > { %v3261_v42 = vpop.f32.mrb[69].mxu1  ;;  %v4424_v58 = vadd.f32 %v3329_v3, %v4334_v51 }
 0x188   : > { %v3262_v47 = vadd.f32 %v3261_v42, %v3260_v14  ;;  %v3263_v56 = vpop.f32.mrb[70].mxu1 }
 0x189   : > { %v3264_v54 = vpop.f32.mrb[71].mxu1  ;;  %v3330_v7 = vpop.f32.mrb[72].mxu0 }
 0x18a   : > { %v4415_v16 = vadd.f32 %v3262_v47, %v4235_v49  ;;  %v3265_v39 = vadd.f32 %v3264_v54, %v3263_v56  ;;  %v3331_v44 = vpop.f32.mrb[73].mxu0 }
 0x18b   : > { %v3332_v30 = vadd.f32 %v3331_v44, %v3330_v7  ;;  %v3333_v49 = vpop.f32.mrb[74].mxu0 }
 0x18c   : > { %v4421_v25 = vadd.f32 %v3265_v39, %v4239_v0  ;;  %v3334_v12 = vpop.f32.mrb[75].mxu0 }
 0x18d   : > { %v4430_v6 = vadd.f32 %v3332_v30, %v4339_v29  ;;  %v3335_v13 = vadd.f32 %v3334_v12, %v3333_v49 }
 0x18e   : > { %v3266_v1 = vpop.f32.mrb[72].mxu1 }
 0x18f   : > { %v3267_v41 = vpop.f32.mrb[73].mxu1  ;;  %v4436_v34 = vadd.f32 %v3335_v13, %v4344_v11 }
 0x190   : > { %v3268_v37 = vadd.f32 %v3267_v41, %v3266_v1  ;;  %v3269_v18 = vpop.f32.mrb[74].mxu1 }
 0x191   : > { %v3270_v2 = vpop.f32.mrb[75].mxu1  ;;  %v3336_v31 = vpop.f32.mrb[76].mxu0 }
 0x192   : > { %v4427_v40 = vadd.f32 %v3268_v37, %v4247_v4  ;;  %v3271_v0 = vadd.f32 %v3270_v2, %v3269_v18  ;;  %v3337_v10 = vpop.f32.mrb[77].mxu0 }
 0x193   : > { %v3338_v46 = vadd.f32 %v3337_v10, %v3336_v31  ;;  %v3339_v4 = vpop.f32.mrb[78].mxu0 }
 0x194   : > { %v4433_v51 = vadd.f32 %v3271_v0, %v4251_v9  ;;  %v3340_v47 = vpop.f32.mrb[79].mxu0 }
 0x195   : > { %v4442_v48 = vadd.f32 %v3338_v46, %v4349_v27  ;;  %v3341_v56 = vadd.f32 %v3340_v47, %v3339_v4 }
 0x196   : > { %v3272_v33 = vpop.f32.mrb[76].mxu1 }
 0x197   : > { %v3273_v59 = vpop.f32.mrb[77].mxu1  ;;  %v4448_v61 = vadd.f32 %v3341_v56, %v4354_v15 }
 0x198   : > { %v3274_v14 = vadd.f32 %v3273_v59, %v3272_v33  ;;  %v3275_v42 = vpop.f32.mrb[78].mxu1 }
 0x199   : > { %v3276_v50 = vpop.f32.mrb[79].mxu1  ;;  %v3342_v54 = vpop.f32.mrb[80].mxu0 }
 0x19a   : > { %v4439_v29 = vadd.f32 %v3274_v14, %v4259_v19  ;;  %v3277_v9 = vadd.f32 %v3276_v50, %v3275_v42  ;;  %v3343_v39 = vpop.f32.mrb[81].mxu0 }
 0x19b   : > { %v3344_v1 = vadd.f32 %v3343_v39, %v3342_v54  ;;  %v3345_v41 = vpop.f32.mrb[82].mxu0 }
 0x19c   : > { %v4445_v11 = vadd.f32 %v3277_v9, %v4263_v8  ;;  %v3346_v44 = vpop.f32.mrb[83].mxu0 }
 0x19d   : > { %v4451_v27 = vadd.f32 %v3344_v1, %v4357_v26  ;;  %v3347_v30 = vadd.f32 %v3346_v44, %v3345_v41 }
 0x19e   : > { %v3406_v62 = vpop.f32.mrb[80].mxu1 }
 0x19f   : > { %v3407_v3 = vpop.f32.mrb[81].mxu1  ;;  %v4457_v15 = vadd.f32 %v3347_v30, %v4362_v21 }
 0x1a0   : > { %v3408_v7 = vadd.f32 %v3407_v3, %v3406_v62  ;;  %v3409_v19 = vpop.f32.mrb[82].mxu1 }
 0x1a1   : > { %v3410_v37 = vpop.f32.mrb[83].mxu1  ;;  %v3348_v2 = vpop.f32.mrb[84].mxu0 }
 0x1a2   : > { %v3411_v18 = vadd.f32 %v3410_v37, %v3409_v19  ;;  %v4454_v8 = vadd.f32 %v3408_v7, %v4360_v53  ;;  %v3349_v0 = vpop.f32.mrb[85].mxu0 }
 0x1a3   : > { %v3350_v33 = vadd.f32 %v3349_v0, %v3348_v2  ;;  %v3351_v59 = vpop.f32.mrb[86].mxu0 }
 0x1a4   : > { %v4460_v49 = vadd.f32 %v3411_v18, %v4365_v24  ;;  %v3352_v10 = vpop.f32.mrb[87].mxu0 }
 0x1a5   : > { %v4463_v46 = vadd.f32 %v3350_v33, %v4368_v20  ;;  %v3353_v53 = vadd.f32 %v3352_v10, %v3351_v59 }
 0x1a6   : > { %v3412_v12 = vpop.f32.mrb[84].mxu1 }
 0x1a7   : > { %v3413_v13 = vpop.f32.mrb[85].mxu1  ;;  %v4469_v24 = vadd.f32 %v3353_v53, %v4373_v55 }
 0x1a8   : > { %v3414_v31 = vadd.f32 %v3413_v13, %v3412_v12  ;;  %v3415_v26 = vpop.f32.mrb[86].mxu1 }
 0x1a9   : > { %v3416_v14 = vpop.f32.mrb[87].mxu1  ;;  %v3354_v50 = vpop.f32.mrb[88].mxu0 }
 0x1aa   : > { %v3417_v42 = vadd.f32 %v3416_v14, %v3415_v26  ;;  %v4466_v21 = vadd.f32 %v3414_v31, %v4371_v45  ;;  %v3355_v9 = vpop.f32.mrb[89].mxu0 }
 0x1ab   : > { %v3356_v54 = vadd.f32 %v3355_v9, %v3354_v50  ;;  %v3357_v39 = vpop.f32.mrb[90].mxu0 }
 0x1ac   : > { %v4472_v4 = vadd.f32 %v3417_v42, %v4376_v5  ;;  %v3358_v3 = vpop.f32.mrb[91].mxu0 }
 0x1ad   : > { %v4475_v7 = vadd.f32 %v3356_v54, %v4379_v43  ;;  %v3359_v45 = vadd.f32 %v3358_v3, %v3357_v39 }
 0x1ae   : > { %v3418_v47 = vpop.f32.mrb[88].mxu1 }
 0x1af   : > { %v3419_v56 = vpop.f32.mrb[89].mxu1  ;;  %v4481_v5 = vadd.f32 %v3359_v45, %v4385_v63 }
 0x1b0   : > { %v3420_v62 = vadd.f32 %v3419_v56, %v3418_v47  ;;  %v3421_v20 = vpop.f32.mrb[90].mxu1 }
 0x1b1   : > { %v3422_v1 = vpop.f32.mrb[91].mxu1  ;;  %v3360_v44 = vpop.f32.mrb[92].mxu0 }
 0x1b2   : > { %v3423_v41 = vadd.f32 %v3422_v1, %v3421_v20  ;;  %v4478_v55 = vadd.f32 %v3420_v62, %v4382_v28  ;;  %v3361_v30 = vpop.f32.mrb[93].mxu0 }
 0x1b3   : > { %v3362_v2 = vadd.f32 %v3361_v30, %v3360_v44  ;;  %v3363_v0 = vpop.f32.mrb[94].mxu0 }
 0x1b4   : > { %v4484_v19 = vadd.f32 %v3423_v41, %v4388_v38  ;;  %v3364_v13 = vpop.f32.mrb[95].mxu0 }
 0x1b5   : > { %v4487_v31 = vadd.f32 %v3362_v2, %v4391_v57  ;;  %v3365_v28 = vadd.f32 %v3364_v13, %v3363_v0 }
 0x1b6   : > { %v3424_v37 = vpop.f32.mrb[92].mxu1 }
 0x1b7   : > { %v3425_v18 = vpop.f32.mrb[93].mxu1  ;;  %v4493_v38 = vadd.f32 %v3365_v28, %v4397_v36 }
 0x1b8   : > { %v3426_v12 = vadd.f32 %v3425_v18, %v3424_v37  ;;  %v3427_v43 = vpop.f32.mrb[94].mxu1 }
 0x1b9   : > { %v3428_v33 = vpop.f32.mrb[95].mxu1  ;;  %v3366_v10 = vpop.f32.mrb[96].mxu0 }
 0x1ba   : > { %v3429_v59 = vadd.f32 %v3428_v33, %v3427_v43  ;;  %v4490_v63 = vadd.f32 %v3426_v12, %v4394_v22  ;;  %v3367_v53 = vpop.f32.mrb[97].mxu0 }
 0x1bb   : > { %v3368_v50 = vadd.f32 %v3367_v53, %v3366_v10  ;;  %v3369_v9 = vpop.f32.mrb[98].mxu0 }
 0x1bc   : > { %v4496_v26 = vadd.f32 %v3429_v59, %v4400_v32  ;;  %v3370_v56 = vpop.f32.mrb[99].mxu0 }
 0x1bd   : > { %v4499_v62 = vadd.f32 %v3368_v50, %v4403_v60  ;;  %v3371_v22 = vadd.f32 %v3370_v56, %v3369_v9 }
 0x1be   : > { %v3430_v14 = vpop.f32.mrb[96].mxu1 }
 0x1bf   : > { %v3431_v42 = vpop.f32.mrb[97].mxu1  ;;  %v4505_v32 = vadd.f32 %v3371_v22, %v4409_v23 }
 0x1c0   : > { %v3432_v47 = vadd.f32 %v3431_v42, %v3430_v14  ;;  %v3433_v57 = vpop.f32.mrb[98].mxu1 }
 0x1c1   : > { %v3434_v54 = vpop.f32.mrb[99].mxu1  ;;  %v3372_v3 = vpop.f32.mrb[100].mxu0 }
 0x1c2   : > { %v3435_v39 = vadd.f32 %v3434_v54, %v3433_v57  ;;  %v4502_v36 = vadd.f32 %v3432_v47, %v4406_v17  ;;  %v3373_v45 = vpop.f32.mrb[101].mxu0 }
 0x1c3   : > { %v3374_v44 = vadd.f32 %v3373_v45, %v3372_v3  ;;  %v3375_v30 = vpop.f32.mrb[102].mxu0 }
 0x1c4   : > { %v4508_v20 = vadd.f32 %v3435_v39, %v4412_v35  ;;  %v3376_v18 = vpop.f32.mrb[103].mxu0 }
 0x1c5   : > { %v4511_v12 = vadd.f32 %v3374_v44, %v4415_v16  ;;  %v3377_v17 = vadd.f32 %v3376_v18, %v3375_v30 }
 0x1c6   : > { %v3436_v1 = vpop.f32.mrb[100].mxu1 }
 0x1c7   : > { %v3437_v41 = vpop.f32.mrb[101].mxu1  ;;  %v4517_v35 = vadd.f32 %v3377_v17, %v4421_v25 }
 0x1c8   : > { %v3438_v37 = vadd.f32 %v3437_v41, %v3436_v1  ;;  %v3439_v60 = vpop.f32.mrb[102].mxu1 }
 0x1c9   : > { %v3440_v2 = vpop.f32.mrb[103].mxu1  ;;  %v3378_v13 = vpop.f32.mrb[104].mxu0 }
 0x1ca   : > { %v3441_v0 = vadd.f32 %v3440_v2, %v3439_v60  ;;  %v4514_v23 = vadd.f32 %v3438_v37, %v4418_v52  ;;  %v3379_v28 = vpop.f32.mrb[105].mxu0 }
 0x1cb   : > { %v3380_v10 = vadd.f32 %v3379_v28, %v3378_v13  ;;  %v3381_v53 = vpop.f32.mrb[106].mxu0 }
 0x1cc   : > { %v4520_v43 = vadd.f32 %v3441_v0, %v4424_v58  ;;  %v3382_v42 = vpop.f32.mrb[107].mxu0 }
 0x1cd   : > { %v4523_v47 = vadd.f32 %v3380_v10, %v4427_v40  ;;  %v3383_v52 = vadd.f32 %v3382_v42, %v3381_v53 }
 0x1ce   : > { %v3442_v33 = vpop.f32.mrb[104].mxu1 }
 0x1cf   : > { %v3443_v59 = vpop.f32.mrb[105].mxu1  ;;  %v4529_v58 = vadd.f32 %v3383_v52, %v4433_v51 }
 0x1d0   : > { %v3444_v14 = vadd.f32 %v3443_v59, %v3442_v33  ;;  %v3445_v16 = vpop.f32.mrb[106].mxu1 }
 0x1d1   : > { %v3446_v50 = vpop.f32.mrb[107].mxu1  ;;  %v3384_v56 = vpop.f32.mrb[108].mxu0 }
 0x1d2   : > { %v3447_v9 = vadd.f32 %v3446_v50, %v3445_v16  ;;  %v4526_v25 = vadd.f32 %v3444_v14, %v4430_v6  ;;  %v3385_v22 = vpop.f32.mrb[109].mxu0 }
 0x1d3   : > { %v3386_v3 = vadd.f32 %v3385_v22, %v3384_v56  ;;  %v3387_v40 = vpop.f32.mrb[110].mxu0 }
 0x1d4   : > { %v4532_v57 = vadd.f32 %v3447_v9, %v4436_v34  ;;  %v3388_v41 = vpop.f32.mrb[111].mxu0 }
 0x1d5   : > { %v4535_v6 = vadd.f32 %v3386_v3, %v4439_v29  ;;  %v3389_v37 = vadd.f32 %v3388_v41, %v3387_v40 }
 0x1d6   : > { %v3448_v54 = vpop.f32.mrb[108].mxu1 }
 0x1d7   : > { %v3449_v39 = vpop.f32.mrb[109].mxu1  ;;  %v4541_v34 = vadd.f32 %v3389_v37, %v4445_v11 }
 0x1d8   : > { %v3450_v1 = vadd.f32 %v3449_v39, %v3448_v54  ;;  %v3451_v45 = vpop.f32.mrb[110].mxu1 }
 0x1d9   : > { %v3452_v44 = vpop.f32.mrb[111].mxu1  ;;  %v3544_v2 = vpop.f32.mrb[112].mxu0 }
 0x1da   : > { %v3453_v51 = vadd.f32 %v3452_v44, %v3451_v45  ;;  %v4538_v30 = vadd.f32 %v3450_v1, %v4442_v48  ;;  %v2319_v17 = vadd.f32 %v3544_v2, %v4466_v21  ;;  %v2310_v13 = vpop.f32.mrb[113].mxu0 }
 0x1db   : > { %v2311_v33 = vadd.f32 %v2310_v13, %v4454_v8  ;;  %v3545_v59 = vpop.f32.mrb[114].mxu0 }
 0x1dc   : > { %v4544_v60 = vadd.f32 %v3453_v51, %v4448_v61  ;;  %v2322_v48 = vadd.f32 %v3545_v59, %v4472_v4  ;;  %v2313_v11 = vpop.f32.mrb[115].mxu0  ;;  %v2637_v52 = vmul.f32 %v2319_v17, %v2319_v17 }
 0x1dd   : > { %v2314_v21 = vadd.f32 %v2313_v11, %v4460_v49  ;;  %v2635_v8 = vmul.f32 %v2311_v33, %v2311_v33 }
 0x1de   : > { %v3454_v18 = vpop.f32.mrb[112].mxu1  ;;  %v2967_v53 = vpack.c.bf16 %v2322_v48, %v2319_v17  ;;  %v2638_v39 = vmul.f32 %v2322_v48, %v2322_v48 }
 0x1df   : > { %v3455_v0 = vpop.f32.mrb[113].mxu1  ;;  %v2962_v16 = vpack.c.bf16 %v2314_v21, %v2311_v33  ;;  %v2597_v42 = vadd.f32 %v2314_v21, %v2311_v33  ;;  %v2636_v4 = vmul.f32 %v2314_v21, %v2314_v21 }
 0x1e0   : > { %v3456_v29 = vadd.f32 %v3455_v0, %v3454_v18  ;;  %v3457_v28 = vpop.f32.mrb[114].mxu1  ;;  %3039 = vst [vmem:[%s4553_s28 + $0x8] sm:$0xff] %v2967_v53  }
 0x1e1   : > { %v3458_v10 = vpop.f32.mrb[115].mxu1  ;;  %2963 = vst [vmem:[%s4553_s28] sm:$0xff] %v2962_v16   ;;  %v2598_v9 = vadd.f32 %v2597_v42, %v2319_v17  ;;  %v2667_v56 = vadd.f32 %v2636_v4, %v2635_v8  ;;  %v3548_v22 = vpop.f32.mrb[116].mxu0 }
 0x1e2   : > { %v3459_v61 = vadd.f32 %v3458_v10, %v3457_v28  ;;  %v4557_v14 = vadd.f32 %v3456_v29, %v4451_v27  ;;  %v2335_v49 = vadd.f32 %v3548_v22, %v4490_v63  ;;  %v2326_v3 = vpop.f32.mrb[117].mxu0 }
 0x1e3   : > { %v2668_v1 = vadd.f32 %v2667_v56, %v2637_v52  ;;  %v2327_v45 = vadd.f32 %v2326_v3, %v4478_v55  ;;  %v2599_v41 = vadd.f32 %v2598_v9, %v2322_v48  ;;  %v3549_v44 = vpop.f32.mrb[118].mxu0 }
 0x1e4   : > { %v4560_v50 = vadd.f32 %v3459_v61, %v4457_v15  ;;  %v2338_v37 = vadd.f32 %v3549_v44, %v4496_v26  ;;  %v2329_v18 = vpop.f32.mrb[119].mxu0  ;;  %v2641_v61 = vmul.f32 %v2335_v49, %v2335_v49 }
 0x1e5   : > { %v2600_v2 = vadd.f32 %v2599_v41, %v2327_v45  ;;  %v2639_v17 = vmul.f32 %v2327_v45, %v2327_v45  ;;  %v2669_v0 = vadd.f32 %v2668_v1, %v2638_v39  ;;  %v2330_v29 = vadd.f32 %v2329_v18, %v4484_v19 }
 0x1e6   : > { %v3460_v54 = vpop.f32.mrb[116].mxu1  ;;  %v2977_v63 = vpack.c.bf16 %v2338_v37, %v2335_v49  ;;  %v2642_v52 = vmul.f32 %v2338_v37, %v2338_v37 }
 0x1e7   : > { %v3461_v27 = vpop.f32.mrb[117].mxu1  ;;  %v2670_v55 = vadd.f32 %v2669_v0, %v2639_v17  ;;  %v2972_v59 = vpack.c.bf16 %v2330_v29, %v2327_v45  ;;  %v2601_v26 = vadd.f32 %v2600_v2, %v2330_v29  ;;  %v2640_v48 = vmul.f32 %v2330_v29, %v2330_v29 }
 0x1e8   : > { %v3462_v40 = vadd.f32 %v3461_v27, %v3460_v54  ;;  %v3463_v15 = vpop.f32.mrb[118].mxu1  ;;  %3041 = vst [vmem:[%s4553_s28 + $0x18] sm:$0xff] %v2977_v63  }
 0x1e9   : > { %v3464_v51 = vpop.f32.mrb[119].mxu1  ;;  %v3552_v11 = vpop.f32.mrb[120].mxu0  ;;  %3040 = vst [vmem:[%s4553_s28 + $0x10] sm:$0xff] %v2972_v59   ;;  %v2602_v21 = vadd.f32 %v2601_v26, %v2335_v49  ;;  %v2671_v8 = vadd.f32 %v2670_v55, %v2640_v48 }
 0x1ea   : > { %v3465_v13 = vadd.f32 %v3464_v51, %v3463_v15  ;;  %v4569_v33 = vadd.f32 %v3462_v40, %v4463_v46  ;;  %v2351_v53 = vadd.f32 %v3552_v11, %v4514_v23  ;;  %v2342_v16 = vpop.f32.mrb[121].mxu0 }
 0x1eb   : > { %v2343_v42 = vadd.f32 %v2342_v16, %v4502_v36  ;;  %v2672_v9 = vadd.f32 %v2671_v8, %v2641_v61  ;;  %v2603_v56 = vadd.f32 %v2602_v21, %v2338_v37 }
 0x1ec   : > { %v4572_v28 = vadd.f32 %v3465_v13, %v4469_v24  ;;  %v3553_v24 = vpop.f32.mrb[122].mxu0  ;;  %v2645_v18 = vmul.f32 %v2351_v53, %v2351_v53 }
 0x1ed   : > { %v2354_v54 = vadd.f32 %v3553_v24, %v4520_v43  ;;  %v2345_v39 = vpop.f32.mrb[123].mxu0  ;;  %v2643_v49 = vmul.f32 %v2343_v42, %v2343_v42  ;;  %v2604_v1 = vadd.f32 %v2603_v56, %v2343_v42  ;;  %v2673_v36 = vadd.f32 %v2672_v9, %v2642_v52 }
 0x1ee   : > { %v3466_v10 = vpop.f32.mrb[120].mxu1  ;;  %v2346_v23 = vadd.f32 %v2345_v39, %v4508_v20 }
 0x1ef   : > { %v3467_v19 = vpop.f32.mrb[121].mxu1  ;;  %v2987_v40 = vpack.c.bf16 %v2354_v54, %v2351_v53  ;;  %v2674_v44 = vadd.f32 %v2673_v36, %v2643_v49 }
 0x1f0   : > { %v3468_v46 = vadd.f32 %v3467_v19, %v3466_v10  ;;  %v3469_v4 = vpop.f32.mrb[122].mxu1  ;;  %v2982_v45 = vpack.c.bf16 %v2346_v23, %v2343_v42  ;;  %v2644_v41 = vmul.f32 %v2346_v23, %v2346_v23  ;;  %v2605_v43 = vadd.f32 %v2604_v1, %v2346_v23 }
 0x1f1   : > { %v3470_v22 = vpop.f32.mrb[123].mxu1  ;;  %3043 = vst [vmem:[%s4553_s28 + $0x28] sm:$0xff] %v2987_v40   ;;  %v3556_v51 = vpop.f32.mrb[124].mxu0 }
 0x1f2   : > { %v3471_v27 = vadd.f32 %v3470_v22, %v3469_v4  ;;  %v4581_v3 = vadd.f32 %v3468_v46, %v4475_v7  ;;  %3042 = vst [vmem:[%s4553_s28 + $0x20] sm:$0xff] %v2982_v45   ;;  %v2606_v2 = vadd.f32 %v2605_v43, %v2351_v53  ;;  %v2675_v20 = vadd.f32 %v2674_v44, %v2644_v41  ;;  %v2358_v0 = vpop.f32.mrb[125].mxu0 }
 0x1f3   : > { %v2367_v7 = vadd.f32 %v3556_v51, %v4538_v30  ;;  %v2359_v63 = vadd.f32 %v2358_v0, %v4526_v25  ;;  %v3557_v55 = vpop.f32.mrb[126].mxu0 }
 0x1f4   : > { %v4584_v15 = vadd.f32 %v3471_v27, %v4481_v5  ;;  %v2646_v5 = vmul.f32 %v2354_v54, %v2354_v54  ;;  %v2676_v59 = vadd.f32 %v2675_v20, %v2645_v18  ;;  %v2607_v26 = vadd.f32 %v2606_v2, %v2354_v54  ;;  %v2361_v11 = vpop.f32.mrb[127].mxu0 }
 0x1f5   : > { %v2370_v48 = vadd.f32 %v3557_v55, %v4544_v60  ;;  %v2647_v61 = vmul.f32 %v2359_v63, %v2359_v63  ;;  %v2362_v30 = vadd.f32 %v2361_v11, %v4532_v57  ;;  %v2649_v9 = vmul.f32 %v2367_v7, %v2367_v7 }
 0x1f6   : > { %v3472_v37 = vpop.f32.mrb[124].mxu1  ;;  %v2608_v53 = vadd.f32 %v2607_v26, %v2359_v63  ;;  %v2677_v19 = vadd.f32 %v2676_v59, %v2646_v5 }
 0x1f7   : > { %v3473_v17 = vpop.f32.mrb[125].mxu1  ;;  %v2997_v25 = vpack.c.bf16 %v2370_v48, %v2367_v7  ;;  %v2992_v16 = vpack.c.bf16 %v2362_v30, %v2359_v63  ;;  %v2648_v46 = vmul.f32 %v2362_v30, %v2362_v30  ;;  %v2650_v1 = vmul.f32 %v2370_v48, %v2370_v48 }
 0x1f8   : > { %v3474_v13 = vadd.f32 %v3473_v17, %v3472_v37  ;;  %v3475_v29 = vpop.f32.mrb[126].mxu1  ;;  %v2678_v4 = vadd.f32 %v2677_v19, %v2647_v61  ;;  %v2609_v24 = vadd.f32 %v2608_v53, %v2362_v30 }
 0x1f9   : > { %v3476_v10 = vpop.f32.mrb[127].mxu1  ;;  %3045 = vst [vmem:[%s4553_s28 + $0x38] sm:$0xff] %v2997_v25   ;;  %3044 = vst [vmem:[%s4553_s28 + $0x30] sm:$0xff] %v2992_v16   ;;  %v3560_v52 = vpop.f32.mrb[128].mxu0 }
 0x1fa   : > { %v3477_v21 = vadd.f32 %v3476_v10, %v3475_v29  ;;  %v2238_v8 = vadd.f32 %v3474_v13, %v4487_v31  ;;  %v2610_v56 = vadd.f32 %v2609_v24, %v2367_v7  ;;  %v2679_v54 = vadd.f32 %v2678_v4, %v2648_v46  ;;  %v2374_v31 = vpop.f32.mrb[129].mxu0 }
 0x1fb   : > { %v2383_v57 = vadd.f32 %v3560_v52, %v4569_v33  ;;  %v2375_v49 = vadd.f32 %v2374_v31, %v4557_v14  ;;  %v3561_v23 = vpop.f32.mrb[130].mxu0 }
 0x1fc   : > { %v2241_v42 = vadd.f32 %v3477_v21, %v4493_v38  ;;  %v2680_v38 = vadd.f32 %v2679_v54, %v2649_v9  ;;  %v2611_v36 = vadd.f32 %v2610_v56, %v2370_v48  ;;  %v2386_v40 = vadd.f32 %v3561_v23, %v4572_v28  ;;  %v2377_v41 = vpop.f32.mrb[131].mxu0 }
 0x1fd   : > { %v2651_v44 = vmul.f32 %v2375_v49, %v2375_v49  ;;  %v2378_v33 = vadd.f32 %v2377_v41, %v4560_v50  ;;  %v2653_v63 = vmul.f32 %v2383_v57, %v2383_v57 }
 0x1fe   : > { %v3478_v60 = vpop.f32.mrb[128].mxu1  ;;  %v2612_v51 = vadd.f32 %v2611_v36, %v2375_v49  ;;  %v2681_v18 = vadd.f32 %v2680_v38, %v2650_v1  ;;  %v3007_v14 = vpack.c.bf16 %v2386_v40, %v2383_v57  ;;  %v2654_v11 = vmul.f32 %v2386_v40, %v2386_v40 }
 0x1ff   : > { %v3479_v22 = vpop.f32.mrb[129].mxu1  ;;  %v3002_v2 = vpack.c.bf16 %v2378_v33, %v2375_v49  ;;  %v2652_v20 = vmul.f32 %v2378_v33, %v2378_v33 }
 0x200   : > { %v3480_v39 = vadd.f32 %v3479_v22, %v3478_v60  ;;  %v3481_v27 = vpop.f32.mrb[130].mxu1  ;;  %v2682_v17 = vadd.f32 %v2681_v18, %v2651_v44  ;;  %3047 = vst [vmem:[%s4553_s28 + $0x48] sm:$0xff] %v3007_v14   ;;  %v2613_v0 = vadd.f32 %v2612_v51, %v2378_v33 }
 0x201   : > { %v3482_v45 = vpop.f32.mrb[131].mxu1  ;;  %3046 = vst [vmem:[%s4553_s28 + $0x40] sm:$0xff] %v3002_v2   ;;  %v3564_v13 = vpop.f32.mrb[132].mxu0 }
 0x202   : > { %v3483_v43 = vadd.f32 %v3482_v45, %v3481_v27  ;;  %v2246_v37 = vadd.f32 %v3480_v39, %v4499_v62  ;;  %v2614_v29 = vadd.f32 %v2613_v0, %v2383_v57  ;;  %v2683_v55 = vadd.f32 %v2682_v17, %v2652_v20  ;;  %v2390_v59 = vpop.f32.mrb[133].mxu0 }
 0x203   : > { %v2399_v5 = vadd.f32 %v3564_v13, %v2238_v8  ;;  %v2391_v26 = vadd.f32 %v2390_v59, %v4581_v3  ;;  %v3565_v10 = vpop.f32.mrb[134].mxu0 }
 0x204   : > { %v2249_v7 = vadd.f32 %v3483_v43, %v4505_v32  ;;  %v2684_v61 = vadd.f32 %v2683_v55, %v2653_v63  ;;  %v2615_v32 = vadd.f32 %v2614_v29, %v2386_v40  ;;  %v2402_v21 = vadd.f32 %v3565_v10, %v2241_v42  ;;  %v2393_v53 = vpop.f32.mrb[135].mxu0 }
 0x205   : > { %v2655_v19 = vmul.f32 %v2391_v26, %v2391_v26  ;;  %v2394_v16 = vadd.f32 %v2393_v53, %v4584_v15  ;;  %v2657_v57 = vmul.f32 %v2399_v5, %v2399_v5 }
 0x206   : > { %v3484_v28 = vpop.f32.mrb[132].mxu1  ;;  %v2616_v46 = vadd.f32 %v2615_v32, %v2391_v26  ;;  %v2685_v4 = vadd.f32 %v2684_v61, %v2654_v11  ;;  %v3017_v24 = vpack.c.bf16 %v2402_v21, %v2399_v5  ;;  %v2658_v38 = vmul.f32 %v2402_v21, %v2402_v21 }
 0x207   : > { %v3485_v50 = vpop.f32.mrb[133].mxu1  ;;  %v3012_v3 = vpack.c.bf16 %v2394_v16, %v2391_v26  ;;  %v2656_v60 = vmul.f32 %v2394_v16, %v2394_v16 }
 0x208   : > { %v3486_v62 = vadd.f32 %v3485_v50, %v3484_v28  ;;  %v3487_v48 = vpop.f32.mrb[134].mxu1  ;;  %v2686_v9 = vadd.f32 %v2685_v4, %v2655_v19  ;;  %3049 = vst [vmem:[%s4553_s28 + $0x58] sm:$0xff] %v3017_v24   ;;  %v2617_v56 = vadd.f32 %v2616_v46, %v2394_v16 }
 0x209   : > { %v3488_v30 = vpop.f32.mrb[135].mxu1  ;;  %3048 = vst [vmem:[%s4553_s28 + $0x50] sm:$0xff] %v3012_v3   ;;  %v3568_v54 = vpop.f32.mrb[136].mxu0 }
 0x20a   : > { %v3489_v25 = vadd.f32 %v3488_v30, %v3487_v48  ;;  %v2254_v8 = vadd.f32 %v3486_v62, %v4511_v12  ;;  %v2618_v22 = vadd.f32 %v2617_v56, %v2399_v5  ;;  %v2687_v31 = vadd.f32 %v2686_v9, %v2656_v60  ;;  %v2406_v49 = vpop.f32.mrb[137].mxu0 }
 0x20b   : > { %v2407_v27 = vadd.f32 %v2406_v49, %v2246_v37  ;;  %v3569_v1 = vpop.f32.mrb[138].mxu0 }
 0x20c   : > { %v2257_v52 = vadd.f32 %v3489_v25, %v4517_v35  ;;  %v2415_v39 = vadd.f32 %v3568_v54, %v2254_v8  ;;  %v2688_v36 = vadd.f32 %v2687_v31, %v2657_v57  ;;  %v2619_v35 = vadd.f32 %v2618_v22, %v2402_v21  ;;  %v2409_v41 = vpop.f32.mrb[139].mxu0 }
 0x20d   : > { %v2659_v44 = vmul.f32 %v2407_v27, %v2407_v27  ;;  %v2410_v33 = vadd.f32 %v2409_v41, %v2249_v7 }
 0x20e   : > { %v3490_v42 = vpop.f32.mrb[136].mxu1  ;;  %v2418_v40 = vadd.f32 %v3569_v1, %v2257_v52  ;;  %v2620_v18 = vadd.f32 %v2619_v35, %v2407_v27  ;;  %v2689_v14 = vadd.f32 %v2688_v36, %v2658_v38  ;;  %v2661_v29 = vmul.f32 %v2415_v39, %v2415_v39 }
 0x20f   : > { %v3491_v15 = vpop.f32.mrb[137].mxu1  ;;  %v3022_v20 = vpack.c.bf16 %v2410_v33, %v2407_v27  ;;  %v2660_v37 = vmul.f32 %v2410_v33, %v2410_v33 }
 0x210   : > { %v3492_v12 = vadd.f32 %v3491_v15, %v3490_v42  ;;  %v3493_v23 = vpop.f32.mrb[138].mxu1  ;;  %v3027_v2 = vpack.c.bf16 %v2418_v40, %v2415_v39  ;;  %v2690_v0 = vadd.f32 %v2689_v14, %v2659_v44  ;;  %v2621_v28 = vadd.f32 %v2620_v18, %v2410_v33 }
 0x211   : > { %v3494_v45 = vpop.f32.mrb[139].mxu1  ;;  %3050 = vst [vmem:[%s4553_s28 + $0x60] sm:$0xff] %v3022_v20   ;;  %v3572_v63 = vpop.f32.mrb[140].mxu0  ;;  %v2662_v48 = vmul.f32 %v2418_v40, %v2418_v40 }
 0x212   : > { %v3495_v43 = vadd.f32 %v3494_v45, %v3493_v23  ;;  %v2262_v51 = vadd.f32 %v3492_v12, %v4523_v47  ;;  %3051 = vst [vmem:[%s4553_s28 + $0x68] sm:$0xff] %v3027_v2   ;;  %v2622_v55 = vadd.f32 %v2621_v28, %v2415_v39  ;;  %v2691_v5 = vadd.f32 %v2690_v0, %v2660_v37  ;;  %v2422_v7 = vpop.f32.mrb[141].mxu0 }
 0x213   : > { %v3573_v26 = vpop.f32.mrb[142].mxu0 }
 0x214   : > { %v2265_v17 = vadd.f32 %v3495_v43, %v4529_v58  ;;  %v2423_v47 = vadd.f32 %v2422_v7, %v2262_v51  ;;  %v2692_v10 = vadd.f32 %v2691_v5, %v2661_v29  ;;  %v2623_v11 = vadd.f32 %v2622_v55, %v2418_v40  ;;  %v2425_v58 = vpop.f32.mrb[143].mxu0 }
 0x216   : > { %v3496_v13 = vpop.f32.mrb[140].mxu1  ;;  %v2663_v21 = vmul.f32 %v2423_v47, %v2423_v47  ;;  %v2426_v53 = vadd.f32 %v2425_v58, %v2265_v17  ;;  %v2624_v19 = vadd.f32 %v2623_v11, %v2423_v47  ;;  %v2693_v25 = vadd.f32 %v2692_v10, %v2662_v48 }
 0x217   : > { %v3497_v50 = vpop.f32.mrb[141].mxu1 }
 0x218   : > { %v3498_v59 = vadd.f32 %v3497_v50, %v3496_v13  ;;  %v3499_v62 = vpop.f32.mrb[142].mxu1  ;;  %v3032_v46 = vpack.c.bf16 %v2426_v53, %v2423_v47  ;;  %v2664_v4 = vmul.f32 %v2426_v53, %v2426_v53  ;;  %v2694_v24 = vadd.f32 %v2693_v25, %v2663_v21 }
 0x219   : > { %v3500_v61 = vpop.f32.mrb[143].mxu1  ;;  %v2625_v3 = vadd.f32 %v2624_v19, %v2426_v53 }
 0x21a   : > { %v2270_v32 = vadd.f32 %v3498_v59, %v4535_v6  ;;  %v3501_v30 = vadd.f32 %v3500_v61, %v3499_v62  ;;  %3052 = vst [vmem:[%s4553_s28 + $0x70] sm:$0xff] %v3032_v46   ;;  %v2695_v56 = vadd.f32 %v2694_v24, %v2664_v4 }
 0x21c   : > { %v2431_v16 = vadd.f32 %v3572_v63, %v2270_v32  ;;  %v2273_v8 = vadd.f32 %v3501_v30, %v4541_v34 }
 0x21e   : > { %v2665_v60 = vmul.f32 %v2431_v16, %v2431_v16  ;;  %v2434_v52 = vadd.f32 %v3573_v26, %v2273_v8  ;;  %v2626_v9 = vadd.f32 %v2625_v3, %v2431_v16 }
 0x220   : > { %v3037_v6 = vpack.c.bf16 %v2434_v52, %v2431_v16  ;;  %v2666_v42 = vmul.f32 %v2434_v52, %v2434_v52  ;;  %v2627_v54 = vadd.f32 %v2626_v9, %v2434_v52  ;;  %v2696_v57 = vadd.f32 %v2695_v56, %v2665_v60 }
 0x222   : > { %3053 = vst [vmem:[%s4553_s28 + $0x78] sm:$0xff] %v3037_v6   ;;  %v2628_v22 = vrot.slane %v2627_v54, 4  ;;  %v2697_v31 = vadd.f32 %v2696_v57, %v2666_v42 }
 0x224   : > { %v2629_v39 = vadd.f32 %v2628_v22, %v2627_v54  ;;  %v2698_v34 = vrot.slane %v2697_v31, 4 }
 0x226   : > { %v2630_v15 = vrot.slane %v2629_v39, 2  ;;  %v2699_v49 = vadd.f32 %v2698_v34, %v2697_v31 }
 0x228   : > { %v2631_v12 = vadd.f32 %v2630_v15, %v2629_v39  ;;  %v2700_v27 = vrot.slane %v2699_v49, 2 }
 0x22a   : > { %v2632_v23 = vrot.slane %v2631_v12, 1  ;;  %v2701_v1 = vadd.f32 %v2700_v27, %v2699_v49 }
 0x22c   : > { %v2633_v38 = vadd.f32 %v2632_v23, %v2631_v12  ;;  %v2702_v36 = vrot.slane %v2701_v1, 1 }
 0x22e   : > { %2634 = vst [vmem:[%s211_s5] sm:$0x1] %v2633_v38  ;;  %v2703_v35 = vadd.f32 %v2702_v36, %v2701_v1 }
 0x230   : > { %2704 = vst [vmem:[%s214_s8] sm:$0x1] %v2703_v35 }
 0x231 PF: > { %s15_s15 = sadd.s32 1, %s3678_s15  }
 0x232   : > { %p12_p4 = scmp.ge.s32.totalorder %s15_s15, 4  }
 0x234   :  { %14 = sbr.rel (!%p12_p4) target bundleno = 1 (0x1), region = 84 }

// kernel: basic_block_forward.4
= control target key start
LH: loop header
LB: loop body
LE: loop exit
PB: predicated region body
PF: predicated region fallthrough
CT: control target
= control target key end

     0   :  { %s3707_s21 = smov 0   ;;  %s4744_s0 = inlined_call_operand.vmem [shape: bf16[2,16,16,128], index: 0, kind: input, shape index: {}]   ;;  %s4745_s1 = inlined_call_operand.vmem [shape: f32[1,128], index: 1, kind: input, shape index: {}]   ;;  %s4746_s2 = inlined_call_operand.vmem [shape: f32[1,128], index: 2, kind: input, shape index: {}]   ;;  %s4747_s3 = inlined_call_operand.vmem [shape: bf16[1152,128], index: 3, kind: input, shape index: {}]   ;;  %s4748_s4 = inlined_call_operand.vmem [shape: f32[2,16,16,128], index: 4, kind: output, shape index: {0}]   ;;  %s4749_s5 = inlined_call_operand.vmem [shape: f32[2,1,128], index: 5, kind: output, shape index: {1}]   ;;  %s4750_s6 = inlined_call_operand.vmem [shape: f32[2,1,128], index: 6, kind: output, shape index: {2}]  }
   0x1 LB: > { %s2878_s22 = sadd.s32 4294967295, %s3668_s21   ;;  %p2882_p0 = scmp.ge.s32.totalorder %s3668_s21, 1  ;;  %s3668_s21 = sphi %s3707_s21, %s17_s21  }
   0x2   : > { %p217_p1 = scmp.lt.s32.totalorder %s3668_s21, 3 }
   0x4   : > { %p218_p2 = pnand %p2882_p0, %p217_p1 }
   0x5   : > { %v3589_v0 = vld [vmem:[%s4747_s3 + $0x40] sm:$0xff] (!%p218_p2)   ;;  %v3670_v2 = vmov (!%p218_p2), 0.0   ;;  %v3591_v3 = vld [vmem:[%s4747_s3 + $0x48] sm:$0xff] (!%p218_p2)   ;;  %p253_p3 = scmp.lt.s32.totalorder (!%p218_p2), %s2878_s22, 1  ;;  %v3593_v5 = vld [vmem:[%s4747_s3 + $0x50] sm:$0xff] (!%p218_p2)  }
   0x6   : > { %221 = sbr.rel (%p218_p2) target bundleno = 561 (0x231), region = 36  ;;  %v3590_v1 = vld [vmem:[%s4747_s3] sm:$0xff] (!%p218_p2)   ;;  %444 = vst [vmem:[#allocation2] sm:$0xff] (!%p218_p2), %v3670_v2  ;;  %445 = vst [vmem:[#allocation2 + $0x8] sm:$0xff] (!%p218_p2), %v3670_v2  ;;  %3044 = vmatprep.subr.bf16.mxu0 (!%p218_p2), %v3589_v0  ;;  %3564 = vmatprep.subr.bf16.mxu1 (!%p218_p2), %v3589_v0  ;;  %v3592_v4 = vld [vmem:[%s4747_s3 + $0x8] sm:$0xff] (!%p218_p2)  }
   0x7   : > { %446 = vst [vmem:[#allocation2 + $0x10] sm:$0x3] (!%p218_p2), %v3670_v2  ;;  %447 = vst [vmem:[#allocation2 + $0x18] sm:$0xff] (!%p218_p2), %v3670_v2  ;;  %3045 = vmatpush3.bf16.msra.mxu0 (!%p218_p2), %v3590_v1  ;;  %3572 = vmatpush3.bf16.msra.mxu1 (!%p218_p2), %v3590_v1  ;;  %v3594_v6 = vld [vmem:[%s4747_s3 + $0x10] sm:$0xff] (!%p218_p2)   ;;  %v3595_v7 = vld [vmem:[%s4747_s3 + $0x58] sm:$0xff] (!%p218_p2)  }
   0x8   : > { %448 = vst [vmem:[#allocation2 + $0x20] sm:$0xff] (!%p218_p2), %v3670_v2  ;;  %449 = vst [vmem:[#allocation2 + $0x28] sm:$0x3] (!%p218_p2), %v3670_v2  ;;  %3046 = vmatprep.subr.bf16.mxu0 (!%p218_p2), %v3591_v3  ;;  %3565 = vmatprep.subr.bf16.mxu1 (!%p218_p2), %v3591_v3  ;;  %v3596_v8 = vld [vmem:[%s4747_s3 + $0x18] sm:$0xff] (!%p218_p2)   ;;  %v3597_v9 = vld [vmem:[%s4747_s3 + $0x60] sm:$0xff] (!%p218_p2)   ;;  %v3671_v3 = vmov (!%p218_p2), 0.0|0.0  }
   0x9   : > { %450 = vst [vmem:[#allocation2 + $0x30] sm:$0xff] (!%p218_p2), %v3670_v2  ;;  %451 = vst [vmem:[#allocation2 + $0x38] sm:$0xff] (!%p218_p2), %v3670_v2  ;;  %v3598_v10 = vld [vmem:[%s4747_s3 + $0x20] sm:$0xff] (!%p218_p2)   ;;  %v3599_v11 = vld [vmem:[%s4747_s3 + $0x68] sm:$0xff] (!%p218_p2)  }
   0xa   : > { %452 = vst [vmem:[#allocation2 + $0x40] sm:$0x3] (!%p218_p2), %v3670_v2  ;;  %453 = vst [vmem:[#allocation2 + $0x48] sm:$0xff] (!%p218_p2), %v3670_v2  ;;  %v3763_v15 = vld [vmem:[%s4745_s1] ss:$0 sm:$0xff] (!%p218_p2)  ;;  %v3600_v17 = vld [vmem:[%s4747_s3 + $0x28] sm:$0xff] (!%p218_p2)  }
   0xb   : > { %454 = vst [vmem:[#allocation2 + $0x50] sm:$0xff] (!%p218_p2), %v3670_v2  ;;  %455 = vst [vmem:[#allocation2 + $0x58] sm:$0x3] (!%p218_p2), %v3670_v2  ;;  %3047 = vmatpush3.bf16.msra.mxu0 (!%p218_p2), %v3592_v4  ;;  %3573 = vmatpush3.bf16.msra.mxu1 (!%p218_p2), %v3592_v4  ;;  %v3772_v20 = vld [vmem:[%s4746_s2] ss:$0 sm:$0xff] (!%p218_p2)  ;;  %v3601_v21 = vld [vmem:[%s4747_s3 + $0x70] sm:$0xff] (!%p218_p2)  }
   0xc   : > { %456 = vst [vmem:[#allocation2 + $0x60] sm:$0xff] (!%p218_p2), %v3670_v2  ;;  %457 = vst [vmem:[#allocation2 + $0x68] sm:$0xff] (!%p218_p2), %v3670_v2  ;;  %3048 = vmatprep.subr.bf16.mxu0 (!%p218_p2), %v3593_v5  ;;  %3566 = vmatprep.subr.bf16.mxu1 (!%p218_p2), %v3593_v5  ;;  %v3602_v26 = vld [vmem:[%s4747_s3 + $0x30] sm:$0xff] (!%p218_p2)   ;;  %v3603_v28 = vld [vmem:[%s4747_s3 + $0x78] sm:$0xff] (!%p218_p2)  }
   0xd   : > { %458 = vst [vmem:[#allocation2 + $0x70] sm:$0x3] %v3670_v2  ;;  %459 = vst [vmem:[#allocation2 + $0x78] sm:$0xff] %v3670_v2  ;;  %s4752_s22 = smov (!%p253_p3, %s2878_s22), 1  ;;  %v595_v12 = vld [vmem:[#allocation2 + $0x1] sm:$0xff]  ;;  %v3604_v36 = vld [vmem:[%s4747_s3 + $0x38] sm:$0xff]  }
   0xe   : > { %460 = vst [vmem:[#allocation2 + $0x80] sm:$0xff] %v3670_v2  ;;  %461 = vst [vmem:[#allocation2 + $0x88] sm:$0x3] %v3670_v2  ;;  %s2963_s15 = sshll.u32 %s4752_s22, 7  ;;  %v596_v13 = vld [vmem:[#allocation2 + $0x9] sm:$0xff]  ;;  %v3605_v40 = vld [vmem:[%s4747_s3 + $0xc0] sm:$0xff]   ;;  %s265_s8 = scalar_lea.vmem %s4749_s5, %s4752_s22 }
   0xf   : > { %462 = vst [vmem:[#allocation2 + $0x90] sm:$0xff] %v3670_v2  ;;  %463 = vst [vmem:[#allocation2 + $0x98] sm:$0xff] %v3670_v2  ;;  %3049 = vmatpush3.bf16.msra.mxu0 %v3594_v6  ;;  %3574 = vmatpush3.bf16.msra.mxu1 %v3594_v6  ;;  %s3752_s20 = scalar_lea.vmem %s4744_s0, %s2963_s15  ;;  %v627_v14 = vpack.c.bf16 %v596_v13, %v595_v12  ;;  %v3606_v43 = vld [vmem:[%s4747_s3 + $0x140] sm:$0xff]   ;;  %v3614_v58 = vld [vmem:[%s4747_s3 + $0x148] sm:$0xff]   ;;  %s2964_s26 = sshll.u32 %s4752_s22, 8 }
  0x10   : > { %464 = vst [vmem:[#allocation2 + $0xa0] sm:$0x3] %v3670_v2  ;;  %465 = vst [vmem:[#allocation2 + $0xa8] sm:$0xff] %v3670_v2  ;;  %3050 = vmatprep.subr.bf16.mxu0 %v3595_v7  ;;  %3567 = vmatprep.subr.bf16.mxu1 %v3595_v7  ;;  %v3039_v16 = vld [vmem:[%s3752_s20 + $0x58] sm:$0xff]   ;;  %v2966_v27 = vld [vmem:[%s3752_s20] sm:$0xff]   ;;  %s4646_s29 = scalar_lea.vmem %s4748_s4, %s2964_s26  ;;  %s268_s10 = scalar_lea.vmem %s4750_s6, %s4752_s22 }
  0x11   : > { %466 = vst [vmem:[#allocation2 + $0xb0] sm:$0xff] %v3670_v2  ;;  %467 = vst [vmem:[#allocation2 + $0xb8] sm:$0x3] %v3670_v2  ;;  %v3011_v18 = vunpack.c.l.bf16 %v3039_v16  ;;  %v3012_v19 = vunpack.c.h.bf16 %v3039_v16  ;;  %1860 = vmatprep.mubr.bf16.mxu0 %v627_v14  ;;  %v2967_v31 = vunpack.c.l.bf16 %v2966_v27  ;;  %v2968_v32 = vunpack.c.h.bf16 %v2966_v27  ;;  %v3040_v33 = vld [vmem:[%s3752_s20 + $0x60] sm:$0xff]   ;;  %v3029_v51 = vld [vmem:[%s3752_s20 + $0x8] sm:$0xff]  }
  0x12   : > { %468 = vst [vmem:[#allocation2 + $0xc0] sm:$0xff] %v3670_v2  ;;  %469 = vst [vmem:[#allocation2 + $0xc8] sm:$0xff] %v3670_v2  ;;  %v3015_v34 = vunpack.c.l.bf16 %v3040_v33  ;;  %v3016_v35 = vunpack.c.h.bf16 %v3040_v33  ;;  %v3608_v48 = vld [vmem:[%s4747_s3 + $0x100] sm:$0xff]   ;;  %v3041_v52 = vld [vmem:[%s3752_s20 + $0x68] sm:$0xff]   ;;  %v2971_v55 = vunpack.c.l.bf16 %v3029_v51  ;;  %v2972_v56 = vunpack.c.h.bf16 %v3029_v51 }
  0x13   : > { %470 = vst [vmem:[#allocation2 + $0xd0] sm:$0x3] %v3670_v2  ;;  %471 = vst [vmem:[#allocation2 + $0xd8] sm:$0xff] %v3670_v2  ;;  %3051 = vmatpush3.bf16.msra.mxu0 %v3596_v8  ;;  %3575 = vmatpush3.bf16.msra.mxu1 %v3596_v8  ;;  %v364_v22 = vmul.f32 %v3011_v18, %v3763_v15  ;;  %v365_v23 = vmul.f32 %v3012_v19, %v3763_v15  ;;  %v3019_v59 = vunpack.c.l.bf16 %v3041_v52  ;;  %v3607_v63 = vld [vmem:[%s4747_s3 + $0x80] sm:$0xff]   ;;  %v3609_v5 = vld [vmem:[%s4747_s3 + $0xc8] sm:$0xff]  }
  0x14   : > { %472 = vst [vmem:[#allocation2 + $0xe0] sm:$0xff] %v3670_v2  ;;  %473 = vst [vmem:[#allocation2 + $0xe8] sm:$0x3] %v3670_v2  ;;  %3052 = vmatprep.subr.bf16.mxu0 %v3597_v9  ;;  %3568 = vmatprep.subr.bf16.mxu1 %v3597_v9  ;;  %v342_v38 = vmul.f32 %v2967_v31, %v3763_v15  ;;  %v343_v39 = vmul.f32 %v2968_v32, %v3763_v15  ;;  %v3020_v60 = vunpack.c.h.bf16 %v3041_v52  ;;  %v3610_v8 = vld [vmem:[%s4747_s3 + $0x88] sm:$0xff]   ;;  %v3030_v14 = vld [vmem:[%s3752_s20 + $0x10] sm:$0xff]  }
  0x15   : > { %474 = vst [vmem:[#allocation2 + $0xf0] sm:$0xff] %v3670_v2  ;;  %475 = vst [vmem:[#allocation2 + $0xf8] sm:$0xff] %v3670_v2  ;;  %v402_v24 = vadd.f32 %v3772_v20, %v364_v22  ;;  %v403_v25 = vadd.f32 %v3772_v20, %v365_v23  ;;  %v366_v41 = vmul.f32 %v3015_v34, %v3763_v15  ;;  %v3616_v9 = vld [vmem:[%s4747_s3 + $0x108] sm:$0xff]   ;;  %v3042_v16 = vld [vmem:[%s3752_s20 + $0x70] sm:$0xff]   ;;  %v2976_v22 = vunpack.c.h.bf16 %v3030_v14 }
  0x16   : > { %476 = vst [vmem:[#allocation2 + $0x100] sm:$0x3] %v3670_v2  ;;  %477 = vst [vmem:[#allocation2 + $0x108] sm:$0xff] %v3670_v2  ;;  %v367_v42 = vmul.f32 %v3016_v35, %v3763_v15  ;;  %v380_v44 = vadd.f32 %v3772_v20, %v342_v38  ;;  %v381_v45 = vadd.f32 %v3772_v20, %v343_v39  ;;  %v3622_v23 = vld [vmem:[%s4747_s3 + $0x150] sm:$0xff]   ;;  %v3024_v27 = vunpack.c.h.bf16 %v3042_v16  ;;  %v3031_v51 = vld [vmem:[%s3752_s20 + $0x18] sm:$0xff]  }
  0x17   : > { %478 = vst [vmem:[#allocation2 + $0x110] sm:$0xff] %v3670_v2  ;;  %479 = vst [vmem:[#allocation2 + $0x118] sm:$0x3] %v3670_v2  ;;  %3053 = vmatpush3.bf16.msra.mxu0 %v3598_v10  ;;  %3576 = vmatpush3.bf16.msra.mxu1 %v3598_v10  ;;  %v434_v29 = vmax.f32 %v402_v24, 0.0  ;;  %v435_v30 = vmax.f32 %v403_v25, 0.0  ;;  %v404_v46 = vadd.f32 %v3772_v20, %v366_v41  ;;  %v3615_v52 = vld [vmem:[%s4747_s3 + $0x98] sm:$0xff]  }
  0x18   : > { %480 = vst [vmem:[#allocation2 + $0x120] sm:$0xff] %v3670_v2  ;;  %481 = vst [vmem:[#allocation2 + $0x128] sm:$0xff] %v3670_v2  ;;  %3054 = vmatprep.subr.bf16.mxu0 %v3599_v11  ;;  %3569 = vmatprep.subr.bf16.mxu1 %v3599_v11  ;;  %v405_v47 = vadd.f32 %v3772_v20, %v367_v42  ;;  %v412_v49 = vmax.f32 %v380_v44, 0.0  ;;  %v413_v50 = vmax.f32 %v381_v45, 0.0 }
  0x19   : > { %482 = vst [vmem:[#allocation2 + $0x130] sm:$0x3] %v3670_v2  ;;  %483 = vst [vmem:[#allocation2 + $0x138] sm:$0xff] %v3670_v2  ;;  %v639_v37 = vpack.c.bf16 %v435_v30, %v434_v29  ;;  %v436_v53 = vmax.f32 %v404_v46, 0.0  ;;  %v344_v1 = vmul.f32 %v2971_v55, %v3763_v15  ;;  %v368_v6 = vmul.f32 %v3019_v59, %v3763_v15  ;;  %v3624_v46 = vld [vmem:[%s4747_s3 + $0x110] sm:$0xff]  }
  0x1a   : > { %484 = vst [vmem:[#allocation2 + $0x140] sm:$0xff] %v3670_v2  ;;  %485 = vst [vmem:[#allocation2 + $0x148] sm:$0x3] %v3670_v2  ;;  %v437_v54 = vmax.f32 %v405_v47, 0.0  ;;  %v3811_v57 = vpack.c.bf16 %v413_v50, %v412_v49  ;;  %v369_v7 = vmul.f32 %v3020_v60, %v3763_v15  ;;  %v347_v33 = vmul.f32 %v2976_v22, %v3763_v15 }
  0x1b   : > { %486 = vst [vmem:[#allocation2 + $0x150] sm:$0xff] %v3670_v2  ;;  %487 = vst [vmem:[#allocation2 + $0x158] sm:$0xff] %v3670_v2  ;;  %3055 = vmatpush3.bf16.msra.mxu0 %v3600_v17  ;;  %3577 = vmatpush3.bf16.msra.mxu1 %v3600_v17  ;;  %v382_v10 = vadd.f32 %v3772_v20, %v344_v1  ;;  %v406_v12 = vadd.f32 %v3772_v20, %v368_v6  ;;  %v3611_v17 = vld [vmem:[%s4747_s3 + $0xd0] sm:$0xff]  }
  0x1c   : > { %488 = vst [vmem:[#allocation2 + $0x160] sm:$0x3] %v3670_v2  ;;  %489 = vst [vmem:[#allocation2 + $0x168] sm:$0xff] %v3670_v2  ;;  %3056 = vmatprep.subr.bf16.mxu0 %v3601_v21  ;;  %3570 = vmatprep.subr.bf16.mxu1 %v3601_v21  ;;  %v640_v0 = vpack.c.bf16 %v437_v54, %v436_v53  ;;  %v407_v13 = vadd.f32 %v3772_v20, %v369_v7  ;;  %v2975_v21 = vunpack.c.l.bf16 %v3030_v14  ;;  %v3629_v7 = vld [vmem:[%s4747_s3 + $0x158] sm:$0xff]   ;;  %v3033_v14 = vld [vmem:[%s3752_s20 + $0x28] sm:$0xff]  }
  0x1d   : > { %490 = vst [vmem:[#allocation2 + $0x170] sm:$0xff] %v3670_v2  ;;  %491 = vst [vmem:[#allocation2 + $0x178] sm:$0x3] %v3670_v2  ;;  %1956 = vmatprep.mubr.bf16.mxu1 %v639_v37  ;;  %v414_v18 = vmax.f32 %v382_v10, 0.0  ;;  %v438_v24 = vmax.f32 %v406_v12, 0.0  ;;  %v371_v38 = vmul.f32 %v3024_v27, %v3763_v15 }
  0x1e   : > { %492 = vst [vmem:[#allocation2 + $0x180] sm:$0xff] %v3670_v2  ;;  %493 = vst [vmem:[#allocation2 + $0x188] sm:$0xff] %v3670_v2  ;;  %v439_v25 = vmax.f32 %v407_v13, 0.0  ;;  %v346_v32 = vmul.f32 %v2975_v21, %v3763_v15  ;;  %v2988_v21 = vunpack.c.h.bf16 %v3033_v14 }
  0x1f   : > { %494 = vst [vmem:[#allocation2 + $0x190] sm:$0x3] %v3670_v2  ;;  %495 = vst [vmem:[#allocation2 + $0x198] sm:$0xff] %v3670_v2  ;;  %3057 = vmatpush3.bf16.msra.mxu0 %v3602_v26  ;;  %3578 = vmatpush3.bf16.msra.mxu1 %v3602_v26  ;;  %v3023_v26 = vunpack.c.l.bf16 %v3042_v16  ;;  %v409_v45 = vadd.f32 %v3772_v20, %v371_v38  ;;  %v3620_v16 = vld [vmem:[%s4747_s3 + $0xa8] sm:$0xff]  }
  0x20   : > { %496 = vst [vmem:[#allocation2 + $0x1a0] sm:$0xff] %v3670_v2  ;;  %497 = vst [vmem:[#allocation2 + $0x1a8] sm:$0x3] %v3670_v2  ;;  %3058 = vmatprep.subr.bf16.mxu0 %v3603_v28  ;;  %3571 = vmatprep.subr.bf16.mxu1 %v3603_v28  ;;  %v345_v2 = vmul.f32 %v2972_v56, %v3763_v15  ;;  %v641_v41 = vpack.c.bf16 %v439_v25, %v438_v24 }
  0x21   : > { %521 = vst [vmem:[#allocation2 + $0x121] sm:$0xff] %v434_v29  ;;  %522 = vst [vmem:[#allocation2 + $0x129] sm:$0xff] %v435_v30  ;;  %v3612_v30 = vld [vmem:[%s4747_s3 + $0x90] sm:$0xff]   ;;  %v370_v37 = vmul.f32 %v3023_v26, %v3763_v15  ;;  %v384_v42 = vadd.f32 %v3772_v20, %v346_v32 }
  0x22   : > { %499 = vst [vmem:[#allocation2 + $0x19] sm:$0xff] %v412_v49  ;;  %500 = vst [vmem:[#allocation2 + $0x21] sm:$0xff] %v413_v50  ;;  %v383_v11 = vadd.f32 %v3772_v20, %v345_v2  ;;  %v441_v50 = vmax.f32 %v409_v45, 0.0 }
  0x23   : > { %3059 = vmatpush3.bf16.msra.mxu0 %v3604_v36  ;;  %3579 = vmatpush3.bf16.msra.mxu1 %v3604_v36  ;;  %523 = vst [vmem:[#allocation2 + $0x139] sm:$0xff] %v436_v53  ;;  %524 = vst [vmem:[#allocation2 + $0x141] sm:$0xff] %v437_v54  ;;  %v408_v44 = vadd.f32 %v3772_v20, %v370_v37  ;;  %v416_v47 = vmax.f32 %v384_v42, 0.0  ;;  %v2979_v53 = vunpack.c.l.bf16 %v3031_v51  ;;  %v2980_v54 = vunpack.c.h.bf16 %v3031_v51  ;;  %v3625_v42 = vld [vmem:[%s4747_s3 + $0xf8] sm:$0xff]  }
  0x24   : > { %3156 = vmatprep.subr.bf16.mxu1 %v3605_v40  ;;  %3268 = vmatprep.subr.bf16.mxu0 %v3606_v43  ;;  %v415_v19 = vmax.f32 %v383_v11, 0.0  ;;  %501 = vst [vmem:[#allocation2 + $0x31] sm:$0xff] %v414_v18  ;;  %525 = vst [vmem:[#allocation2 + $0x151] sm:$0xff] %v438_v24  ;;  %v3613_v40 = vld [vmem:[%s4747_s3 + $0xd8] sm:$0xff]   ;;  %v385_v43 = vadd.f32 %v3772_v20, %v347_v33  ;;  %v3621_v24 = vld [vmem:[%s4747_s3 + $0xf0] sm:$0xff]  }
  0x25   : > { %526 = vst [vmem:[#allocation2 + $0x159] sm:$0xff] %v439_v25  ;;  %v440_v49 = vmax.f32 %v408_v44, 0.0  ;;  %503 = vst [vmem:[#allocation2 + $0x49] sm:$0xff] %v416_v47  ;;  %v349_v1 = vmul.f32 %v2980_v54, %v3763_v15 }
  0x26   : > { %1861 = vmatmul.mubr.bf16.vlgmr.msra.gmra.mrb[0].mxu0 %v3671_v3  ;;  %502 = vst [vmem:[#allocation2 + $0x39] sm:$0xff] %v415_v19  ;;  %v3848_v31 = vpack.c.bf16 %v415_v19, %v414_v18  ;;  %528 = vst [vmem:[#allocation2 + $0x171] sm:$0xff] %v441_v50  ;;  %v3619_v3 = vld [vmem:[%s4747_s3 + $0xe8] sm:$0xff]   ;;  %v2987_v19 = vunpack.c.l.bf16 %v3033_v14 }
  0x27   : > { %3269 = vmatpush3.bf16.msra.mxu0 %v3608_v48  ;;  %1868 = vmatprep.mubr.bf16.mxu0 %v3811_v57  ;;  %v417_v48 = vmax.f32 %v385_v43, 0.0  ;;  %527 = vst [vmem:[#allocation2 + $0x169] sm:$0xff] %v440_v49  ;;  %v387_v6 = vadd.f32 %v3772_v20, %v349_v1  ;;  %v3632_v14 = vld [vmem:[%s4747_s3 + $0x1c8] sm:$0xff]  }
  0x28   : > { %v555_v61 = vld [vmem:[#allocation2 + $0x120] sm:$0xff]  ;;  %v556_v62 = vld [vmem:[#allocation2 + $0x128] sm:$0xff]  ;;  %3270 = vmatprep.subr.bf16.mxu0 %v3614_v58 }
  0x29   : > { %v575_v4 = vpack.c.bf16 %v556_v62, %v555_v61  ;;  %v533_v28 = vld [vmem:[#allocation2 + $0x18] sm:$0xff]  ;;  %v534_v29 = vld [vmem:[#allocation2 + $0x20] sm:$0xff]  ;;  %504 = vst [vmem:[#allocation2 + $0x51] sm:$0xff] %v417_v48  ;;  %v419_v11 = vmax.f32 %v387_v6, 0.0 }
  0x2a   : > { %v3852_v34 = vpack.c.bf16 %v534_v29, %v533_v28  ;;  %v557_v35 = vld [vmem:[#allocation2 + $0x138] sm:$0xff]  ;;  %v558_v36 = vld [vmem:[#allocation2 + $0x140] sm:$0xff]  ;;  %v352_v28 = vmul.f32 %v2987_v19, %v3763_v15  ;;  %v353_v29 = vmul.f32 %v2988_v21, %v3763_v15 }
  0x2b   : > { %1957 = vmatmul.mubr.bf16.vlgmr.msra.gmra.mrb[0].mxu1 %v575_v4  ;;  %3271 = vmatpush3.bf16.msra.mxu0 %v3616_v9  ;;  %v576_v39 = vpack.c.bf16 %v558_v36, %v557_v35  ;;  %v535_v55 = vld [vmem:[#allocation2 + $0x30] sm:$0xff]  ;;  %v3617_v58 = vld [vmem:[%s4747_s3 + $0xe0] sm:$0xff]   ;;  %v642_v4 = vpack.c.bf16 %v441_v50, %v440_v49  ;;  %506 = vst [vmem:[#allocation2 + $0x69] sm:$0xff] %v419_v11 }
  0x2c   : > { %3157 = vmatpush3.bf16.msra.mxu1 %v3607_v63  ;;  %1964 = vmatprep.mubr.bf16.mxu1 %v640_v0  ;;  %v559_v60 = vld [vmem:[#allocation2 + $0x150] sm:$0xff]  ;;  %v560_v61 = vld [vmem:[#allocation2 + $0x158] sm:$0xff]  ;;  %v3618_v62 = vld [vmem:[%s4747_s3 + $0xa0] sm:$0xff]   ;;  %v3880_v63 = vpack.c.bf16 %v417_v48, %v416_v47  ;;  %v348_v0 = vmul.f32 %v2979_v53, %v3763_v15  ;;  %v3924_v37 = vadd.f32 %v3772_v20, %v352_v28 }
  0x2d   : > { %3158 = vmatprep.subr.bf16.mxu1 %v3609_v5  ;;  %3272 = vmatprep.subr.bf16.mxu0 %v3622_v23  ;;  %v536_v56 = vld [vmem:[#allocation2 + $0x38] sm:$0xff]  ;;  %v3884_v2 = vpack.c.bf16 %v560_v61, %v559_v60  ;;  %v3032_v9 = vld [vmem:[%s3752_s20 + $0x20] sm:$0xff]   ;;  %v3927_v38 = vadd.f32 %v3772_v20, %v353_v29  ;;  %v660_v49 = vld [vmem:[#allocation2 + $0xa] sm:$0xff] }
  0x2e   : > { %1869 = vmatmul.mubr.bf16.gmra.mrb[4].mxu0 %v3852_v34  ;;  %v3875_v59 = vpack.c.bf16 %v536_v56, %v535_v55  ;;  %v386_v5 = vadd.f32 %v3772_v20, %v348_v0  ;;  %v2983_v12 = vunpack.c.l.bf16 %v3032_v9  ;;  %v2984_v13 = vunpack.c.h.bf16 %v3032_v9  ;;  %v561_v22 = vld [vmem:[#allocation2 + $0x168] sm:$0xff]  ;;  %v562_v23 = vld [vmem:[#allocation2 + $0x170] sm:$0xff]  ;;  %v3626_v47 = vld [vmem:[%s4747_s3 + $0xb8] sm:$0xff]  }
  0x2f   : > { %1876 = vmatprep.mubr.bf16.mxu0 %v3848_v31  ;;  %3273 = vmatpush3.bf16.msra.mxu0 %v3624_v46  ;;  %v3920_v35 = vpack.c.bf16 %v562_v23, %v561_v22  ;;  %v422_v44 = vmax.f32 %v3924_v37, 0.0  ;;  %v423_v45 = vmax.f32 %v3927_v38, 0.0  ;;  %v3034_v46 = vld [vmem:[%s3752_s20 + $0x30] sm:$0xff]   ;;  %v659_v48 = vld [vmem:[#allocation2 + $0x2] sm:$0xff]  ;;  %v3035_v60 = vld [vmem:[%s3752_s20 + $0x38] sm:$0xff]  }
  0x30   : > { %3159 = vmatpush3.bf16.msra.mxu1 %v3610_v8  ;;  %v3630_v8 = vld [vmem:[%s4747_s3 + $0x118] sm:$0xff]   ;;  %v418_v10 = vmax.f32 %v386_v5, 0.0  ;;  %3274 = vmatprep.subr.bf16.mxu0 %v3629_v7  ;;  %v538_v18 = vld [vmem:[#allocation2 + $0x50] sm:$0xff]  ;;  %v350_v25 = vmul.f32 %v2983_v12, %v3763_v15  ;;  %v351_v27 = vmul.f32 %v2984_v13, %v3763_v15  ;;  %v2991_v50 = vunpack.c.l.bf16 %v3034_v46  ;;  %v3628_v6 = vld [vmem:[%s4747_s3 + $0x180] sm:$0xff]  }
  0x31   : > { %3160 = vmatprep.subr.bf16.mxu1 %v3611_v17  ;;  %v537_v17 = vld [vmem:[#allocation2 + $0x48] sm:$0xff]  ;;  %v2992_v51 = vunpack.c.h.bf16 %v3034_v46  ;;  %509 = vst [vmem:[#allocation2 + $0x91] sm:$0xff] %v422_v44  ;;  %510 = vst [vmem:[#allocation2 + $0x99] sm:$0xff] %v423_v45  ;;  %v2995_v0 = vunpack.c.l.bf16 %v3035_v60  ;;  %v691_v5 = vpack.c.bf16 %v660_v49, %v659_v48  ;;  %v3036_v9 = vld [vmem:[%s3752_s20 + $0x40] sm:$0xff]  }
  0x32   : > { %505 = vst [vmem:[#allocation2 + $0x61] sm:$0xff] %v418_v10  ;;  %v3909_v26 = vpack.c.bf16 %v538_v18, %v537_v17  ;;  %v3917_v32 = vpack.c.bf16 %v419_v11, %v418_v10  ;;  %v388_v33 = vadd.f32 %v3772_v20, %v350_v25  ;;  %v389_v36 = vadd.f32 %v3772_v20, %v351_v27  ;;  %v3639_v18 = vld [vmem:[%s4747_s3 + $0x170] sm:$0xff]   ;;  %v662_v25 = vld [vmem:[#allocation2 + $0x22] sm:$0xff]  ;;  %v3643_v38 = vld [vmem:[%s4747_s3 + $0x178] sm:$0xff]  }
  0x33   : > { %1965 = vmatmul.mubr.bf16.gmra.mrb[4].mxu1 %v576_v39  ;;  %3275 = vmatpush3.bf16.msra.mxu0 %v3630_v8  ;;  %v3633_v39 = vld [vmem:[%s4747_s3 + $0x120] sm:$0xff]   ;;  %v354_v55 = vmul.f32 %v2991_v50, %v3763_v15  ;;  %v355_v56 = vmul.f32 %v2992_v51, %v3763_v15  ;;  %v356_v7 = vmul.f32 %v2995_v0, %v3763_v15  ;;  %v2999_v12 = vunpack.c.l.bf16 %v3036_v9  ;;  %v3634_v29 = vld [vmem:[%s4747_s3 + $0x188] sm:$0xff]   ;;  %v3638_v46 = vld [vmem:[%s4747_s3 + $0x190] sm:$0xff]  }
  0x34   : > { %3161 = vmatpush3.bf16.msra.mxu1 %v3612_v30  ;;  %1972 = vmatprep.mubr.bf16.mxu1 %v641_v41  ;;  %v3631_v30 = vld [vmem:[%s4747_s3 + $0x160] sm:$0xff]   ;;  %v420_v41 = vmax.f32 %v388_v33, 0.0  ;;  %v421_v43 = vmax.f32 %v389_v36, 0.0  ;;  %v3000_v13 = vunpack.c.h.bf16 %v3036_v9  ;;  %v3640_v36 = vld [vmem:[%s4747_s3 + $0x130] sm:$0xff]   ;;  %v3641_v51 = vld [vmem:[%s4747_s3 + $0x1d8] sm:$0xff]  }
  0x35   : > { %3162 = vmatprep.subr.bf16.mxu1 %v3613_v40  ;;  %3276 = vmatprep.subr.bf16.mxu0 %v3631_v30  ;;  %v3623_v40 = vld [vmem:[%s4747_s3 + $0xb0] sm:$0xff]   ;;  %v358_v22 = vmul.f32 %v2999_v12, %v3763_v15  ;;  %v4091_v12 = vld [vmem:[%s4747_s3 + $0x200] sm:$0xff]  }
  0x36   : > { %1877 = vmatmul.mubr.bf16.gmra.mrb[8].mxu0 %v3875_v59  ;;  %507 = vst [vmem:[#allocation2 + $0x79] sm:$0xff] %v420_v41  ;;  %508 = vst [vmem:[#allocation2 + $0x81] sm:$0xff] %v421_v43  ;;  %v3966_v1 = vpack.c.bf16 %v421_v43, %v420_v41  ;;  %v359_v23 = vmul.f32 %v3000_v13, %v3763_v15  ;;  %v4031_v43 = vpack.c.bf16 %v423_v45, %v422_v44  ;;  %v663_v0 = vld [vmem:[#allocation2 + $0x32] sm:$0xff] }
  0x37   : > { %1884 = vmatprep.mubr.bf16.mxu0 %v3880_v63  ;;  %3277 = vmatpush3.bf16.msra.mxu0 %v3633_v39  ;;  %v4009_v30 = vadd.f32 %v3772_v20, %v358_v22  ;;  %v3037_v39 = vld [vmem:[%s3752_s20 + $0x48] sm:$0xff]  }
  0x38   : > { %3163 = vmatpush3.bf16.msra.mxu1 %v3615_v52  ;;  %v3635_v52 = vld [vmem:[%s4747_s3 + $0x168] sm:$0xff]   ;;  %v4012_v33 = vadd.f32 %v3772_v20, %v359_v23  ;;  %v3003_v41 = vunpack.c.l.bf16 %v3037_v39  ;;  %v666_v23 = vld [vmem:[#allocation2 + $0x52] sm:$0xff] }
  0x39   : > { %3164 = vmatprep.subr.bf16.mxu1 %v3617_v58  ;;  %v539_v53 = vld [vmem:[#allocation2 + $0x60] sm:$0xff]  ;;  %v540_v54 = vld [vmem:[#allocation2 + $0x68] sm:$0xff]  ;;  %3278 = vmatprep.subr.bf16.mxu0 %v3635_v52  ;;  %v3644_v52 = vld [vmem:[%s4747_s3 + $0x138] sm:$0xff]  }
  0x3a   : > { %v3636_v58 = vld [vmem:[%s4747_s3 + $0x128] sm:$0xff]   ;;  %v3961_v61 = vpack.c.bf16 %v540_v54, %v539_v53  ;;  %v429_v48 = vmax.f32 %v4012_v33, 0.0  ;;  %v360_v50 = vmul.f32 %v3003_v41, %v3763_v15  ;;  %v543_v53 = vld [vmem:[#allocation2 + $0x90] sm:$0xff]  ;;  %v544_v54 = vld [vmem:[#allocation2 + $0x98] sm:$0xff] }
  0x3b   : > { %1973 = vmatmul.mubr.bf16.gmra.mrb[8].mxu1 %v3884_v2  ;;  %3279 = vmatpush3.bf16.msra.mxu0 %v3636_v58  ;;  %v665_v22 = vld [vmem:[#allocation2 + $0x4a] sm:$0xff] }
  0x3c   : > { %3165 = vmatpush3.bf16.msra.mxu1 %v3618_v62  ;;  %1980 = vmatprep.mubr.bf16.mxu1 %v642_v4  ;;  %v3627_v62 = vld [vmem:[%s4747_s3 + $0x1c0] sm:$0xff]   ;;  %v3972_v4 = vadd.f32 %v3772_v20, %v355_v56  ;;  %516 = vst [vmem:[#allocation2 + $0xe1] sm:$0xff] %v429_v48  ;;  %v4051_v44 = vadd.f32 %v3772_v20, %v360_v50 }
  0x3d   : > { %3166 = vmatprep.subr.bf16.mxu1 %v3619_v3  ;;  %v3969_v3 = vadd.f32 %v3772_v20, %v354_v55  ;;  %v541_v19 = vld [vmem:[#allocation2 + $0x78] sm:$0xff]  ;;  %v542_v21 = vld [vmem:[#allocation2 + $0x80] sm:$0xff]  ;;  %3280 = vmatprep.subr.bf16.mxu0 %v3639_v18  ;;  %v3038_v55 = vld [vmem:[%s3752_s20 + $0x50] sm:$0xff]  }
  0x3e   : > { %1885 = vmatmul.mubr.bf16.gmra.mrb[12].mxu0 %v3909_v26  ;;  %v425_v11 = vmax.f32 %v3972_v4, 0.0  ;;  %v430_v56 = vmax.f32 %v4051_v44, 0.0  ;;  %v672_v44 = vld [vmem:[#allocation2 + $0x9a] sm:$0xff] }
  0x3f   : > { %1892 = vmatprep.mubr.bf16.mxu0 %v3917_v32  ;;  %v424_v10 = vmax.f32 %v3969_v3, 0.0  ;;  %3281 = vmatpush3.bf16.msra.mxu0 %v3640_v36  ;;  %v3647_v3 = vld [vmem:[%s4747_s3 + $0x1a0] sm:$0xff]   ;;  %v4129_v36 = vpack.c.bf16 %v666_v23, %v665_v22  ;;  %v3649_v23 = vld [vmem:[%s4747_s3 + $0x208] sm:$0xff]  }
  0x40   : > { %3167 = vmatpush3.bf16.msra.mxu1 %v3620_v16  ;;  %v3987_v16 = vadd.f32 %v3772_v20, %v356_v7  ;;  %512 = vst [vmem:[#allocation2 + $0xb1] sm:$0xff] %v425_v11  ;;  %3282 = vmatprep.subr.bf16.mxu0 %v3643_v38  ;;  %517 = vst [vmem:[#allocation2 + $0xf1] sm:$0xff] %v430_v56  ;;  %v3043_v38 = vld [vmem:[%s3752_s20 + $0x78] sm:$0xff]  }
  0x41   : > { %3168 = vmatprep.subr.bf16.mxu1 %v3621_v24  ;;  %511 = vst [vmem:[#allocation2 + $0xa9] sm:$0xff] %v424_v10  ;;  %v661_v24 = vld [vmem:[#allocation2 + $0x1a] sm:$0xff]  ;;  %v4086_v9 = vpack.c.bf16 %v425_v11, %v424_v10  ;;  %v3648_v11 = vld [vmem:[%s4747_s3 + $0x1e8] sm:$0xff]  }
  0x42   : > { %v426_v27 = vmax.f32 %v3987_v16, 0.0  ;;  %v4038_v49 = vpack.c.bf16 %v662_v25, %v661_v24  ;;  %v3650_v25 = vld [vmem:[%s4747_s3 + $0x1a8] sm:$0xff]   ;;  %v3653_v16 = vld [vmem:[%s4747_s3 + $0x1b0] sm:$0xff]  }
  0x43   : > { %1981 = vmatmul.mubr.bf16.gmra.mrb[12].mxu1 %v3920_v35  ;;  %3283 = vmatpush3.bf16.msra.mxu0 %v3644_v52 }
  0x44   : > { %3169 = vmatpush3.bf16.msra.mxu1 %v3623_v40  ;;  %2021 = vmatprep.mubr.bf16.mxu1 %v3852_v34  ;;  %v2996_v34 = vunpack.c.h.bf16 %v3035_v60  ;;  %v4018_v40 = vpack.c.bf16 %v542_v21, %v541_v19  ;;  %513 = vst [vmem:[#allocation2 + $0xc1] sm:$0xff] %v426_v27  ;;  %v3007_v60 = vunpack.c.l.bf16 %v3038_v55 }
  0x45   : > { %3170 = vmatprep.subr.bf16.mxu1 %v3625_v42  ;;  %v3004_v42 = vunpack.c.h.bf16 %v3037_v39  ;;  %3516 = vmatprep.subr.bf16.mxu0 %v4091_v12  ;;  %v3651_v39 = vld [vmem:[%s4747_s3 + $0x1f0] sm:$0xff]  }
  0x46   : > { %v357_v8 = vmul.f32 %v2996_v34, %v3763_v15  ;;  %1893 = vmatmul.mubr.bf16.gmra.mrb[16].mxu0 %v3961_v61  ;;  %v664_v34 = vld [vmem:[#allocation2 + $0x3a] sm:$0xff]  ;;  %v362_v7 = vmul.f32 %v3007_v60, %v3763_v15 }
  0x47   : > { %1900 = vmatprep.mubr.bf16.mxu0 %v3966_v1  ;;  %v361_v37 = vmul.f32 %v3004_v42, %v3763_v15  ;;  %v4093_v13 = vpack.c.bf16 %v664_v34, %v663_v0 }
  0x48   : > { %3171 = vmatpush3.bf16.msra.mxu1 %v3626_v47  ;;  %v3990_v17 = vadd.f32 %v3772_v20, %v357_v8  ;;  %v428_v47 = vmax.f32 %v4009_v30, 0.0  ;;  %v3645_v8 = vld [vmem:[%s4747_s3 + $0x1e0] sm:$0xff]   ;;  %v545_v19 = vld [vmem:[#allocation2 + $0xa8] sm:$0xff]  ;;  %v546_v21 = vld [vmem:[#allocation2 + $0xb0] sm:$0xff]  ;;  %v3028_v30 = vunpack.c.h.bf16 %v3043_v38 }
  0x49   : > { %3380 = vmatprep.subr.bf16.mxu1 %v3627_v62  ;;  %v4054_v45 = vadd.f32 %v3772_v20, %v361_v37  ;;  %v3008_v62 = vunpack.c.h.bf16 %v3038_v55  ;;  %v4118_v24 = vpack.c.bf16 %v546_v21, %v545_v19  ;;  %v3656_v37 = vld [vmem:[%s4747_s3 + $0x1b8] sm:$0xff]   ;;  %v673_v21 = vld [vmem:[#allocation2 + $0xaa] sm:$0xff] }
  0x4a   : > { %v427_v28 = vmax.f32 %v3990_v17, 0.0  ;;  %515 = vst [vmem:[#allocation2 + $0xd9] sm:$0xff] %v428_v47  ;;  %v667_v17 = vld [vmem:[#allocation2 + $0x62] sm:$0xff]  ;;  %v4147_v42 = vpack.c.bf16 %v429_v48, %v428_v47  ;;  %v373_v52 = vmul.f32 %v3028_v30, %v3763_v15 }
  0x4b   : > { %2022 = vmatmul.mubr.bf16.vlgmr.msra.gmra.mrb[16].mxu1 %v691_v5  ;;  %v431_v58 = vmax.f32 %v4054_v45, 0.0  ;;  %v3642_v5 = vld [vmem:[%s4747_s3 + $0x198] sm:$0xff]   ;;  %v748_v30 = vld [vmem:[#allocation2 + $0x140] sm:$0xff] }
  0x4c   : > { %3381 = vmatpush3.bf16.msra.mxu1 %v3628_v6  ;;  %2029 = vmatprep.mubr.bf16.mxu1 %v3875_v59  ;;  %514 = vst [vmem:[#allocation2 + $0xc9] sm:$0xff] %v427_v28  ;;  %v3637_v59 = vld [vmem:[%s4747_s3 + $0x1d0] sm:$0xff]   ;;  %v4071_v6 = vpack.c.bf16 %v544_v54, %v543_v53  ;;  %v669_v53 = vld [vmem:[#allocation2 + $0x7a] sm:$0xff]  ;;  %v670_v54 = vld [vmem:[#allocation2 + $0x82] sm:$0xff] }
  0x4d   : > { %3382 = vmatprep.subr.bf16.mxu1 %v3632_v14  ;;  %518 = vst [vmem:[#allocation2 + $0xf9] sm:$0xff] %v431_v58  ;;  %v4096_v14 = vadd.f32 %v3772_v20, %v362_v7  ;;  %v4172_v0 = vpack.c.bf16 %v431_v58, %v430_v56  ;;  %v4174_v34 = vpack.c.bf16 %v670_v54, %v669_v53  ;;  %v551_v7 = vld [vmem:[#allocation2 + $0xf0] sm:$0xff]  ;;  %v685_v54 = vld [vmem:[#allocation2 + $0x13a] sm:$0xff] }
  0x4e   : > { %1901 = vmatmul.mubr.bf16.gmra.mrb[20].mxu0 %v4018_v40 }
  0x4f   : > { %1908 = vmatprep.mubr.bf16.mxu0 %v4031_v43  ;;  %v432_v4 = vmax.f32 %v4096_v14, 0.0 }
  0x50   : > { %3383 = vmatpush3.bf16.msra.mxu1 %v3634_v29  ;;  %v4127_v29 = vpack.c.bf16 %v427_v28, %v426_v27  ;;  %v668_v27 = vld [vmem:[#allocation2 + $0x6a] sm:$0xff] }
  0x51   : > { %3384 = vmatprep.subr.bf16.mxu1 %v3637_v59  ;;  %519 = vst [vmem:[#allocation2 + $0x109] sm:$0xff] %v432_v4  ;;  %v547_v59 = vld [vmem:[#allocation2 + $0xc0] sm:$0xff]  ;;  %v4152_v50 = vpack.c.bf16 %v668_v27, %v667_v17  ;;  %v549_v33 = vld [vmem:[#allocation2 + $0xd8] sm:$0xff]  ;;  %v746_v17 = vld [vmem:[#allocation2 + $0x128] sm:$0xff] }
  0x52   : > { %v550_v47 = vld [vmem:[#allocation2 + $0xe0] sm:$0xff] }
  0x53   : > { %2030 = vmatmul.mubr.bf16.gmra.mrb[20].mxu1 %v4038_v49  ;;  %v548_v41 = vld [vmem:[#allocation2 + $0xc8] sm:$0xff]  ;;  %v4164_v55 = vpack.c.bf16 %v550_v47, %v549_v33 }
  0x54   : > { %2037 = vmatprep.mubr.bf16.mxu1 %v3909_v26  ;;  %3385 = vmatpush3.bf16.msra.mxu1 %v3638_v46  ;;  %v363_v26 = vmul.f32 %v3008_v62, %v3763_v15  ;;  %v4141_v28 = vpack.c.bf16 %v548_v41, %v547_v59  ;;  %v3654_v46 = vld [vmem:[%s4747_s3 + $0x1f8] sm:$0xff]   ;;  %v411_v62 = vadd.f32 %v3772_v20, %v373_v52  ;;  %v684_v52 = vld [vmem:[#allocation2 + $0x12a] sm:$0xff] }
  0x55   : > { %3386 = vmatprep.subr.bf16.mxu1 %v3641_v51  ;;  %v3027_v51 = vunpack.c.l.bf16 %v3043_v38  ;;  %v680_v41 = vld [vmem:[#allocation2 + $0xfa] sm:$0xff] }
  0x56   : > { %v4099_v18 = vadd.f32 %v3772_v20, %v363_v26  ;;  %1909 = vmatmul.mubr.bf16.gmra.mrb[24].mxu0 %v4071_v6  ;;  %v552_v26 = vld [vmem:[#allocation2 + $0xf8] sm:$0xff] }
  0x57   : > { %1916 = vmatprep.mubr.bf16.mxu0 %v4086_v9  ;;  %v372_v48 = vmul.f32 %v3027_v51, %v3763_v15  ;;  %v443_v15 = vmax.f32 %v411_v62, 0.0  ;;  %v4180_v45 = vpack.c.bf16 %v552_v26, %v551_v7  ;;  %v747_v51 = vld [vmem:[#allocation2 + $0x138] sm:$0xff] }
  0x58   : > { %3387 = vmatpush3.bf16.msra.mxu1 %v3642_v5  ;;  %v433_v10 = vmax.f32 %v4099_v18, 0.0  ;;  %v4248_v47 = vpack.c.bf16 %v748_v30, %v747_v51 }
  0x59   : > { %3388 = vmatprep.subr.bf16.mxu1 %v3645_v8  ;;  %v410_v60 = vadd.f32 %v3772_v20, %v372_v48  ;;  %530 = vst [vmem:[#allocation2 + $0x189] sm:$0xff] %v443_v15  ;;  %v671_v20 = vld [vmem:[#allocation2 + $0x92] sm:$0xff]  ;;  %v553_v8 = vld [vmem:[#allocation2 + $0x108] sm:$0xff] }
  0x5a   : > { %520 = vst [vmem:[#allocation2 + $0x111] sm:$0xff] %v433_v10  ;;  %v4186_v56 = vpack.c.bf16 %v433_v10, %v432_v4  ;;  %v4188_v58 = vpack.c.bf16 %v672_v44, %v671_v20  ;;  %v675_v4 = vld [vmem:[#allocation2 + $0xc2] sm:$0xff]  ;;  %v676_v10 = vld [vmem:[#allocation2 + $0xca] sm:$0xff] }
  0x5b   : > { %2038 = vmatmul.mubr.bf16.gmra.mrb[24].mxu1 %v4093_v13  ;;  %v442_v5 = vmax.f32 %v410_v60, 0.0  ;;  %v4204_v22 = vpack.c.bf16 %v676_v10, %v675_v4  ;;  %v683_v48 = vld [vmem:[#allocation2 + $0x122] sm:$0xff]  ;;  %v916_v4 = vld [vmem:[#allocation2 + $0x30] sm:$0xff]  ;;  %v917_v10 = vld [vmem:[#allocation2 + $0x38] sm:$0xff] }
  0x5c   : > { %2045 = vmatprep.mubr.bf16.mxu1 %v3961_v61  ;;  %3389 = vmatpush3.bf16.msra.mxu1 %v3647_v3  ;;  %v674_v3 = vld [vmem:[#allocation2 + $0xb2] sm:$0xff]  ;;  %v4254_v53 = vpack.c.bf16 %v684_v52, %v683_v48  ;;  %v686_v60 = vld [vmem:[#allocation2 + $0x142] sm:$0xff] }
  0x5d   : > { %3390 = vmatprep.subr.bf16.mxu1 %v3648_v11  ;;  %529 = vst [vmem:[#allocation2 + $0x181] sm:$0xff] %v442_v5  ;;  %v4196_v14 = vpack.c.bf16 %v674_v3, %v673_v21  ;;  %v4199_v18 = vpack.c.bf16 %v443_v15, %v442_v5  ;;  %v4260_v62 = vpack.c.bf16 %v686_v60, %v685_v54  ;;  %v687_v5 = vld [vmem:[#allocation2 + $0x152] sm:$0xff]  ;;  %v688_v15 = vld [vmem:[#allocation2 + $0x15a] sm:$0xff] }
  0x5e   : > { %1917 = vmatmul.mubr.bf16.gmra.mrb[28].mxu0 %v4118_v24  ;;  %v4266_v20 = vpack.c.bf16 %v688_v15, %v687_v5 }
  0x5f   : > { %1924 = vmatprep.mubr.bf16.mxu0 %v4127_v29 }
  0x60   : > { %3391 = vmatpush3.bf16.msra.mxu1 %v3650_v25  ;;  %v677_v25 = vld [vmem:[#allocation2 + $0xda] sm:$0xff]  ;;  %v882_v51 = vld [vmem:[#allocation2 + $0x18a] sm:$0xff] }
  0x61   : > { %3392 = vmatprep.subr.bf16.mxu1 %v3651_v39  ;;  %v554_v19 = vld [vmem:[#allocation2 + $0x110] sm:$0xff]  ;;  %v678_v39 = vld [vmem:[#allocation2 + $0xe2] sm:$0xff] }
  0x62   : > { %v4194_v11 = vpack.c.bf16 %v554_v19, %v553_v8  ;;  %v4217_v59 = vpack.c.bf16 %v678_v39, %v677_v25  ;;  %v682_v38 = vld [vmem:[#allocation2 + $0x112] sm:$0xff]  ;;  %v948_v25 = vpack.c.bf16 %v917_v10, %v916_v4 }
  0x63   : > { %2046 = vmatmul.mubr.bf16.gmra.mrb[28].mxu1 %v4129_v36  ;;  %v690_v8 = vld [vmem:[#allocation2 + $0x172] sm:$0xff] }
  0x64   : > { %2053 = vmatprep.mubr.bf16.mxu1 %v4018_v40  ;;  %3393 = vmatpush3.bf16.msra.mxu1 %v3653_v16  ;;  %v745_v16 = vld [vmem:[#allocation2 + $0x120] sm:$0xff]  ;;  %v754_v26 = vld [vmem:[#allocation2 + $0x188] sm:$0xff]  ;;  %v980_v19 = vld [vmem:[#allocation2 + $0x31] sm:$0xff] }
  0x65   : > { %3394 = vmatprep.subr.bf16.mxu1 %v3654_v46  ;;  %v3659_v46 = vld [vmem:[%s4747_s3 + $0x230] sm:$0xff]   ;;  %v753_v7 = vld [vmem:[#allocation2 + $0x180] sm:$0xff] }
  0x66   : > { %1925 = vmatmul.mubr.bf16.gmra.mrb[32].mxu0 %v4141_v28  ;;  %v4268_v44 = vpack.c.bf16 %v754_v26, %v753_v7 }
  0x67   : > { %1932 = vmatprep.mubr.bf16.mxu0 %v4147_v42 }
  0x68   : > { %3395 = vmatpush3.bf16.msra.mxu1 %v3656_v37  ;;  %v681_v37 = vld [vmem:[#allocation2 + $0x10a] sm:$0xff] }
  0x69   : > { %v4243_v33 = vpack.c.bf16 %v682_v38, %v681_v37  ;;  %v881_v38 = vld [vmem:[#allocation2 + $0x182] sm:$0xff] }
  0x6b   : > { %2054 = vmatmul.mubr.bf16.gmra.mrb[32].mxu1 %v4152_v50 }
  0x6c   : > { %2061 = vmatprep.mubr.bf16.mxu1 %v4071_v6 }
  0x6e   : > { %1933 = vmatmul.mubr.bf16.gmra.mrb[36].mxu0 %v4164_v55 }
  0x6f   : > { %1940 = vmatprep.mubr.bf16.mxu0 %v4172_v0 }
  0x73   : > { %2062 = vmatmul.mubr.bf16.gmra.mrb[36].mxu1 %v4174_v34 }
  0x74   : > { %2069 = vmatprep.mubr.bf16.mxu1 %v4118_v24 }
  0x76   : > { %1941 = vmatmul.mubr.bf16.gmra.mrb[40].mxu0 %v4180_v45 }
  0x77   : > { %1948 = vmatprep.mubr.bf16.mxu0 %v4186_v56 }
  0x7b   : > { %2070 = vmatmul.mubr.bf16.gmra.mrb[40].mxu1 %v4188_v58 }
  0x7c   : > { %2077 = vmatprep.mubr.bf16.mxu1 %v4141_v28 }
  0x7e   : > { %1949 = vmatmul.mubr.bf16.gmra.mrb[44].mxu0 %v4194_v11 }
  0x7f   : > { %2182 = vmatprep.mubr.bf16.mxu0 %v4038_v49  ;;  %v3652_v49 = vld [vmem:[%s4747_s3 + $0x210] sm:$0xff]  }
  0x83   : > { %2078 = vmatmul.mubr.bf16.gmra.mrb[44].mxu1 %v4196_v14 }
  0x84   : > { %2085 = vmatprep.mubr.bf16.mxu1 %v4164_v55 }
  0x86   : > { %2183 = vmatmul.mubr.bf16.vlgmr.msra.gmra.mrb[48].mxu0 %v3811_v57  ;;  %v3655_v57 = vld [vmem:[%s4747_s3 + $0x218] sm:$0xff]  }
  0x87   : > { %3517 = vmatpush3.bf16.msra.mxu0 %v4091_v12  ;;  %2190 = vmatprep.mubr.bf16.mxu0 %v4093_v13  ;;  %v3657_v12 = vld [vmem:[%s4747_s3 + $0x220] sm:$0xff]   ;;  %v679_v13 = vld [vmem:[#allocation2 + $0xf2] sm:$0xff] }
  0x88   : > { %3518 = vmatprep.subr.bf16.mxu0 %v3649_v23  ;;  %v4229_v27 = vpack.c.bf16 %v680_v41, %v679_v13  ;;  %v809_v41 = vld [vmem:[#allocation2 + $0x121] sm:$0xff] }
  0x8b   : > { %2086 = vmatmul.mubr.bf16.gmra.mrb[48].mxu1 %v4204_v22  ;;  %3519 = vmatpush3.bf16.msra.mxu0 %v3649_v23  ;;  %v982_v23 = vld [vmem:[#allocation2 + $0x49] sm:$0xff] }
  0x8c   : > { %2093 = vmatprep.mubr.bf16.mxu1 %v4180_v45  ;;  %3520 = vmatprep.subr.bf16.mxu0 %v3652_v49 }
  0x8e   : > { %2191 = vmatmul.mubr.bf16.gmra.mrb[52].mxu0 %v3848_v31  ;;  %v3658_v31 = vld [vmem:[%s4747_s3 + $0x228] sm:$0xff]  }
  0x8f   : > { %2198 = vmatprep.mubr.bf16.mxu0 %v4129_v36  ;;  %3521 = vmatpush3.bf16.msra.mxu0 %v3652_v49  ;;  %v4234_v36 = vpack.c.bf16 %v746_v17, %v745_v16  ;;  %v983_v49 = vld [vmem:[#allocation2 + $0x51] sm:$0xff]  ;;  %v810_v16 = vld [vmem:[#allocation2 + $0x129] sm:$0xff] }
  0x90   : > { %3522 = vmatprep.subr.bf16.mxu0 %v3655_v57  ;;  %v1013_v39 = vpack.c.bf16 %v983_v49, %v982_v23  ;;  %v4288_v17 = vpack.c.bf16 %v810_v16, %v809_v41 }
  0x93   : > { %2094 = vmatmul.mubr.bf16.gmra.mrb[52].mxu1 %v4217_v59  ;;  %3523 = vmatpush3.bf16.msra.mxu0 %v3655_v57  ;;  %v918_v57 = vld [vmem:[#allocation2 + $0x48] sm:$0xff] }
  0x94   : > { %2101 = vmatprep.mubr.bf16.mxu1 %v4194_v11  ;;  %3524 = vmatprep.subr.bf16.mxu0 %v3657_v12 }
  0x96   : > { %2199 = vmatmul.mubr.bf16.gmra.mrb[56].mxu0 %v3880_v63  ;;  %v3660_v63 = vld [vmem:[%s4747_s3 + $0x238] sm:$0xff]  }
  0x97   : > { %2206 = vmatprep.mubr.bf16.mxu0 %v4152_v50  ;;  %3525 = vmatpush3.bf16.msra.mxu0 %v3657_v12  ;;  %v919_v12 = vld [vmem:[#allocation2 + $0x50] sm:$0xff] }
  0x98   : > { %3526 = vmatprep.subr.bf16.mxu0 %v3658_v31  ;;  %v949_v13 = vpack.c.bf16 %v919_v12, %v918_v57 }
  0x9b   : > { %2102 = vmatmul.mubr.bf16.gmra.mrb[56].mxu1 %v4229_v27  ;;  %3527 = vmatpush3.bf16.msra.mxu0 %v3658_v31  ;;  %v811_v31 = vld [vmem:[#allocation2 + $0x139] sm:$0xff] }
  0x9c   : > { %2109 = vmatprep.mubr.bf16.mxu1 %v4234_v36  ;;  %3528 = vmatprep.subr.bf16.mxu0 %v3659_v46 }
  0x9e   : > { %2207 = vmatmul.mubr.bf16.gmra.mrb[60].mxu0 %v3917_v32 }
  0x9f   : > { %2214 = vmatprep.mubr.bf16.mxu0 %v4174_v34  ;;  %3529 = vmatpush3.bf16.msra.mxu0 %v3659_v46  ;;  %v812_v46 = vld [vmem:[#allocation2 + $0x141] sm:$0xff] }
  0xa0   : > { %3530 = vmatprep.subr.bf16.mxu0 %v3660_v63 }
  0xa3   : > { %2110 = vmatmul.mubr.bf16.gmra.mrb[60].mxu1 %v4243_v33  ;;  %3531 = vmatpush3.bf16.msra.mxu0 %v3660_v63  ;;  %v4308_v63 = vpack.c.bf16 %v882_v51, %v881_v38 }
  0xa4   : > { %2117 = vmatprep.mubr.bf16.mxu1 %v4248_v47 }
  0xa6   : > { %2215 = vmatmul.mubr.bf16.gmra.mrb[64].mxu0 %v3966_v1 }
  0xa7   : > { %2222 = vmatprep.mubr.bf16.mxu0 %v4188_v58 }
  0xab   : > { %2118 = vmatmul.mubr.bf16.gmra.mrb[64].mxu1 %v4254_v53 }
  0xac   : > { %2125 = vmatprep.mubr.bf16.mxu1 %v3884_v2  ;;  %v689_v2 = vld [vmem:[#allocation2 + $0x16a] sm:$0xff] }
  0xad   : > { %v4274_v21 = vpack.c.bf16 %v690_v8, %v689_v2 }
  0xae   : > { %2223 = vmatmul.mubr.bf16.gmra.mrb[68].mxu0 %v4031_v43 }
  0xaf   : > { %2230 = vmatprep.mubr.bf16.mxu0 %v4196_v14 }
  0xb3   : > { %2126 = vmatmul.mubr.bf16.gmra.mrb[68].mxu1 %v4260_v62 }
  0xb4   : > { %2133 = vmatprep.mubr.bf16.mxu1 %v3920_v35  ;;  %v981_v35 = vld [vmem:[#allocation2 + $0x39] sm:$0xff] }
  0xb5   : > { %v1012_v3 = vpack.c.bf16 %v981_v35, %v980_v19  ;;  %v1047_v19 = vld [vmem:[#allocation2 + $0x52] sm:$0xff] }
  0xb6   : > { %2231 = vmatmul.mubr.bf16.gmra.mrb[72].mxu0 %v4086_v9 }
  0xb7   : > { %2238 = vmatprep.mubr.bf16.mxu0 %v4204_v22 }
  0xbb   : > { %2134 = vmatmul.mubr.bf16.gmra.mrb[72].mxu1 %v4266_v20 }
  0xbc   : > { %2141 = vmatprep.mubr.bf16.mxu1 %v4268_v44 }
  0xbe   : > { %2239 = vmatmul.mubr.bf16.gmra.mrb[76].mxu0 %v4127_v29 }
  0xbf   : > { %2246 = vmatprep.mubr.bf16.mxu0 %v4217_v59 }
  0xc3   : > { %2142 = vmatmul.mubr.bf16.gmra.mrb[76].mxu1 %v4274_v21 }
  0xc4   : > { %2343 = vmatprep.mubr.bf16.mxu1 %v1012_v3 }
  0xc6   : > { %2247 = vmatmul.mubr.bf16.gmra.mrb[80].mxu0 %v4147_v42 }
  0xc7   : > { %2254 = vmatprep.mubr.bf16.mxu0 %v4229_v27 }
  0xcb   : > { %2344 = vmatmul.mubr.bf16.vlgmr.msra.gmra.mrb[80].mxu1 %v948_v25 }
  0xcc   : > { %2351 = vmatprep.mubr.bf16.mxu1 %v1013_v39 }
  0xce   : > { %2255 = vmatmul.mubr.bf16.gmra.mrb[84].mxu0 %v4172_v0 }
  0xcf   : > { %2262 = vmatprep.mubr.bf16.mxu0 %v4243_v33 }
  0xd3   : > { %2352 = vmatmul.mubr.bf16.gmra.mrb[84].mxu1 %v949_v13 }
  0xd4   : > { %2359 = vmatprep.mubr.bf16.mxu1 %v3917_v32  ;;  %v4294_v32 = vpack.c.bf16 %v812_v46, %v811_v31 }
  0xd6   : > { %2263 = vmatmul.mubr.bf16.gmra.mrb[88].mxu0 %v4186_v56 }
  0xd7   : > { %2270 = vmatprep.mubr.bf16.mxu0 %v4254_v53 }
  0xdb   : > { %2360 = vmatmul.mubr.bf16.gmra.mrb[88].mxu1 %v3961_v61  ;;  %v813_v61 = vld [vmem:[#allocation2 + $0x151] sm:$0xff] }
  0xdc   : > { %2367 = vmatprep.mubr.bf16.mxu1 %v3966_v1  ;;  %v814_v1 = vld [vmem:[#allocation2 + $0x159] sm:$0xff] }
  0xdd   : > { %v4300_v37 = vpack.c.bf16 %v814_v1, %v813_v61 }
  0xde   : > { %2271 = vmatmul.mubr.bf16.gmra.mrb[92].mxu0 %v4288_v17 }
  0xdf   : > { %2278 = vmatprep.mubr.bf16.mxu0 %v4260_v62 }
  0xe3   : > { %2368 = vmatmul.mubr.bf16.gmra.mrb[92].mxu1 %v4018_v40  ;;  %v815_v40 = vld [vmem:[#allocation2 + $0x169] sm:$0xff] }
  0xe4   : > { %2375 = vmatprep.mubr.bf16.mxu1 %v4031_v43  ;;  %v816_v43 = vld [vmem:[#allocation2 + $0x171] sm:$0xff] }
  0xe5   : > { %v4306_v30 = vpack.c.bf16 %v816_v43, %v815_v40 }
  0xe6   : > { %2279 = vmatmul.mubr.bf16.gmra.mrb[96].mxu0 %v4294_v32 }
  0xe7   : > { %2286 = vmatprep.mubr.bf16.mxu0 %v4266_v20 }
  0xeb   : > { %2376 = vmatmul.mubr.bf16.gmra.mrb[96].mxu1 %v4071_v6  ;;  %v1044_v6 = vld [vmem:[#allocation2 + $0x32] sm:$0xff] }
  0xec   : > { %2383 = vmatprep.mubr.bf16.mxu1 %v4086_v9  ;;  %v1045_v9 = vld [vmem:[#allocation2 + $0x3a] sm:$0xff] }
  0xed   : > { %v1076_v60 = vpack.c.bf16 %v1045_v9, %v1044_v6 }
  0xee   : > { %2287 = vmatmul.mubr.bf16.gmra.mrb[100].mxu0 %v4300_v37 }
  0xef   : > { %2294 = vmatprep.mubr.bf16.mxu0 %v4274_v21 }
  0xf3   : > { %2384 = vmatmul.mubr.bf16.gmra.mrb[100].mxu1 %v4118_v24 }
  0xf4   : > { %2391 = vmatprep.mubr.bf16.mxu1 %v4127_v29 }
  0xf6   : > { %2295 = vmatmul.mubr.bf16.gmra.mrb[104].mxu0 %v4306_v30 }
  0xf7   : > { %2302 = vmatprep.mubr.bf16.mxu0 %v4308_v63 }
  0xf9   : > { %v3060_v48 = vpop.f32.mrb[0].mxu0 }
  0xfa   : > { %v3061_v24 = vpop.f32.mrb[1].mxu0 }
  0xfb   : > { %2392 = vmatmul.mubr.bf16.gmra.mrb[104].mxu1 %v4141_v28  ;;  %v4314_v54 = vadd.f32 %v3061_v24, %v3060_v48  ;;  %v3063_v29 = vpop.f32.mrb[2].mxu0 }
  0xfc   : > { %2399 = vmatprep.mubr.bf16.mxu1 %v4147_v42  ;;  %v3064_v15 = vpop.f32.mrb[3].mxu0  ;;  %v1046_v42 = vld [vmem:[#allocation2 + $0x4a] sm:$0xff] }
  0xfd   : > { %v4318_v2 = vadd.f32 %v3064_v15, %v3063_v29  ;;  %v1077_v4 = vpack.c.bf16 %v1047_v19, %v1046_v42 }
  0xfe   : > { %v3132_v52 = vpop.f32.mrb[0].mxu1  ;;  %2303 = vmatmul.mubr.bf16.gmra.mrb[108].mxu0 %v4199_v18 }
  0xff   : > { %v3133_v5 = vpop.f32.mrb[1].mxu1  ;;  %3532 = vmatprep.mubr.bf16.mxu0 %v1076_v60 }
 0x100   : > { %v4316_v7 = vadd.f32 %v3133_v5, %v3132_v52  ;;  %v3135_v26 = vpop.f32.mrb[2].mxu1 }
 0x101   : > { %v3136_v8 = vpop.f32.mrb[3].mxu1  ;;  %v3066_v35 = vpop.f32.mrb[4].mxu0 }
 0x102   : > { %v4321_v28 = vadd.f32 %v3136_v8, %v3135_v26  ;;  %v3067_v3 = vpop.f32.mrb[5].mxu0 }
 0x103   : > { %2400 = vmatmul.mubr.bf16.gmra.mrb[108].mxu1 %v4164_v55  ;;  %v4325_v23 = vadd.f32 %v3067_v3, %v3066_v35  ;;  %v3069_v49 = vpop.f32.mrb[6].mxu0 }
 0x104   : > { %2407 = vmatprep.mubr.bf16.mxu1 %v4172_v0  ;;  %v3070_v39 = vpop.f32.mrb[7].mxu0 }
 0x105   : > { %v4329_v13 = vadd.f32 %v3070_v39, %v3069_v49  ;;  %v941_v39 = vld [vmem:[#allocation2 + $0x158] sm:$0xff] }
 0x106   : > { %v3138_v10 = vpop.f32.mrb[4].mxu1  ;;  %3533 = vmatmul.mubr.bf16.vlgmr.msra.gmra.mrb[112].mxu0 %v1077_v4 }
 0x107   : > { %v3139_v25 = vpop.f32.mrb[5].mxu1  ;;  %3536 = vmatprep.mubr.bf16.mxu0 %v4152_v50 }
 0x108   : > { %v4327_v57 = vadd.f32 %v3139_v25, %v3138_v10  ;;  %v3141_v12 = vpop.f32.mrb[6].mxu1  ;;  %v940_v25 = vld [vmem:[#allocation2 + $0x150] sm:$0xff] }
 0x109   : > { %v3142_v41 = vpop.f32.mrb[7].mxu1  ;;  %v3072_v55 = vpop.f32.mrb[8].mxu0 }
 0x10a   : > { %v4331_v16 = vadd.f32 %v3142_v41, %v3141_v12  ;;  %v3073_v0 = vpop.f32.mrb[9].mxu0 }
 0x10b   : > { %2408 = vmatmul.mubr.bf16.gmra.mrb[112].mxu1 %v4180_v45  ;;  %v4336_v46 = vadd.f32 %v3073_v0, %v3072_v55  ;;  %v3075_v61 = vpop.f32.mrb[10].mxu0 }
 0x10c   : > { %2415 = vmatprep.mubr.bf16.mxu1 %v4186_v56  ;;  %v3076_v40 = vpop.f32.mrb[11].mxu0 }
 0x10d   : > { %v4340_v51 = vadd.f32 %v3076_v40, %v3075_v61 }
 0x10e   : > { %v3144_v31 = vpop.f32.mrb[8].mxu1  ;;  %3537 = vmatmul.mubr.bf16.gmra.mrb[116].mxu0 %v4174_v34 }
 0x10f   : > { %v3145_v1 = vpop.f32.mrb[9].mxu1  ;;  %3540 = vmatprep.mubr.bf16.mxu0 %v4188_v58 }
 0x110   : > { %v4338_v43 = vadd.f32 %v3145_v1, %v3144_v31  ;;  %v3147_v38 = vpop.f32.mrb[10].mxu1  ;;  %v960_v31 = vpack.c.bf16 %v941_v39, %v940_v25 }
 0x111   : > { %v3148_v6 = vpop.f32.mrb[11].mxu1  ;;  %v3078_v45 = vpop.f32.mrb[12].mxu0 }
 0x112   : > { %v4343_v50 = vadd.f32 %v3148_v6, %v3147_v38  ;;  %v3079_v56 = vpop.f32.mrb[13].mxu0  ;;  %v942_v6 = vld [vmem:[#allocation2 + $0x168] sm:$0xff] }
 0x113   : > { %2416 = vmatmul.mubr.bf16.gmra.mrb[116].mxu1 %v4194_v11  ;;  %v4348_v48 = vadd.f32 %v3079_v56, %v3078_v45  ;;  %v3081_v24 = vpop.f32.mrb[14].mxu0  ;;  %v943_v45 = vld [vmem:[#allocation2 + $0x170] sm:$0xff] }
 0x114   : > { %2423 = vmatprep.mubr.bf16.mxu1 %v4288_v17  ;;  %v3082_v29 = vpop.f32.mrb[15].mxu0 }
 0x115   : > { %v4352_v34 = vadd.f32 %v3082_v29, %v3081_v24  ;;  %v961_v29 = vpack.c.bf16 %v943_v45, %v942_v6 }
 0x116   : > { %v3150_v9 = vpop.f32.mrb[12].mxu1  ;;  %3541 = vmatmul.mubr.bf16.gmra.mrb[120].mxu0 %v4196_v14 }
 0x117   : > { %v3151_v52 = vpop.f32.mrb[13].mxu1  ;;  %3544 = vmatprep.mubr.bf16.mxu0 %v4204_v22 }
 0x118   : > { %v4350_v60 = vadd.f32 %v3151_v52, %v3150_v9  ;;  %v3153_v5 = vpop.f32.mrb[14].mxu1 }
 0x119   : > { %v3154_v15 = vpop.f32.mrb[15].mxu1  ;;  %v3084_v11 = vpop.f32.mrb[16].mxu0 }
 0x11a   : > { %v4355_v58 = vadd.f32 %v3154_v15, %v3153_v5  ;;  %v3085_v17 = vpop.f32.mrb[17].mxu0 }
 0x11b   : > { %2424 = vmatmul.mubr.bf16.gmra.mrb[120].mxu1 %v4234_v36  ;;  %v4360_v8 = vadd.f32 %v3085_v17, %v3084_v11  ;;  %v3087_v42 = vpop.f32.mrb[18].mxu0 }
 0x11c   : > { %2431 = vmatprep.mubr.bf16.mxu1 %v4294_v32  ;;  %v3088_v35 = vpop.f32.mrb[19].mxu0 }
 0x11d   : > { %v4362_v10 = vadd.f32 %v3088_v35, %v3087_v42  ;;  %v1011_v35 = vld [vmem:[#allocation2 + $0x1a1] sm:$0xff] }
 0x11e   : > { %v3172_v26 = vpop.f32.mrb[16].mxu1  ;;  %3545 = vmatmul.mubr.bf16.gmra.mrb[124].mxu0 %v4217_v59 }
 0x11f   : > { %v3173_v19 = vpop.f32.mrb[17].mxu1  ;;  %3548 = vmatprep.mubr.bf16.mxu0 %v4229_v27 }
 0x120   : > { %v3174_v3 = vadd.f32 %v3173_v19, %v3172_v26  ;;  %v3175_v4 = vpop.f32.mrb[18].mxu1  ;;  %v1010_v19 = vld [vmem:[#allocation2 + $0x199] sm:$0xff] }
 0x121   : > { %v3176_v14 = vpop.f32.mrb[19].mxu1  ;;  %v3090_v49 = vpop.f32.mrb[20].mxu0 }
 0x122   : > { %v4366_v22 = vadd.f32 %v3174_v3, %v4314_v54  ;;  %v3177_v36 = vadd.f32 %v3176_v14, %v3175_v4  ;;  %v3091_v12 = vpop.f32.mrb[21].mxu0 }
 0x123   : > { %2432 = vmatmul.mubr.bf16.gmra.mrb[124].mxu1 %v4248_v47  ;;  %v4374_v55 = vadd.f32 %v3091_v12, %v3090_v49  ;;  %v3093_v59 = vpop.f32.mrb[22].mxu0  ;;  %v1074_v12 = vld [vmem:[#allocation2 + $0x19a] sm:$0xff] }
 0x124   : > { %v4371_v32 = vadd.f32 %v3177_v36, %v4318_v2  ;;  %2439 = vmatprep.mubr.bf16.mxu1 %v4300_v37  ;;  %v3094_v0 = vpop.f32.mrb[23].mxu0 }
 0x125   : > { %v4376_v1 = vadd.f32 %v3094_v0, %v3093_v59 }
 0x126   : > { %v3178_v41 = vpop.f32.mrb[20].mxu1  ;;  %3549 = vmatmul.mubr.bf16.gmra.mrb[128].mxu0 %v4243_v33 }
 0x127   : > { %v3179_v54 = vpop.f32.mrb[21].mxu1  ;;  %3552 = vmatprep.mubr.bf16.mxu0 %v4254_v53 }
 0x128   : > { %v3180_v61 = vadd.f32 %v3179_v54, %v3178_v41  ;;  %v3181_v27 = vpop.f32.mrb[22].mxu1  ;;  %v1075_v41 = vld [vmem:[#allocation2 + $0x1a2] sm:$0xff] }
 0x129   : > { %v3182_v47 = vpop.f32.mrb[23].mxu1  ;;  %v3096_v38 = vpop.f32.mrb[24].mxu0 }
 0x12a   : > { %v4380_v2 = vadd.f32 %v3180_v61, %v4325_v23  ;;  %v3183_v37 = vadd.f32 %v3182_v47, %v3181_v27  ;;  %v3097_v56 = vpop.f32.mrb[25].mxu0 }
 0x12b   : > { %2440 = vmatmul.mubr.bf16.gmra.mrb[128].mxu1 %v960_v31  ;;  %v4387_v24 = vadd.f32 %v3097_v56, %v3096_v38  ;;  %v3099_v33 = vpop.f32.mrb[26].mxu0  ;;  %v1091_v31 = vpack.c.bf16 %v1075_v41, %v1074_v12 }
 0x12c   : > { %v4384_v40 = vadd.f32 %v3183_v37, %v4329_v13  ;;  %2447 = vmatprep.mubr.bf16.mxu1 %v4306_v30  ;;  %v3100_v23 = vpop.f32.mrb[27].mxu0  ;;  %v3661_v37 = vld [vmem:[#allocation2] sm:$0xff] }
 0x12d   : > { %v4389_v53 = vadd.f32 %v3100_v23, %v3099_v33  ;;  %v963_v38 = vpack.c.bf16 %v3661_v37, %v3661_v37 }
 0x12e   : > { %v3184_v9 = vpop.f32.mrb[24].mxu1  ;;  %3553 = vmatmul.mubr.bf16.gmra.mrb[132].mxu0 %v4260_v62 }
 0x12f   : > { %v3185_v52 = vpop.f32.mrb[25].mxu1  ;;  %3556 = vmatprep.mubr.bf16.mxu0 %v4266_v20  ;;  %v1027_v20 = vpack.c.bf16 %v1011_v35, %v1010_v19 }
 0x130   : > { %v3186_v5 = vadd.f32 %v3185_v52, %v3184_v9  ;;  %v3187_v15 = vpop.f32.mrb[26].mxu1 }
 0x131   : > { %v3188_v11 = vpop.f32.mrb[27].mxu1  ;;  %v3102_v26 = vpop.f32.mrb[28].mxu0 }
 0x132   : > { %v4393_v13 = vadd.f32 %v3186_v5, %v4336_v46  ;;  %v3189_v30 = vadd.f32 %v3188_v11, %v3187_v15  ;;  %v3103_v42 = vpop.f32.mrb[29].mxu0 }
 0x133   : > { %2448 = vmatmul.mubr.bf16.gmra.mrb[132].mxu1 %v961_v29  ;;  %v4400_v4 = vadd.f32 %v3103_v42, %v3102_v26  ;;  %v3105_v62 = vpop.f32.mrb[30].mxu0 }
 0x134   : > { %v4397_v17 = vadd.f32 %v3189_v30, %v4340_v51  ;;  %2455 = vmatprep.mubr.bf16.mxu1 %v4199_v18  ;;  %v3106_v46 = vpop.f32.mrb[31].mxu0 }
 0x135   : > { %v4402_v25 = vadd.f32 %v3106_v46, %v3105_v62 }
 0x136   : > { %v3190_v3 = vpop.f32.mrb[28].mxu1  ;;  %3557 = vmatmul.mubr.bf16.gmra.mrb[136].mxu0 %v4274_v21 }
 0x137   : > { %v3191_v14 = vpop.f32.mrb[29].mxu1  ;;  %3560 = vmatprep.mubr.bf16.mxu0 %v4308_v63 }
 0x138   : > { %v3192_v36 = vadd.f32 %v3191_v14, %v3190_v3  ;;  %v3193_v49 = vpop.f32.mrb[30].mxu1 }
 0x139   : > { %v3194_v39 = vpop.f32.mrb[31].mxu1  ;;  %v3108_v54 = vpop.f32.mrb[32].mxu0 }
 0x13a   : > { %v4406_v51 = vadd.f32 %v3192_v36, %v4348_v48  ;;  %v3195_v18 = vadd.f32 %v3194_v39, %v3193_v49  ;;  %v3109_v0 = vpop.f32.mrb[33].mxu0 }
 0x13b   : > { %2456 = vmatmul.mubr.bf16.gmra.mrb[136].mxu1 %v4268_v44  ;;  %v4413_v27 = vadd.f32 %v3109_v0, %v3108_v54  ;;  %v3111_v21 = vpop.f32.mrb[34].mxu0 }
 0x13c   : > { %v4411_v59 = vadd.f32 %v3195_v18, %v4352_v34  ;;  %2463 = vmatprep.mubr.bf16.mxu1 %v1027_v20  ;;  %v3112_v47 = vpop.f32.mrb[35].mxu0 }
 0x13d   : > { %v4415_v45 = vadd.f32 %v3112_v47, %v3111_v21 }
 0x13e   : > { %v3196_v61 = vpop.f32.mrb[32].mxu1  ;;  %3561 = vmatmul.mubr.bf16.gmra.mrb[140].mxu0 %v1091_v31 }
 0x13f   : > { %v3197_v48 = vpop.f32.mrb[33].mxu1 }
 0x140   : > { %v3198_v63 = vadd.f32 %v3197_v48, %v3196_v61  ;;  %v3199_v6 = vpop.f32.mrb[34].mxu1 }
 0x141   : > { %v3200_v44 = vpop.f32.mrb[35].mxu1  ;;  %v3114_v33 = vpop.f32.mrb[36].mxu0 }
 0x142   : > { %v4418_v34 = vadd.f32 %v3198_v63, %v4360_v8  ;;  %v3201_v56 = vadd.f32 %v3200_v44, %v3199_v6  ;;  %v3115_v52 = vpop.f32.mrb[37].mxu0 }
 0x143   : > { %2464 = vmatmul.mubr.bf16.gmra.mrb[140].mxu1 %v963_v38  ;;  %v4423_v29 = vadd.f32 %v3115_v52, %v3114_v33  ;;  %v3117_v5 = vpop.f32.mrb[38].mxu0 }
 0x144   : > { %v4421_v9 = vadd.f32 %v3201_v56, %v4362_v10  ;;  %v3118_v11 = vpop.f32.mrb[39].mxu0 }
 0x145   : > { %v4425_v42 = vadd.f32 %v3118_v11, %v3117_v5 }
 0x146   : > { %v3202_v23 = vpop.f32.mrb[36].mxu1 }
 0x147   : > { %v3203_v15 = vpop.f32.mrb[37].mxu1 }
 0x148   : > { %v3204_v30 = vadd.f32 %v3203_v15, %v3202_v23  ;;  %v3205_v26 = vpop.f32.mrb[38].mxu1 }
 0x149   : > { %v3206_v19 = vpop.f32.mrb[39].mxu1  ;;  %v3120_v3 = vpop.f32.mrb[40].mxu0 }
 0x14a   : > { %v4428_v8 = vadd.f32 %v3204_v30, %v4374_v55  ;;  %v3207_v35 = vadd.f32 %v3206_v19, %v3205_v26  ;;  %v3121_v62 = vpop.f32.mrb[41].mxu0 }
 0x14b   : > { %v4433_v46 = vadd.f32 %v3121_v62, %v3120_v3  ;;  %v3123_v36 = vpop.f32.mrb[42].mxu0 }
 0x14c   : > { %v4431_v10 = vadd.f32 %v3207_v35, %v4376_v1  ;;  %v3124_v20 = vpop.f32.mrb[43].mxu0 }
 0x14d   : > { %v4435_v12 = vadd.f32 %v3124_v20, %v3123_v36 }
 0x14e   : > { %v3208_v14 = vpop.f32.mrb[40].mxu1 }
 0x14f   : > { %v3209_v49 = vpop.f32.mrb[41].mxu1 }
 0x150   : > { %v3210_v39 = vadd.f32 %v3209_v49, %v3208_v14  ;;  %v3211_v18 = vpop.f32.mrb[42].mxu1 }
 0x151   : > { %v3212_v41 = vpop.f32.mrb[43].mxu1  ;;  %v3126_v0 = vpop.f32.mrb[44].mxu0 }
 0x152   : > { %v4438_v55 = vadd.f32 %v3210_v39, %v4387_v24  ;;  %v3213_v54 = vadd.f32 %v3212_v41, %v3211_v18  ;;  %v3127_v31 = vpop.f32.mrb[45].mxu0 }
 0x153   : > { %v4443_v21 = vadd.f32 %v3127_v31, %v3126_v0  ;;  %v3129_v48 = vpop.f32.mrb[46].mxu0 }
 0x154   : > { %v4441_v1 = vadd.f32 %v3213_v54, %v4389_v53  ;;  %v3130_v37 = vpop.f32.mrb[47].mxu0 }
 0x155   : > { %v4445_v6 = vadd.f32 %v3130_v37, %v3129_v48 }
 0x156   : > { %v3214_v61 = vpop.f32.mrb[44].mxu1 }
 0x157   : > { %v3215_v47 = vpop.f32.mrb[45].mxu1 }
 0x158   : > { %v3216_v38 = vadd.f32 %v3215_v47, %v3214_v61  ;;  %v3217_v63 = vpop.f32.mrb[46].mxu1 }
 0x159   : > { %v3218_v44 = vpop.f32.mrb[47].mxu1  ;;  %v3284_v33 = vpop.f32.mrb[48].mxu0 }
 0x15a   : > { %v4448_v24 = vadd.f32 %v3216_v38, %v4400_v4  ;;  %v3219_v56 = vadd.f32 %v3218_v44, %v3217_v63  ;;  %v3285_v52 = vpop.f32.mrb[49].mxu0 }
 0x15b   : > { %v3286_v5 = vadd.f32 %v3285_v52, %v3284_v33  ;;  %v3287_v15 = vpop.f32.mrb[50].mxu0 }
 0x15c   : > { %v4451_v53 = vadd.f32 %v3219_v56, %v4402_v25  ;;  %v3288_v30 = vpop.f32.mrb[51].mxu0 }
 0x15d   : > { %v4454_v19 = vadd.f32 %v3286_v5, %v4366_v22  ;;  %v3289_v3 = vadd.f32 %v3288_v30, %v3287_v15 }
 0x15e   : > { %v3220_v23 = vpop.f32.mrb[48].mxu1 }
 0x15f   : > { %v3221_v11 = vpop.f32.mrb[49].mxu1  ;;  %v4460_v25 = vadd.f32 %v3289_v3, %v4371_v32 }
 0x160   : > { %v3222_v26 = vadd.f32 %v3221_v11, %v3220_v23  ;;  %v3223_v35 = vpop.f32.mrb[50].mxu1 }
 0x161   : > { %v3224_v62 = vpop.f32.mrb[51].mxu1  ;;  %v3290_v49 = vpop.f32.mrb[52].mxu0 }
 0x162   : > { %v4457_v4 = vadd.f32 %v3222_v26, %v4413_v27  ;;  %v3225_v14 = vadd.f32 %v3224_v62, %v3223_v35  ;;  %v3291_v20 = vpop.f32.mrb[53].mxu0 }
 0x163   : > { %v3292_v18 = vadd.f32 %v3291_v20, %v3290_v49  ;;  %v3293_v41 = vpop.f32.mrb[54].mxu0 }
 0x164   : > { %v4463_v36 = vadd.f32 %v3225_v14, %v4415_v45  ;;  %v3294_v54 = vpop.f32.mrb[55].mxu0 }
 0x165   : > { %v4466_v31 = vadd.f32 %v3292_v18, %v4380_v2  ;;  %v3295_v61 = vadd.f32 %v3294_v54, %v3293_v41 }
 0x166   : > { %v3226_v39 = vpop.f32.mrb[52].mxu1 }
 0x167   : > { %v3227_v22 = vpop.f32.mrb[53].mxu1  ;;  %v4472_v45 = vadd.f32 %v3295_v61, %v4384_v40 }
 0x168   : > { %v3228_v0 = vadd.f32 %v3227_v22, %v3226_v39  ;;  %v3229_v27 = vpop.f32.mrb[54].mxu1 }
 0x169   : > { %v3230_v48 = vpop.f32.mrb[55].mxu1  ;;  %v3296_v38 = vpop.f32.mrb[56].mxu0 }
 0x16a   : > { %v4469_v32 = vadd.f32 %v3228_v0, %v4423_v29  ;;  %v3231_v47 = vadd.f32 %v3230_v48, %v3229_v27  ;;  %v3297_v63 = vpop.f32.mrb[57].mxu0 }
 0x16b   : > { %v3298_v56 = vadd.f32 %v3297_v63, %v3296_v38  ;;  %v3299_v33 = vpop.f32.mrb[58].mxu0 }
 0x16c   : > { %v4475_v37 = vadd.f32 %v3231_v47, %v4425_v42  ;;  %v3300_v52 = vpop.f32.mrb[59].mxu0 }
 0x16d   : > { %v4478_v5 = vadd.f32 %v3298_v56, %v4393_v13  ;;  %v3301_v15 = vadd.f32 %v3300_v52, %v3299_v33 }
 0x16e   : > { %v3232_v44 = vpop.f32.mrb[56].mxu1 }
 0x16f   : > { %v3233_v2 = vpop.f32.mrb[57].mxu1  ;;  %v4484_v42 = vadd.f32 %v3301_v15, %v4397_v17 }
 0x170   : > { %v3234_v23 = vadd.f32 %v3233_v2, %v3232_v44  ;;  %v3235_v29 = vpop.f32.mrb[58].mxu1 }
 0x171   : > { %v3236_v11 = vpop.f32.mrb[59].mxu1  ;;  %v3302_v35 = vpop.f32.mrb[60].mxu0 }
 0x172   : > { %v4481_v40 = vadd.f32 %v3234_v23, %v4433_v46  ;;  %v3237_v30 = vadd.f32 %v3236_v11, %v3235_v29  ;;  %v3303_v3 = vpop.f32.mrb[61].mxu0 }
 0x173   : > { %v3304_v14 = vadd.f32 %v3303_v3, %v3302_v35  ;;  %v3305_v49 = vpop.f32.mrb[62].mxu0 }
 0x174   : > { %v4487_v26 = vadd.f32 %v3237_v30, %v4435_v12  ;;  %v3306_v20 = vpop.f32.mrb[63].mxu0 }
 0x175   : > { %v4490_v18 = vadd.f32 %v3304_v14, %v4406_v51  ;;  %v3307_v41 = vadd.f32 %v3306_v20, %v3305_v49 }
 0x176   : > { %v3238_v62 = vpop.f32.mrb[60].mxu1 }
 0x177   : > { %v3239_v13 = vpop.f32.mrb[61].mxu1  ;;  %v4496_v12 = vadd.f32 %v3307_v41, %v4411_v59 }
 0x178   : > { %v3240_v39 = vadd.f32 %v3239_v13, %v3238_v62  ;;  %v3241_v46 = vpop.f32.mrb[62].mxu1 }
 0x179   : > { %v3242_v22 = vpop.f32.mrb[63].mxu1  ;;  %v3308_v27 = vpop.f32.mrb[64].mxu0 }
 0x17a   : > { %v4493_v17 = vadd.f32 %v3240_v39, %v4443_v21  ;;  %v3243_v54 = vadd.f32 %v3242_v22, %v3241_v46  ;;  %v3309_v61 = vpop.f32.mrb[65].mxu0 }
 0x17b   : > { %v3310_v47 = vadd.f32 %v3309_v61, %v3308_v27  ;;  %v3311_v38 = vpop.f32.mrb[66].mxu0 }
 0x17c   : > { %v4499_v0 = vadd.f32 %v3243_v54, %v4445_v6  ;;  %v3312_v63 = vpop.f32.mrb[67].mxu0 }
 0x17d   : > { %v4502_v56 = vadd.f32 %v3310_v47, %v4418_v34  ;;  %v3313_v33 = vadd.f32 %v3312_v63, %v3311_v38 }
 0x17e   : > { %v3244_v48 = vpop.f32.mrb[64].mxu1 }
 0x17f   : > { %v3245_v51 = vpop.f32.mrb[65].mxu1  ;;  %v4508_v6 = vadd.f32 %v3313_v33, %v4421_v9 }
 0x180   : > { %v3246_v44 = vadd.f32 %v3245_v51, %v3244_v48  ;;  %v3247_v21 = vpop.f32.mrb[66].mxu1 }
 0x181   : > { %v3248_v2 = vpop.f32.mrb[67].mxu1  ;;  %v3314_v29 = vpop.f32.mrb[68].mxu0 }
 0x182   : > { %v4505_v59 = vadd.f32 %v3246_v44, %v4316_v7  ;;  %v3249_v52 = vadd.f32 %v3248_v2, %v3247_v21  ;;  %v3315_v15 = vpop.f32.mrb[69].mxu0 }
 0x183   : > { %v3316_v30 = vadd.f32 %v3315_v15, %v3314_v29  ;;  %v3317_v35 = vpop.f32.mrb[70].mxu0 }
 0x184   : > { %v4511_v23 = vadd.f32 %v3249_v52, %v4321_v28  ;;  %v3318_v3 = vpop.f32.mrb[71].mxu0 }
 0x185   : > { %v4514_v14 = vadd.f32 %v3316_v30, %v4428_v8  ;;  %v3319_v49 = vadd.f32 %v3318_v3, %v3317_v35 }
 0x186   : > { %v3250_v11 = vpop.f32.mrb[68].mxu1 }
 0x187   : > { %v3251_v34 = vpop.f32.mrb[69].mxu1  ;;  %v4520_v28 = vadd.f32 %v3319_v49, %v4431_v10 }
 0x188   : > { %v3252_v62 = vadd.f32 %v3251_v34, %v3250_v11  ;;  %v3253_v7 = vpop.f32.mrb[70].mxu1 }
 0x189   : > { %v3254_v13 = vpop.f32.mrb[71].mxu1  ;;  %v3320_v46 = vpop.f32.mrb[72].mxu0 }
 0x18a   : > { %v4517_v9 = vadd.f32 %v3252_v62, %v4327_v57  ;;  %v3255_v20 = vadd.f32 %v3254_v13, %v3253_v7  ;;  %v3321_v41 = vpop.f32.mrb[73].mxu0 }
 0x18b   : > { %v3322_v54 = vadd.f32 %v3321_v41, %v3320_v46  ;;  %v3323_v27 = vpop.f32.mrb[74].mxu0 }
 0x18c   : > { %v4523_v39 = vadd.f32 %v3255_v20, %v4331_v16  ;;  %v3324_v61 = vpop.f32.mrb[75].mxu0 }
 0x18d   : > { %v4526_v47 = vadd.f32 %v3322_v54, %v4438_v55  ;;  %v3325_v38 = vadd.f32 %v3324_v61, %v3323_v27 }
 0x18e   : > { %v3256_v22 = vpop.f32.mrb[72].mxu1 }
 0x18f   : > { %v3257_v8 = vpop.f32.mrb[73].mxu1  ;;  %v4532_v16 = vadd.f32 %v3325_v38, %v4441_v1 }
 0x190   : > { %v3258_v48 = vadd.f32 %v3257_v8, %v3256_v22  ;;  %v3259_v57 = vpop.f32.mrb[74].mxu1 }
 0x191   : > { %v3260_v51 = vpop.f32.mrb[75].mxu1  ;;  %v3326_v21 = vpop.f32.mrb[76].mxu0 }
 0x192   : > { %v4529_v10 = vadd.f32 %v3258_v48, %v4338_v43  ;;  %v3261_v63 = vadd.f32 %v3260_v51, %v3259_v57  ;;  %v3327_v33 = vpop.f32.mrb[77].mxu0 }
 0x193   : > { %v3328_v52 = vadd.f32 %v3327_v33, %v3326_v21  ;;  %v3329_v29 = vpop.f32.mrb[78].mxu0 }
 0x194   : > { %v4535_v44 = vadd.f32 %v3261_v63, %v4343_v50  ;;  %v3330_v15 = vpop.f32.mrb[79].mxu0 }
 0x195   : > { %v4538_v30 = vadd.f32 %v3328_v52, %v4448_v24  ;;  %v3331_v35 = vadd.f32 %v3330_v15, %v3329_v29 }
 0x196   : > { %v3262_v2 = vpop.f32.mrb[76].mxu1 }
 0x197   : > { %v3263_v55 = vpop.f32.mrb[77].mxu1  ;;  %v4544_v50 = vadd.f32 %v3331_v35, %v4451_v53 }
 0x198   : > { %v3264_v11 = vadd.f32 %v3263_v55, %v3262_v2  ;;  %v3265_v43 = vpop.f32.mrb[78].mxu1 }
 0x199   : > { %v3266_v34 = vpop.f32.mrb[79].mxu1  ;;  %v3332_v7 = vpop.f32.mrb[80].mxu0 }
 0x19a   : > { %v4541_v1 = vadd.f32 %v3264_v11, %v4350_v60  ;;  %v3267_v3 = vadd.f32 %v3266_v34, %v3265_v43  ;;  %v3333_v49 = vpop.f32.mrb[81].mxu0 }
 0x19b   : > { %v3334_v20 = vadd.f32 %v3333_v49, %v3332_v7  ;;  %v3335_v46 = vpop.f32.mrb[82].mxu0 }
 0x19c   : > { %v4547_v62 = vadd.f32 %v3267_v3, %v4355_v58  ;;  %v3336_v41 = vpop.f32.mrb[83].mxu0 }
 0x19d   : > { %v4550_v22 = vadd.f32 %v3334_v20, %v4457_v4  ;;  %v3337_v27 = vadd.f32 %v3336_v41, %v3335_v46 }
 0x19e   : > { %v3396_v13 = vpop.f32.mrb[80].mxu1 }
 0x19f   : > { %v3397_v24 = vpop.f32.mrb[81].mxu1  ;;  %v4553_v53 = vadd.f32 %v3337_v27, %v4463_v36 }
 0x1a0   : > { %v3398_v54 = vadd.f32 %v3397_v24, %v3396_v13  ;;  %v3399_v60 = vpop.f32.mrb[82].mxu1 }
 0x1a1   : > { %v3400_v8 = vpop.f32.mrb[83].mxu1  ;;  %v3338_v48 = vpop.f32.mrb[84].mxu0 }
 0x1a2   : > { %v3401_v61 = vadd.f32 %v3400_v8, %v3399_v60  ;;  %v4556_v58 = vadd.f32 %v3398_v54, %v4454_v19  ;;  %v3339_v38 = vpop.f32.mrb[85].mxu0 }
 0x1a3   : > { %v3340_v63 = vadd.f32 %v3339_v38, %v3338_v48  ;;  %v3341_v4 = vpop.f32.mrb[86].mxu0 }
 0x1a4   : > { %v4559_v57 = vadd.f32 %v3401_v61, %v4460_v25  ;;  %v3342_v33 = vpop.f32.mrb[87].mxu0 }
 0x1a5   : > { %v4562_v2 = vadd.f32 %v3340_v63, %v4469_v32  ;;  %v3343_v29 = vadd.f32 %v3342_v33, %v3341_v4 }
 0x1a6   : > { %v3402_v51 = vpop.f32.mrb[84].mxu1 }
 0x1a7   : > { %v3403_v21 = vpop.f32.mrb[85].mxu1  ;;  %v4565_v19 = vadd.f32 %v3343_v29, %v4475_v37 }
 0x1a8   : > { %v3404_v52 = vadd.f32 %v3403_v21, %v3402_v51  ;;  %v3405_v36 = vpop.f32.mrb[86].mxu1 }
 0x1a9   : > { %v3406_v55 = vpop.f32.mrb[87].mxu1  ;;  %v3344_v11 = vpop.f32.mrb[88].mxu0 }
 0x1aa   : > { %v3407_v15 = vadd.f32 %v3406_v55, %v3405_v36  ;;  %v4568_v25 = vadd.f32 %v3404_v52, %v4466_v31  ;;  %v3345_v35 = vpop.f32.mrb[89].mxu0 }
 0x1ab   : > { %v3346_v3 = vadd.f32 %v3345_v35, %v3344_v11  ;;  %v3347_v32 = vpop.f32.mrb[90].mxu0 }
 0x1ac   : > { %v4571_v43 = vadd.f32 %v3407_v15, %v4472_v45  ;;  %v3348_v49 = vpop.f32.mrb[91].mxu0 }
 0x1ad   : > { %v4574_v13 = vadd.f32 %v3346_v3, %v4481_v40  ;;  %v3349_v46 = vadd.f32 %v3348_v49, %v3347_v32 }
 0x1ae   : > { %v3408_v34 = vpop.f32.mrb[88].mxu1 }
 0x1af   : > { %v3409_v7 = vpop.f32.mrb[89].mxu1  ;;  %v4577_v31 = vadd.f32 %v3349_v46, %v4487_v26 }
 0x1b0   : > { %v3410_v20 = vadd.f32 %v3409_v7, %v3408_v34  ;;  %v3411_v37 = vpop.f32.mrb[90].mxu1 }
 0x1b1   : > { %v3412_v24 = vpop.f32.mrb[91].mxu1  ;;  %v3350_v54 = vpop.f32.mrb[92].mxu0 }
 0x1b2   : > { %v3413_v41 = vadd.f32 %v3412_v24, %v3411_v37  ;;  %v4580_v45 = vadd.f32 %v3410_v20, %v4478_v5  ;;  %v3351_v27 = vpop.f32.mrb[93].mxu0 }
 0x1b3   : > { %v3352_v61 = vadd.f32 %v3351_v27, %v3350_v54  ;;  %v3353_v40 = vpop.f32.mrb[94].mxu0 }
 0x1b4   : > { %v4583_v60 = vadd.f32 %v3413_v41, %v4484_v42  ;;  %v3354_v38 = vpop.f32.mrb[95].mxu0 }
 0x1b5   : > { %v4586_v51 = vadd.f32 %v3352_v61, %v4493_v17  ;;  %v3355_v4 = vadd.f32 %v3354_v38, %v3353_v40 }
 0x1b6   : > { %v3414_v8 = vpop.f32.mrb[92].mxu1 }
 0x1b7   : > { %v3415_v48 = vpop.f32.mrb[93].mxu1  ;;  %v4589_v5 = vadd.f32 %v3355_v4, %v4499_v0 }
 0x1b8   : > { %v3416_v63 = vadd.f32 %v3415_v48, %v3414_v8  ;;  %v3417_v26 = vpop.f32.mrb[94].mxu1 }
 0x1b9   : > { %v3418_v21 = vpop.f32.mrb[95].mxu1  ;;  %v3356_v52 = vpop.f32.mrb[96].mxu0 }
 0x1ba   : > { %v3419_v33 = vadd.f32 %v3418_v21, %v3417_v26  ;;  %v4592_v42 = vadd.f32 %v3416_v63, %v4490_v18  ;;  %v3357_v29 = vpop.f32.mrb[97].mxu0 }
 0x1bb   : > { %v3358_v15 = vadd.f32 %v3357_v29, %v3356_v52  ;;  %v3359_v17 = vpop.f32.mrb[98].mxu0 }
 0x1bc   : > { %v4595_v36 = vadd.f32 %v3419_v33, %v4496_v12  ;;  %v3360_v35 = vpop.f32.mrb[99].mxu0 }
 0x1bd   : > { %v4598_v34 = vadd.f32 %v3358_v15, %v4505_v59  ;;  %v3361_v32 = vadd.f32 %v3360_v35, %v3359_v17 }
 0x1be   : > { %v3420_v55 = vpop.f32.mrb[96].mxu1 }
 0x1bf   : > { %v3421_v11 = vpop.f32.mrb[97].mxu1  ;;  %v4601_v18 = vadd.f32 %v3361_v32, %v4511_v23 }
 0x1c0   : > { %v3422_v3 = vadd.f32 %v3421_v11, %v3420_v55  ;;  %v3423_v0 = vpop.f32.mrb[98].mxu1 }
 0x1c1   : > { %v3424_v7 = vpop.f32.mrb[99].mxu1  ;;  %v3362_v20 = vpop.f32.mrb[100].mxu0 }
 0x1c2   : > { %v3425_v49 = vadd.f32 %v3424_v7, %v3423_v0  ;;  %v4604_v12 = vadd.f32 %v3422_v3, %v4502_v56  ;;  %v3363_v46 = vpop.f32.mrb[101].mxu0 }
 0x1c3   : > { %v3364_v41 = vadd.f32 %v3363_v46, %v3362_v20  ;;  %v3365_v59 = vpop.f32.mrb[102].mxu0 }
 0x1c4   : > { %v4607_v37 = vadd.f32 %v3425_v49, %v4508_v6  ;;  %v3366_v27 = vpop.f32.mrb[103].mxu0 }
 0x1c5   : > { %v4610_v8 = vadd.f32 %v3364_v41, %v4517_v9  ;;  %v3367_v40 = vadd.f32 %v3366_v27, %v3365_v59 }
 0x1c6   : > { %v3426_v24 = vpop.f32.mrb[100].mxu1 }
 0x1c7   : > { %v3427_v54 = vpop.f32.mrb[101].mxu1  ;;  %v4613_v56 = vadd.f32 %v3367_v40, %v4523_v39 }
 0x1c8   : > { %v3428_v61 = vadd.f32 %v3427_v54, %v3426_v24  ;;  %v3429_v23 = vpop.f32.mrb[102].mxu1 }
 0x1c9   : > { %v3430_v48 = vpop.f32.mrb[103].mxu1  ;;  %v3368_v63 = vpop.f32.mrb[104].mxu0 }
 0x1ca   : > { %v3431_v38 = vadd.f32 %v3430_v48, %v3429_v23  ;;  %v4616_v6 = vadd.f32 %v3428_v61, %v4514_v14  ;;  %v3369_v4 = vpop.f32.mrb[105].mxu0 }
 0x1cb   : > { %v3370_v33 = vadd.f32 %v3369_v4, %v3368_v63  ;;  %v3371_v9 = vpop.f32.mrb[106].mxu0 }
 0x1cc   : > { %v4619_v26 = vadd.f32 %v3431_v38, %v4520_v28  ;;  %v3372_v29 = vpop.f32.mrb[107].mxu0 }
 0x1cd   : > { %v4622_v55 = vadd.f32 %v3370_v33, %v4529_v10  ;;  %v3373_v17 = vadd.f32 %v3372_v29, %v3371_v9 }
 0x1ce   : > { %v3432_v21 = vpop.f32.mrb[104].mxu1 }
 0x1cf   : > { %v3433_v52 = vpop.f32.mrb[105].mxu1  ;;  %v4625_v14 = vadd.f32 %v3373_v17, %v4535_v44 }
 0x1d0   : > { %v3434_v15 = vadd.f32 %v3433_v52, %v3432_v21  ;;  %v3435_v39 = vpop.f32.mrb[106].mxu1 }
 0x1d1   : > { %v3436_v11 = vpop.f32.mrb[107].mxu1  ;;  %v3374_v3 = vpop.f32.mrb[108].mxu0 }
 0x1d2   : > { %v3437_v35 = vadd.f32 %v3436_v11, %v3435_v39  ;;  %v4628_v28 = vadd.f32 %v3434_v15, %v4526_v47  ;;  %v3375_v32 = vpop.f32.mrb[109].mxu0 }
 0x1d3   : > { %v3376_v10 = vadd.f32 %v3375_v32, %v3374_v3  ;;  %v3377_v49 = vpop.f32.mrb[110].mxu0 }
 0x1d4   : > { %v4631_v0 = vadd.f32 %v3437_v35, %v4532_v16  ;;  %v3378_v46 = vpop.f32.mrb[111].mxu0 }
 0x1d5   : > { %v4634_v24 = vadd.f32 %v3376_v10, %v4541_v1  ;;  %v3379_v59 = vadd.f32 %v3378_v46, %v3377_v49 }
 0x1d6   : > { %v3438_v7 = vpop.f32.mrb[108].mxu1 }
 0x1d7   : > { %v3439_v20 = vpop.f32.mrb[109].mxu1  ;;  %v4638_v47 = vadd.f32 %v3379_v59, %v4547_v62 }
 0x1d8   : > { %v3440_v41 = vadd.f32 %v3439_v20, %v3438_v7  ;;  %v3441_v44 = vpop.f32.mrb[110].mxu1 }
 0x1d9   : > { %v3442_v54 = vpop.f32.mrb[111].mxu1  ;;  %v3534_v1 = vpop.f32.mrb[112].mxu0 }
 0x1da   : > { %v3443_v27 = vadd.f32 %v3442_v54, %v3441_v44  ;;  %v4641_v16 = vadd.f32 %v3440_v41, %v4538_v30  ;;  %v2515_v23 = vadd.f32 %v3534_v1, %v4568_v25  ;;  %v2506_v62 = vpop.f32.mrb[113].mxu0 }
 0x1db   : > { %v2507_v30 = vadd.f32 %v2506_v62, %v4556_v58  ;;  %v3535_v48 = vpop.f32.mrb[114].mxu0 }
 0x1dc   : > { %v4649_v61 = vadd.f32 %v3443_v27, %v4544_v50  ;;  %2635 = vst [vmem:[%s4646_s29 + $0x10] sm:$0xff] %v2515_v23  ;;  %v2518_v63 = vadd.f32 %v3535_v48, %v4571_v43  ;;  %v2509_v4 = vpop.f32.mrb[115].mxu0  ;;  %v2705_v39 = vmul.f32 %v2515_v23, %v2515_v23 }
 0x1dd   : > { %2633 = vst [vmem:[%s4646_s29] sm:$0xff] %v2507_v30  ;;  %v2510_v9 = vadd.f32 %v2509_v4, %v4559_v57  ;;  %v2703_v50 = vmul.f32 %v2507_v30, %v2507_v30 }
 0x1de   : > { %v3444_v40 = vpop.f32.mrb[112].mxu1  ;;  %2636 = vst [vmem:[%s4646_s29 + $0x18] sm:$0xff] %v2518_v63  ;;  %v2706_v32 = vmul.f32 %v2518_v63, %v2518_v63 }
 0x1df   : > { %v3445_v38 = vpop.f32.mrb[113].mxu1  ;;  %2634 = vst [vmem:[%s4646_s29 + $0x8] sm:$0xff] %v2510_v9  ;;  %v2665_v29 = vadd.f32 %v2510_v9, %v2507_v30  ;;  %v2704_v15 = vmul.f32 %v2510_v9, %v2510_v9 }
 0x1e0   : > { %v3446_v21 = vadd.f32 %v3445_v38, %v3444_v40  ;;  %v3447_v33 = vpop.f32.mrb[114].mxu1 }
 0x1e1   : > { %v3448_v52 = vpop.f32.mrb[115].mxu1  ;;  %v2666_v17 = vadd.f32 %v2665_v29, %v2515_v23  ;;  %v2735_v43 = vadd.f32 %v2704_v15, %v2703_v50  ;;  %v3538_v11 = vpop.f32.mrb[116].mxu0 }
 0x1e2   : > { %v3449_v25 = vadd.f32 %v3448_v52, %v3447_v33  ;;  %v4660_v58 = vadd.f32 %v3446_v21, %v4550_v22  ;;  %v2531_v57 = vadd.f32 %v3538_v11, %v4592_v42  ;;  %v2522_v3 = vpop.f32.mrb[117].mxu0 }
 0x1e3   : > { %v2736_v7 = vadd.f32 %v2735_v43, %v2705_v39  ;;  %v2523_v49 = vadd.f32 %v2522_v3, %v4580_v45  ;;  %v2667_v20 = vadd.f32 %v2666_v17, %v2518_v63  ;;  %v3539_v22 = vpop.f32.mrb[118].mxu0 }
 0x1e4   : > { %v4663_v35 = vadd.f32 %v3449_v25, %v4553_v53  ;;  %2639 = vst [vmem:[%s4646_s29 + $0x30] sm:$0xff] %v2531_v57  ;;  %v2534_v41 = vadd.f32 %v3539_v22, %v4595_v36  ;;  %v2525_v44 = vpop.f32.mrb[119].mxu0  ;;  %v2709_v63 = vmul.f32 %v2531_v57, %v2531_v57 }
 0x1e5   : > { %2637 = vst [vmem:[%s4646_s29 + $0x20] sm:$0xff] %v2523_v49  ;;  %v2668_v53 = vadd.f32 %v2667_v20, %v2523_v49  ;;  %v2707_v54 = vmul.f32 %v2523_v49, %v2523_v49  ;;  %v2737_v42 = vadd.f32 %v2736_v7, %v2706_v32  ;;  %v2526_v23 = vadd.f32 %v2525_v44, %v4583_v60 }
 0x1e6   : > { %v3450_v10 = vpop.f32.mrb[116].mxu1  ;;  %2640 = vst [vmem:[%s4646_s29 + $0x38] sm:$0xff] %v2534_v41  ;;  %v2710_v52 = vmul.f32 %v2534_v41, %v2534_v41 }
 0x1e7   : > { %v3451_v46 = vpop.f32.mrb[117].mxu1  ;;  %v2738_v62 = vadd.f32 %v2737_v42, %v2707_v54  ;;  %2638 = vst [vmem:[%s4646_s29 + $0x28] sm:$0xff] %v2526_v23  ;;  %v2669_v30 = vadd.f32 %v2668_v53, %v2526_v23  ;;  %v2708_v36 = vmul.f32 %v2526_v23, %v2526_v23 }
 0x1e8   : > { %v3452_v59 = vadd.f32 %v3451_v46, %v3450_v10  ;;  %v3453_v27 = vpop.f32.mrb[118].mxu1 }
 0x1e9   : > { %v3454_v1 = vpop.f32.mrb[119].mxu1  ;;  %v3542_v48 = vpop.f32.mrb[120].mxu0  ;;  %v2670_v4 = vadd.f32 %v2669_v30, %v2531_v57  ;;  %v2739_v21 = vadd.f32 %v2738_v62, %v2708_v36 }
 0x1ea   : > { %v3455_v45 = vadd.f32 %v3454_v1, %v3453_v27  ;;  %v4673_v40 = vadd.f32 %v3452_v59, %v4562_v2  ;;  %v2547_v33 = vadd.f32 %v3542_v48, %v4616_v6  ;;  %v2538_v60 = vpop.f32.mrb[121].mxu0 }
 0x1eb   : > { %v2539_v50 = vadd.f32 %v2538_v60, %v4604_v12  ;;  %v3543_v2 = vpop.f32.mrb[122].mxu0  ;;  %v2740_v25 = vadd.f32 %v2739_v21, %v2709_v63  ;;  %v2671_v15 = vadd.f32 %v2670_v4, %v2534_v41 }
 0x1ec   : > { %v4677_v38 = vadd.f32 %v3455_v45, %v4565_v19  ;;  %2643 = vst [vmem:[%s4646_s29 + $0x50] sm:$0xff] %v2547_v33  ;;  %v2550_v19 = vadd.f32 %v3543_v2, %v4619_v26  ;;  %v2541_v39 = vpop.f32.mrb[123].mxu0  ;;  %v2713_v46 = vmul.f32 %v2547_v33, %v2547_v33 }
 0x1ed   : > { %2641 = vst [vmem:[%s4646_s29 + $0x40] sm:$0xff] %v2539_v50  ;;  %v2711_v43 = vmul.f32 %v2539_v50, %v2539_v50  ;;  %v2542_v6 = vadd.f32 %v2541_v39, %v4607_v37  ;;  %v2672_v57 = vadd.f32 %v2671_v15, %v2539_v50  ;;  %v2741_v3 = vadd.f32 %v2740_v25, %v2710_v52 }
 0x1ee   : > { %v3456_v9 = vpop.f32.mrb[120].mxu1  ;;  %2644 = vst [vmem:[%s4646_s29 + $0x58] sm:$0xff] %v2550_v19 }
 0x1ef   : > { %v3457_v29 = vpop.f32.mrb[121].mxu1  ;;  %2642 = vst [vmem:[%s4646_s29 + $0x48] sm:$0xff] %v2542_v6  ;;  %v2712_v7 = vmul.f32 %v2542_v6, %v2542_v6  ;;  %v2742_v49 = vadd.f32 %v2741_v3, %v2711_v43  ;;  %v2673_v26 = vadd.f32 %v2672_v57, %v2542_v6 }
 0x1f0   : > { %v3458_v17 = vadd.f32 %v3457_v29, %v3456_v9  ;;  %v3459_v11 = vpop.f32.mrb[122].mxu1 }
 0x1f1   : > { %v3460_v12 = vpop.f32.mrb[123].mxu1  ;;  %v3546_v20 = vpop.f32.mrb[124].mxu0  ;;  %v2674_v37 = vadd.f32 %v2673_v26, %v2547_v33  ;;  %v2743_v41 = vadd.f32 %v2742_v49, %v2712_v7 }
 0x1f2   : > { %v3461_v32 = vadd.f32 %v3460_v12, %v3459_v11  ;;  %v4688_v10 = vadd.f32 %v3458_v17, %v4574_v13  ;;  %v2563_v44 = vadd.f32 %v3546_v20, %v4641_v16  ;;  %v2554_v59 = vpop.f32.mrb[125].mxu0  ;;  %v2714_v13 = vmul.f32 %v2550_v19, %v2550_v19 }
 0x1f3   : > { %v2555_v54 = vadd.f32 %v2554_v59, %v4628_v28  ;;  %v3547_v42 = vpop.f32.mrb[126].mxu0  ;;  %v2744_v27 = vadd.f32 %v2743_v41, %v2713_v46  ;;  %v2675_v23 = vadd.f32 %v2674_v37, %v2550_v19 }
 0x1f4   : > { %v4691_v22 = vadd.f32 %v3461_v32, %v4577_v31  ;;  %2647 = vst [vmem:[%s4646_s29 + $0x70] sm:$0xff] %v2563_v44  ;;  %v2566_v31 = vadd.f32 %v3547_v42, %v4649_v61  ;;  %v2557_v62 = vpop.f32.mrb[127].mxu0  ;;  %v2717_v2 = vmul.f32 %v2563_v44, %v2563_v44 }
 0x1f5   : > { %2645 = vst [vmem:[%s4646_s29 + $0x60] sm:$0xff] %v2555_v54  ;;  %v2715_v30 = vmul.f32 %v2555_v54, %v2555_v54  ;;  %v2558_v16 = vadd.f32 %v2557_v62, %v4631_v0  ;;  %v2676_v48 = vadd.f32 %v2675_v23, %v2555_v54  ;;  %v2745_v63 = vadd.f32 %v2744_v27, %v2714_v13 }
 0x1f6   : > { %v3462_v53 = vpop.f32.mrb[124].mxu1  ;;  %2648 = vst [vmem:[%s4646_s29 + $0x78] sm:$0xff] %v2566_v31  ;;  %v2718_v17 = vmul.f32 %v2566_v31, %v2566_v31 }
 0x1f7   : > { %v3463_v1 = vpop.f32.mrb[125].mxu1  ;;  %2646 = vst [vmem:[%s4646_s29 + $0x68] sm:$0xff] %v2558_v16  ;;  %v2716_v21 = vmul.f32 %v2558_v16, %v2558_v16  ;;  %v2746_v60 = vadd.f32 %v2745_v63, %v2715_v30  ;;  %v2677_v9 = vadd.f32 %v2676_v48, %v2558_v16 }
 0x1f8   : > { %v3464_v45 = vadd.f32 %v3463_v1, %v3462_v53  ;;  %v3465_v36 = vpop.f32.mrb[126].mxu1 }
 0x1f9   : > { %v3466_v28 = vpop.f32.mrb[127].mxu1  ;;  %v3550_v61 = vpop.f32.mrb[128].mxu0  ;;  %v2678_v52 = vadd.f32 %v2677_v9, %v2563_v44  ;;  %v2747_v25 = vadd.f32 %v2746_v60, %v2716_v21 }
 0x1fa   : > { %v3467_v4 = vadd.f32 %v3466_v28, %v3465_v36  ;;  %v2434_v33 = vadd.f32 %v3464_v45, %v4586_v51  ;;  %v2579_v0 = vadd.f32 %v3550_v61, %v4673_v40  ;;  %v2570_v29 = vpop.f32.mrb[129].mxu0 }
 0x1fb   : > { %v2571_v19 = vadd.f32 %v2570_v29, %v4660_v58  ;;  %v3551_v39 = vpop.f32.mrb[130].mxu0  ;;  %v2748_v43 = vadd.f32 %v2747_v25, %v2717_v2  ;;  %v2679_v11 = vadd.f32 %v2678_v52, %v2566_v31 }
 0x1fc   : > { %v2437_v50 = vadd.f32 %v3467_v4, %v4589_v5  ;;  %2651 = vst [vmem:[%s4646_s29 + $0x90] sm:$0xff] %v2579_v0  ;;  %v2582_v5 = vadd.f32 %v3551_v39, %v4677_v38  ;;  %v2573_v6 = vpop.f32.mrb[131].mxu0  ;;  %v2721_v44 = vmul.f32 %v2579_v0, %v2579_v0 }
 0x1fd   : > { %2649 = vst [vmem:[%s4646_s29 + $0x80] sm:$0xff] %v2571_v19  ;;  %v2719_v3 = vmul.f32 %v2571_v19, %v2571_v19  ;;  %v2574_v40 = vadd.f32 %v2573_v6, %v4663_v35  ;;  %v2680_v32 = vadd.f32 %v2679_v11, %v2571_v19  ;;  %v2749_v7 = vadd.f32 %v2748_v43, %v2718_v17 }
 0x1fe   : > { %v3468_v15 = vpop.f32.mrb[128].mxu1  ;;  %2652 = vst [vmem:[%s4646_s29 + $0x98] sm:$0xff] %v2582_v5  ;;  %v2722_v1 = vmul.f32 %v2582_v5, %v2582_v5 }
 0x1ff   : > { %v3469_v51 = vpop.f32.mrb[129].mxu1  ;;  %2650 = vst [vmem:[%s4646_s29 + $0x88] sm:$0xff] %v2574_v40  ;;  %v2720_v26 = vmul.f32 %v2574_v40, %v2574_v40  ;;  %v2750_v46 = vadd.f32 %v2749_v7, %v2719_v3  ;;  %v2681_v37 = vadd.f32 %v2680_v32, %v2574_v40 }
 0x200   : > { %v3470_v57 = vadd.f32 %v3469_v51, %v3468_v15  ;;  %v3471_v12 = vpop.f32.mrb[130].mxu1 }
 0x201   : > { %v3472_v58 = vpop.f32.mrb[131].mxu1  ;;  %v3554_v38 = vpop.f32.mrb[132].mxu0  ;;  %v2682_v59 = vadd.f32 %v2681_v37, %v2579_v0  ;;  %v2751_v53 = vadd.f32 %v2750_v46, %v2720_v26 }
 0x202   : > { %v3473_v49 = vadd.f32 %v3472_v58, %v3471_v12  ;;  %v2442_v20 = vadd.f32 %v3470_v57, %v4598_v34  ;;  %v2595_v35 = vadd.f32 %v3554_v38, %v2434_v33  ;;  %v2586_v54 = vpop.f32.mrb[133].mxu0 }
 0x203   : > { %v2587_v13 = vadd.f32 %v2586_v54, %v4688_v10  ;;  %v3555_v27 = vpop.f32.mrb[134].mxu0  ;;  %v2752_v23 = vadd.f32 %v2751_v53, %v2721_v44  ;;  %v2683_v31 = vadd.f32 %v2682_v59, %v2582_v5 }
 0x204   : > { %v2445_v41 = vadd.f32 %v3473_v49, %v4601_v18  ;;  %2655 = vst [vmem:[%s4646_s29 + $0xb0] sm:$0xff] %v2595_v35  ;;  %v2598_v62 = vadd.f32 %v3555_v27, %v2437_v50  ;;  %v2589_v45 = vpop.f32.mrb[135].mxu0  ;;  %v2725_v50 = vmul.f32 %v2595_v35, %v2595_v35 }
 0x205   : > { %2653 = vst [vmem:[%s4646_s29 + $0xa0] sm:$0xff] %v2587_v13  ;;  %v2723_v30 = vmul.f32 %v2587_v13, %v2587_v13  ;;  %v2590_v16 = vadd.f32 %v2589_v45, %v4691_v22  ;;  %v2684_v48 = vadd.f32 %v2683_v31, %v2587_v13  ;;  %v2753_v63 = vadd.f32 %v2752_v23, %v2722_v1 }
 0x206   : > { %v3474_v42 = vpop.f32.mrb[132].mxu1  ;;  %2656 = vst [vmem:[%s4646_s29 + $0xb8] sm:$0xff] %v2598_v62  ;;  %v2726_v19 = vmul.f32 %v2598_v62, %v2598_v62 }
 0x207   : > { %v3475_v34 = vpop.f32.mrb[133].mxu1  ;;  %2654 = vst [vmem:[%s4646_s29 + $0xa8] sm:$0xff] %v2590_v16  ;;  %v2724_v4 = vmul.f32 %v2590_v16, %v2590_v16  ;;  %v2754_v33 = vadd.f32 %v2753_v63, %v2723_v30  ;;  %v2685_v60 = vadd.f32 %v2684_v48, %v2590_v16 }
 0x208   : > { %v3476_v18 = vadd.f32 %v3475_v34, %v3474_v42  ;;  %v3477_v36 = vpop.f32.mrb[134].mxu1 }
 0x209   : > { %v3478_v10 = vpop.f32.mrb[135].mxu1  ;;  %v3558_v9 = vpop.f32.mrb[136].mxu0  ;;  %v2686_v2 = vadd.f32 %v2685_v60, %v2595_v35  ;;  %v2755_v52 = vadd.f32 %v2754_v33, %v2724_v4 }
 0x20a   : > { %v3479_v28 = vadd.f32 %v3478_v10, %v3477_v36  ;;  %v2450_v21 = vadd.f32 %v3476_v18, %v4610_v8  ;;  %v2602_v25 = vpop.f32.mrb[137].mxu0 }
 0x20b   : > { %v2603_v29 = vadd.f32 %v2602_v25, %v2442_v20  ;;  %v3559_v15 = vpop.f32.mrb[138].mxu0  ;;  %v2756_v39 = vadd.f32 %v2755_v52, %v2725_v50  ;;  %v2687_v17 = vadd.f32 %v2686_v2, %v2598_v62 }
 0x20c   : > { %v2453_v61 = vadd.f32 %v3479_v28, %v4613_v56  ;;  %v2611_v22 = vadd.f32 %v3558_v9, %v2450_v21  ;;  %v2605_v51 = vpop.f32.mrb[139].mxu0 }
 0x20d   : > { %2657 = vst [vmem:[%s4646_s29 + $0xc0] sm:$0xff] %v2603_v29  ;;  %v2727_v56 = vmul.f32 %v2603_v29, %v2603_v29  ;;  %v2606_v6 = vadd.f32 %v2605_v51, %v2445_v41  ;;  %v2688_v57 = vadd.f32 %v2687_v17, %v2603_v29  ;;  %v2757_v3 = vadd.f32 %v2756_v39, %v2726_v19 }
 0x20e   : > { %v3480_v0 = vpop.f32.mrb[136].mxu1  ;;  %2659 = vst [vmem:[%s4646_s29 + $0xd0] sm:$0xff] %v2611_v22  ;;  %v2614_v43 = vadd.f32 %v3559_v15, %v2453_v61  ;;  %v2729_v46 = vmul.f32 %v2611_v22, %v2611_v22 }
 0x20f   : > { %v3481_v8 = vpop.f32.mrb[137].mxu1  ;;  %2658 = vst [vmem:[%s4646_s29 + $0xc8] sm:$0xff] %v2606_v6  ;;  %v2728_v32 = vmul.f32 %v2606_v6, %v2606_v6  ;;  %v2758_v58 = vadd.f32 %v2757_v3, %v2727_v56  ;;  %v2689_v49 = vadd.f32 %v2688_v57, %v2606_v6 }
 0x210   : > { %v3482_v11 = vadd.f32 %v3481_v8, %v3480_v0  ;;  %v3483_v5 = vpop.f32.mrb[138].mxu1  ;;  %2660 = vst [vmem:[%s4646_s29 + $0xd8] sm:$0xff] %v2614_v43  ;;  %v2730_v35 = vmul.f32 %v2614_v43, %v2614_v43 }
 0x211   : > { %v3484_v12 = vpop.f32.mrb[139].mxu1  ;;  %v3562_v26 = vpop.f32.mrb[140].mxu0  ;;  %v2690_v37 = vadd.f32 %v2689_v49, %v2611_v22  ;;  %v2759_v38 = vadd.f32 %v2758_v58, %v2728_v32 }
 0x212   : > { %v3485_v40 = vadd.f32 %v3484_v12, %v3483_v5  ;;  %v2458_v7 = vadd.f32 %v3482_v11, %v4622_v55  ;;  %v2618_v44 = vpop.f32.mrb[141].mxu0 }
 0x213   : > { %v3563_v53 = vpop.f32.mrb[142].mxu0  ;;  %v2760_v54 = vadd.f32 %v2759_v38, %v2729_v46  ;;  %v2691_v13 = vadd.f32 %v2690_v37, %v2614_v43 }
 0x214   : > { %v2461_v20 = vadd.f32 %v3485_v40, %v4625_v14  ;;  %v2619_v59 = vadd.f32 %v2618_v44, %v2458_v7  ;;  %v2621_v27 = vpop.f32.mrb[143].mxu0 }
 0x215   : > { %v2761_v31 = vadd.f32 %v2760_v54, %v2730_v35 }
 0x216   : > { %v3486_v41 = vpop.f32.mrb[140].mxu1  ;;  %2661 = vst [vmem:[%s4646_s29 + $0xe0] sm:$0xff] %v2619_v59  ;;  %v2731_v1 = vmul.f32 %v2619_v59, %v2619_v59  ;;  %v2622_v34 = vadd.f32 %v2621_v27, %v2461_v20  ;;  %v2692_v14 = vadd.f32 %v2691_v13, %v2619_v59 }
 0x217   : > { %v3487_v42 = vpop.f32.mrb[141].mxu1 }
 0x218   : > { %v3488_v55 = vadd.f32 %v3487_v42, %v3486_v41  ;;  %v3489_v23 = vpop.f32.mrb[142].mxu1  ;;  %2662 = vst [vmem:[%s4646_s29 + $0xe8] sm:$0xff] %v2622_v34  ;;  %v2732_v30 = vmul.f32 %v2622_v34, %v2622_v34  ;;  %v2762_v36 = vadd.f32 %v2761_v31, %v2731_v1  ;;  %v2693_v16 = vadd.f32 %v2692_v14, %v2622_v34 }
 0x219   : > { %v3490_v62 = vpop.f32.mrb[143].mxu1 }
 0x21a   : > { %v2466_v45 = vadd.f32 %v3488_v55, %v4634_v24  ;;  %v3491_v18 = vadd.f32 %v3490_v62, %v3489_v23  ;;  %v2763_v10 = vadd.f32 %v2762_v36, %v2732_v30 }
 0x21c   : > { %v2627_v48 = vadd.f32 %v3562_v26, %v2466_v45  ;;  %v2469_v63 = vadd.f32 %v3491_v18, %v4638_v47 }
 0x21e   : > { %2663 = vst [vmem:[%s4646_s29 + $0xf0] sm:$0xff] %v2627_v48  ;;  %v2733_v28 = vmul.f32 %v2627_v48, %v2627_v48  ;;  %v2630_v4 = vadd.f32 %v3563_v53, %v2469_v63  ;;  %v2694_v21 = vadd.f32 %v2693_v16, %v2627_v48 }
 0x220   : > { %2664 = vst [vmem:[%s4646_s29 + $0xf8] sm:$0xff] %v2630_v4  ;;  %v2734_v33 = vmul.f32 %v2630_v4, %v2630_v4  ;;  %v2695_v60 = vadd.f32 %v2694_v21, %v2630_v4  ;;  %v2764_v9 = vadd.f32 %v2763_v10, %v2733_v28 }
 0x222   : > { %v2696_v24 = vrot.slane %v2695_v60, 4  ;;  %v2765_v61 = vadd.f32 %v2764_v9, %v2734_v33 }
 0x224   : > { %v2697_v50 = vadd.f32 %v2696_v24, %v2695_v60  ;;  %v2766_v2 = vrot.slane %v2765_v61, 4 }
 0x226   : > { %v2698_v52 = vrot.slane %v2697_v50, 2  ;;  %v2767_v22 = vadd.f32 %v2766_v2, %v2765_v61 }
 0x228   : > { %v2699_v25 = vadd.f32 %v2698_v52, %v2697_v50  ;;  %v2768_v0 = vrot.slane %v2767_v22, 2 }
 0x22a   : > { %v2700_v47 = vrot.slane %v2699_v25, 1  ;;  %v2769_v29 = vadd.f32 %v2768_v0, %v2767_v22 }
 0x22c   : > { %v2701_v15 = vadd.f32 %v2700_v47, %v2699_v25  ;;  %v2770_v19 = vrot.slane %v2769_v29, 1 }
 0x22e   : > { %2702 = vst [vmem:[%s265_s8] sm:$0x1] %v2701_v15  ;;  %v2771_v39 = vadd.f32 %v2770_v19, %v2769_v29 }
 0x230   : > { %2772 = vst [vmem:[%s268_s10] sm:$0x1] %v2771_v39 }
 0x231 PF: > { %s17_s21 = sadd.s32 1, %s3668_s21  }
 0x232   : > { %p14_p4 = scmp.ge.s32.totalorder %s17_s21, 4  }
 0x234   :  { %16 = sbr.rel (!%p14_p4) target bundleno = 1 (0x1), region = 92 }

</bundles_post_ra>
